<compile_context>
chip_gen: v7x
topology: tpu7x:2x2x1
jax: 0.10.0
libtpu: 0.0.40
codegen_flags: <defaults>
</compile_context>

<pallas_src>
import functools
import math

import jax
import jax.numpy as jnp
from jax.experimental import pallas as pl
from jax.experimental.pallas import tpu as pltpu

EPS = 1e-6

# bias / vector slab row indices (per layer)
_B_E0, _B_E1, _B_E2, _B_E3 = 0, 1, 2, 3
_B_Q1, _B_KV1, _B_O1, _B_L1 = 4, 5, 6, 7
_B_QKV2, _B_O2, _B_F1, _B_F2 = 8, 9, 10, 11
_LN1_A, _LN1_B, _LN2_A, _LN2_B = 12, 13, 14, 15
_N_BVEC = 16


# ----------------------------- in-kernel helpers -----------------------------

def _relu(z):
    return jnp.maximum(z, 0.0)


def _norm(z, alpha, bias):
    # PyTorch `Norm`: alpha * (z - mean) / (z.std(-1, unbiased=True) + eps) + bias
    mu = jnp.mean(z, axis=-1, keepdims=True)
    d = z - mu
    var = jnp.sum(d * d, axis=-1, keepdims=True) * (1.0 / (z.shape[-1] - 1))
    inv = pl.reciprocal(jnp.sqrt(var) + EPS)   # exact reciprocal (EUP slot);
    return alpha * (d * inv) + bias            # keeps the eps-on-std semantics


def _attention(q, k, v, batch, heads):
    """Scaled dot-product attention, head outputs concatenated (no out-proj).

    q: (batch*Sq, Dl), k/v: (batch*Skv, Dl), all f32 -> (batch*Sq, Dl).
    The score/softmax/value part is a small static per-head loop: the fully
    head-batched single-einsum form needs a two-batch-dim dot_general (or a
    (0,2,1,3) sublane transpose) that Mosaic does not reliably lower.
    # TODO(synk): fold heads into one (B*heads)-batched einsum once multi-batch
    # dot_general / sublane transposes lower cleanly on TPU.
    """
    d_model = q.shape[-1]
    dk = d_model // heads
    scale = 1.0 / math.sqrt(dk)
    sq = q.shape[0] // batch
    skv = k.shape[0] // batch
    q3 = q.reshape(batch, sq, d_model)
    k3 = k.reshape(batch, skv, d_model)
    v3 = v.reshape(batch, skv, d_model)

    outs = []
    for h in range(heads):                      # heads is small & static
        sl = slice(h * dk, (h + 1) * dk)
        s = jnp.einsum("bqd,bkd->bqk", q3[:, :, sl], k3[:, :, sl],
                       preferred_element_type=jnp.float32) * scale
        s = s - jnp.max(s, axis=-1, keepdims=True)
        e = jnp.exp(s)
        # approx reciprocal on the EUP: probability rows sum to 1 within ~1e-4.
        p = e * pl.reciprocal(jnp.sum(e, axis=-1, keepdims=True), approx=True)
        outs.append(jnp.einsum("bqk,bkd->bqd", p, v3[:, :, sl],
                               preferred_element_type=jnp.float32))
    # single lane-concat -> one full-contraction output-projection dot outside
    return jnp.concatenate(outs, axis=-1).reshape(batch * sq, d_model)


# --------------------------------- kernel ------------------------------------

def encoder_kernel(n_layers, heads, dims,
                   x_ref, pe_ref, src_ref,
                   we0_ref, we1_ref, we2_ref, we3_ref,
                   wq1_ref, wkv1_ref, wo1_ref, wl1_ref,
                   wqkv2_ref, wo2_ref, wf1_ref, wf2_ref,
                   b_ref, fn_ref, o_ref, x_state):
    B, S, Dl, M, Dop, C, Dm = dims
    c8, c4, c2 = C // 8, C // 4, C // 2
    l = pl.program_id(0)

    # layer 0: add the learnt positional encoding, fold batch into matmul rows
    @pl.when(l == 0)
    def _init():
        x_state[...] = (x_ref[...] + pe_ref[...][None]).reshape(B * S, Dl)

    def V(i, width):                      # (1, width) f32 bias / norm vector
        return b_ref[0, i:i + 1, :width]

    def mm(a, w3_ref):                    # bf16 (or f32) MXU matmul, f32 accum
        w = w3_ref[0]
        return jnp.dot(a.astype(w.dtype), w, preferred_element_type=jnp.float32)

    x2 = x_state[...]                                 # (B*S, Dl) f32
    src2 = src_ref[...].reshape(B * M, Dop)           # (B*M, Dop)

    # ---- embedder MLP: Dop -> C/8 -> C/4 -> C/2 -> C (per-layer weights) ----
    h = _relu(mm(src2, we0_ref) + V(_B_E0, c8))
    h = _relu(mm(h, we1_ref) + V(_B_E1, c4))
    h = _relu(mm(h, we2_ref) + V(_B_E2, c2))
    s_emb = mm(h, we3_ref) + V(_B_E3, C)              # (B*M, C)

    # ---- cross attention: q = x, k/v = embedded src (fused [Wk|Wv]) ----
    q = mm(x2, wq1_ref) + V(_B_Q1, Dl)
    kv = mm(s_emb, wkv1_ref) + V(_B_KV1, 2 * Dl)
    att = _attention(q, kv[:, :Dl], kv[:, Dl:], B, heads)
    latent = mm(att, wo1_ref) + V(_B_O1, C)           # (B*S, C)

    # ---- x = ln1(x + linear1(latent)) ----
    x2 = _norm(x2 + mm(latent, wl1_ref) + V(_B_L1, Dl),
               V(_LN1_A, Dl), V(_LN1_B, Dl))

    # ---- self attention on x (fused [Wq|Wk|Wv]) ----
    qkv = mm(x2, wqkv2_ref) + V(_B_QKV2, 3 * Dl)
    att2 = _attention(qkv[:, :Dl], qkv[:, Dl:2 * Dl], qkv[:, 2 * Dl:], B, heads)
    latent2 = mm(att2, wo2_ref) + V(_B_O2, Dl)

    # ---- feed forward + ln2 ----
    ff = mm(_relu(mm(latent2, wf1_ref) + V(_B_F1, Dm)), wf2_ref) + V(_B_F2, Dl)
    x2 = _norm(x2 + ff, V(_LN2_A, Dl), V(_LN2_B, Dl))

    x_state[...] = x2

    # final Norm of the Encoder, written once at the last layer
    @pl.when(l == n_layers - 1)
    def _final():
        fn = fn_ref[...]
        out = _norm(x2, fn[0:1, :], fn[1:2, :])
        # TODO(synk): a lane-dense (B, S*Dl) output layout needs a minormost-dim
        # reshape in-kernel (Mosaic relayout); the store happens once per
        # forward, so the module's (B, S, Dl) layout is kept.
        o_ref[...] = out.reshape(B, S, Dl).astype(o_ref.dtype)


# --------------------------------- wrapper -----------------------------------

def encoder_forward(x, src, params, heads, *, param_dtype=jnp.bfloat16):
    B, S, Dl = x.shape
    _, M, Do = src.shape
    N = params["we0"].shape[0]
    Dop = params["we0"].shape[1]
    C = params["we3"].shape[-1]
    Dm = params["wf1"].shape[-1]
    assert Dl % heads == 0

    # zero-pad src's feature dim to the padded embedder input width (the extra
    # embedder weight rows are zero, so this is numerically exact).
    src_p = jnp.pad(src, ((0, 0), (0, 0), (0, Dop - Do)))
    pe_s = params["pe"][:S]
    fn = jnp.stack([params["final_alpha"], params["final_bias"]], axis=0)

    w_names = ["we0", "we1", "we2", "we3", "wq1", "wkv1", "wo1", "wl1",
               "wqkv2", "wo2", "wf1", "wf2"]
    w_list = [params[n].astype(param_dtype) for n in w_names]   # MXU operands
    b_slab = params["bvec"].astype(jnp.float32)                 # VPU math in f32

    def const2(l): return (0, 0)
    def const3(l): return (0, 0, 0)
    def layer3(l): return (l, 0, 0)

    in_specs = ([pl.BlockSpec((B, S, Dl), const3),
                 pl.BlockSpec((S, Dl), const2),
                 pl.BlockSpec((B, M, Dop), const3)]
                + [pl.BlockSpec((1,) + tuple(w.shape[1:]), layer3) for w in w_list]
                + [pl.BlockSpec((1,) + tuple(b_slab.shape[1:]), layer3),
                   pl.BlockSpec((2, Dl), const2)])

    # ---- advisory cost estimate ----
    def mmf(m, k, n): return 2 * m * k * n
    per_layer = (mmf(B * M, Dop, C // 8) + mmf(B * M, C // 8, C // 4)
                 + mmf(B * M, C // 4, C // 2) + mmf(B * M, C // 2, C)
                 + mmf(B * S, Dl, Dl) + mmf(B * M, C, 2 * Dl)
                 + 2 * mmf(B * S, M, Dl)                 # cross scores + values
                 + mmf(B * S, Dl, C) + mmf(B * S, C, Dl)
                 + mmf(B * S, Dl, 3 * Dl) + 2 * mmf(B * S, S, Dl)
                 + mmf(B * S, Dl, Dl)
                 + mmf(B * S, Dl, Dm) + mmf(B * S, Dm, Dl))
    flops = int(N * per_layer)
    transcendentals = int(N * (heads * B * S * (M + S) + 6 * B * S))
    bytes_accessed = int(sum(int(a.size) * a.dtype.itemsize
                             for a in [x, pe_s, src_p, b_slab, fn] + w_list)
                         + int(x.size) * x.dtype.itemsize)

    # ---- VMEM budget: double-buffered per-layer params + I/O + state ----
    per_layer_bytes = (sum((int(w.size) // w.shape[0]) * w.dtype.itemsize
                           for w in w_list)
                       + (int(b_slab.size) // b_slab.shape[0]) * 4)
    io_bytes = (int(x.size) + int(src_p.size) + int(pe_s.size) + int(fn.size)) * 4 \
               + int(x.size) * 4 + B * S * Dl * 4
    vmem_limit = int(min(64 * 2 ** 20,
                         max(16 * 2 ** 20, 8 * (2 * per_layer_bytes + io_bytes))))

    kern = functools.partial(encoder_kernel, N, heads,
                             (B, S, Dl, M, Dop, C, Dm))
    return pl.pallas_call(
        kern,
        out_shape=jax.ShapeDtypeStruct((B, S, Dl), x.dtype),
        grid=(N,),
        in_specs=in_specs,
        out_specs=pl.BlockSpec((B, S, Dl), const3),
        scratch_shapes=[pltpu.VMEM((B * S, Dl), jnp.float32)],
        compiler_params=pltpu.CompilerParams(
            dimension_semantics=("arbitrary",),
            vmem_limit_bytes=vmem_limit),
        cost_estimate=pl.CostEstimate(flops=flops,
                                      transcendentals=transcendentals,
                                      bytes_accessed=bytes_accessed),
    )(x, pe_s, src_p, *w_list, b_slab, fn)
    # TODO(synk): the optional `weights=` attention-override path of
    # MultiHeadAttention is not implemented (Encoder is run with weights=None).


# ---------------------------- deterministic init ------------------------------

def _uniform_linear(key, fan_in, fan_out):
    kw, kb = jax.random.split(key)
    bound = 1.0 / math.sqrt(fan_in)
    w = jax.random.uniform(kw, (fan_in, fan_out), jnp.float32, -bound, bound)
    b = jax.random.uniform(kb, (fan_out,), jnp.float32, -bound, bound)
    return w, b


def init_encoder_params(key, *, n_layers, d_latent, d_channels, d_middle,
                        heads, d_origin, max_seq_len):
    c8, c4, c2 = d_channels // 8, d_channels // 4, d_channels // 2
    d_origin_pad = ((max(d_origin, 8) + 7) // 8) * 8
    wmax = ((max(d_channels, 3 * d_latent, d_middle) + 127) // 128) * 128

    k_pe, key = jax.random.split(key)
    layer_keys = jax.random.split(key, n_layers)

    names = ["we0", "we1", "we2", "we3", "wq1", "wkv1", "wo1", "wl1",
             "wqkv2", "wo2", "wf1", "wf2", "bvec"]
    stacked = {n: [] for n in names}

    def pad_vec(v):
        return jnp.zeros((wmax,), jnp.float32).at[:v.shape[0]].set(v)

    for lk in layer_keys:
        ks = jax.random.split(lk, 15)
        we0, be0 = _uniform_linear(ks[0], d_origin, c8)
        we1, be1 = _uniform_linear(ks[1], c8, c4)
        we2, be2 = _uniform_linear(ks[2], c4, c2)
        we3, be3 = _uniform_linear(ks[3], c2, d_channels)
        wq1, bq1 = _uniform_linear(ks[4], d_latent, d_latent)
        wk1, bk1 = _uniform_linear(ks[5], d_channels, d_latent)
        wv1, bv1 = _uniform_linear(ks[6], d_channels, d_latent)
        wo1, bo1 = _uniform_linear(ks[7], d_latent, d_channels)
        wl1, bl1 = _uniform_linear(ks[8], d_channels, d_latent)
        wq2, bq2 = _uniform_linear(ks[9], d_latent, d_latent)
        wk2, bk2 = _uniform_linear(ks[10], d_latent, d_latent)
        wv2, bv2 = _uniform_linear(ks[11], d_latent, d_latent)
        wo2, bo2 = _uniform_linear(ks[12], d_latent, d_latent)
        wf1, bf1 = _uniform_linear(ks[13], d_latent, d_middle)
        wf2, bf2 = _uniform_linear(ks[14], d_middle, d_latent)

        # pad the first embedder weight's rows (src feature dim 3 -> 8)
        we0_p = jnp.zeros((d_origin_pad, c8), jnp.float32).at[:d_origin].set(we0)
        # column-fuse k/v (cross-attn) and q/k/v (self-attn) projections
        wkv1 = jnp.concatenate([wk1, wv1], axis=1)
        bkv1 = jnp.concatenate([bk1, bv1], axis=0)
        wqkv2 = jnp.concatenate([wq2, wk2, wv2], axis=1)
        bqkv2 = jnp.concatenate([bq2, bk2, bv2], axis=0)

        ones = jnp.ones((d_latent,), jnp.float32)
        zeros = jnp.zeros((d_latent,), jnp.float32)
        bvec = jnp.stack([pad_vec(v) for v in
                          [be0, be1, be2, be3, bq1, bkv1, bo1, bl1,
                           bqkv2, bo2, bf1, bf2, ones, zeros, ones, zeros]])
        assert bvec.shape == (_N_BVEC, wmax)

        for name, arr in [("we0", we0_p), ("we1", we1), ("we2", we2),
                          ("we3", we3), ("wq1", wq1), ("wkv1", wkv1),
                          ("wo1", wo1), ("wl1", wl1), ("wqkv2", wqkv2),
                          ("wo2", wo2), ("wf1", wf1), ("wf2", wf2),
                          ("bvec", bvec)]:
            stacked[name].append(arr)

    params = {n: jnp.stack(v) for n, v in stacked.items()}
    params["pe"] = jax.random.normal(k_pe, (max_seq_len, d_latent), jnp.float32)
    params["final_alpha"] = jnp.ones((d_latent,), jnp.float32)
    params["final_bias"] = jnp.zeros((d_latent,), jnp.float32)
    return params


# ------------------------------------ main ------------------------------------

if __name__ == "__main__":
    # Small shapes consistent with the module (dropout = 0).
    B, S, M = 2, 8, 16
    d_latent, d_channels, d_middle = 32, 32, 64
    heads, d_origin, N, max_seq_len = 4, 3, 2, 8

    root = jax.random.PRNGKey(0)
    kx, ksrc, kparam = jax.random.split(root, 3)
    x = jax.random.normal(kx, (B, S, d_latent), jnp.float32)
    src = jax.random.normal(ksrc, (B, M, d_origin), jnp.float32)

    params = init_encoder_params(kparam, n_layers=N, d_latent=d_latent,
                                 d_channels=d_channels, d_middle=d_middle,
                                 heads=heads, d_origin=d_origin,
                                 max_seq_len=max_seq_len)

    out = encoder_forward(x, src, params, heads, param_dtype=jnp.bfloat16)
    out = jax.block_until_ready(out)
    assert out.shape == (B, S, d_latent), out.shape
    assert bool(jnp.all(jnp.isfinite(out)))
    print("KERNEL_OK")
</pallas_src>

<mosaic_0001>
module attributes {stable_mosaic.version = 11 : i64} {
  func.func @encoder_kernel(%arg0: i32, %arg1: memref<2x8x32xf32, #tpu.memory_space<vmem>>, %arg2: memref<8x32xf32, #tpu.memory_space<vmem>>, %arg3: memref<2x16x8xf32, #tpu.memory_space<vmem>>, %arg4: memref<1x8x4xbf16, #tpu.memory_space<vmem>>, %arg5: memref<1x4x8xbf16, #tpu.memory_space<vmem>>, %arg6: memref<1x8x16xbf16, #tpu.memory_space<vmem>>, %arg7: memref<1x16x32xbf16, #tpu.memory_space<vmem>>, %arg8: memref<1x32x32xbf16, #tpu.memory_space<vmem>>, %arg9: memref<1x32x64xbf16, #tpu.memory_space<vmem>>, %arg10: memref<1x32x32xbf16, #tpu.memory_space<vmem>>, %arg11: memref<1x32x32xbf16, #tpu.memory_space<vmem>>, %arg12: memref<1x32x96xbf16, #tpu.memory_space<vmem>>, %arg13: memref<1x32x32xbf16, #tpu.memory_space<vmem>>, %arg14: memref<1x32x64xbf16, #tpu.memory_space<vmem>>, %arg15: memref<1x64x32xbf16, #tpu.memory_space<vmem>>, %arg16: memref<1x16x128xf32, #tpu.memory_space<vmem>>, %arg17: memref<2x32xf32, #tpu.memory_space<vmem>>, %arg18: memref<2x8x32xf32, #tpu.memory_space<vmem>>, %arg19: memref<16x32xf32, #tpu.memory_space<vmem>>) attributes {dimension_semantics = [#tpu.dimension_semantics<arbitrary>], iteration_bounds = array<i64: 2>, scalar_prefetch = 0 : i64, scratch_operands = 1 : i64, tpu.core_type = #tpu.core_type<tc>, window_params = [{pipeline_mode = #tpu.pipeline_mode<synchronous>, transform_indices = @transform_0, window_bounds = array<i64: 2, 8, 32>}, {pipeline_mode = #tpu.pipeline_mode<synchronous>, transform_indices = @transform_1, window_bounds = array<i64: 8, 32>}, {pipeline_mode = #tpu.pipeline_mode<synchronous>, transform_indices = @transform_2, window_bounds = array<i64: 2, 16, 8>}, {transform_indices = @transform_3, window_bounds = array<i64: 1, 8, 4>}, {transform_indices = @transform_4, window_bounds = array<i64: 1, 4, 8>}, {transform_indices = @transform_5, window_bounds = array<i64: 1, 8, 16>}, {transform_indices = @transform_6, window_bounds = array<i64: 1, 16, 32>}, {transform_indices = @transform_7, window_bounds = array<i64: 1, 32, 32>}, {transform_indices = @transform_8, window_bounds = array<i64: 1, 32, 64>}, {transform_indices = @transform_9, window_bounds = array<i64: 1, 32, 32>}, {transform_indices = @transform_10, window_bounds = array<i64: 1, 32, 32>}, {transform_indices = @transform_11, window_bounds = array<i64: 1, 32, 96>}, {transform_indices = @transform_12, window_bounds = array<i64: 1, 32, 32>}, {transform_indices = @transform_13, window_bounds = array<i64: 1, 32, 64>}, {transform_indices = @transform_14, window_bounds = array<i64: 1, 64, 32>}, {transform_indices = @transform_15, window_bounds = array<i64: 1, 16, 128>}, {pipeline_mode = #tpu.pipeline_mode<synchronous>, transform_indices = @transform_16, window_bounds = array<i64: 2, 32>}, {pipeline_mode = #tpu.pipeline_mode<synchronous>, transform_indices = @transform_17, window_bounds = array<i64: 2, 8, 32>}]} {
    %c0_i32 = arith.constant 0 : i32
    %0 = arith.cmpi eq, %arg0, %c0_i32 : i32
    %1 = arith.extui %0 : i1 to i32
    %c0_i32_0 = arith.constant 0 : i32
    %2 = arith.cmpi ne, %1, %c0_i32_0 : i32
    scf.if %2 {
      %c0_142 = arith.constant 0 : index
      %c0_143 = arith.constant 0 : index
      %c0_144 = arith.constant 0 : index
      %317 = vector.load %arg1[%c0_142, %c0_143, %c0_144] : memref<2x8x32xf32, #tpu.memory_space<vmem>>, vector<2x8x32xf32>
      %c0_145 = arith.constant 0 : index
      %c0_146 = arith.constant 0 : index
      %318 = vector.load %arg2[%c0_145, %c0_146] : memref<8x32xf32, #tpu.memory_space<vmem>>, vector<8x32xf32>
      %319 = vector.shape_cast %318 : vector<8x32xf32> to vector<1x8x32xf32>
      %320 = vector.broadcast %319 : vector<1x8x32xf32> to vector<2x8x32xf32>
      %321 = arith.addf %317, %320 : vector<2x8x32xf32>
      %322 = vector.shape_cast %321 : vector<2x8x32xf32> to vector<16x32xf32>
      %c0_147 = arith.constant 0 : index
      %c0_148 = arith.constant 0 : index
      %323 = vector.load %arg19[%c0_147, %c0_148] : memref<16x32xf32, #tpu.memory_space<vmem>>, vector<16x32xf32>
      tpu.vector_store %arg19[%c0_147, %c0_148], %322 {strides = array<i32>} : memref<16x32xf32, #tpu.memory_space<vmem>>, vector<16x32xf32>,
    } else {
    }
    %c0 = arith.constant 0 : index
    %c0_1 = arith.constant 0 : index
    %3 = vector.load %arg19[%c0, %c0_1] : memref<16x32xf32, #tpu.memory_space<vmem>>, vector<16x32xf32>
    %c0_2 = arith.constant 0 : index
    %c0_3 = arith.constant 0 : index
    %c0_4 = arith.constant 0 : index
    %4 = vector.load %arg3[%c0_2, %c0_3, %c0_4] : memref<2x16x8xf32, #tpu.memory_space<vmem>>, vector<2x16x8xf32>
    %5 = vector.shape_cast %4 : vector<2x16x8xf32> to vector<32x8xf32>
    %c0_5 = arith.constant 0 : index
    %c0_6 = arith.constant 0 : index
    %c0_7 = arith.constant 0 : index
    %6 = vector.load %arg4[%c0_5, %c0_6, %c0_7] : memref<1x8x4xbf16, #tpu.memory_space<vmem>>, vector<1x8x4xbf16>
    %7 = vector.shape_cast %6 : vector<1x8x4xbf16> to vector<8x4xbf16>
    %8 = arith.truncf %5 : vector<32x8xf32> to vector<32x8xbf16>
    %cst = arith.constant dense<0.000000e+00> : vector<32x4xf32>
    %9 = tpu.matmul %8, %7, %cst {dimension_numbers = #tpu.dot_dimension_numbers<[1], [0], [0], [1], [0, 0, 1, 1], [], []>} : vector<32x8xbf16>, vector<8x4xbf16>, vector<32x4xf32> -> vector<32x4xf32>
    %c0_8 = arith.constant 0 : index
    %c0_9 = arith.constant 0 : index
    %c0_10 = arith.constant 0 : index
    %10 = vector.load %arg16[%c0_8, %c0_9, %c0_10] : memref<1x16x128xf32, #tpu.memory_space<vmem>>, vector<1x1x4xf32>
    %11 = vector.shape_cast %10 : vector<1x1x4xf32> to vector<1x4xf32>
    %12 = vector.broadcast %11 : vector<1x4xf32> to vector<32x4xf32>
    %13 = arith.addf %9, %12 : vector<32x4xf32>
    %cst_11 = arith.constant 0.000000e+00 : f32
    %14 = vector.broadcast %cst_11 : f32 to vector<32x4xf32>
    %15 = arith.maximumf %13, %14 : vector<32x4xf32>
    %c0_12 = arith.constant 0 : index
    %c0_13 = arith.constant 0 : index
    %c0_14 = arith.constant 0 : index
    %16 = vector.load %arg5[%c0_12, %c0_13, %c0_14] : memref<1x4x8xbf16, #tpu.memory_space<vmem>>, vector<1x4x8xbf16>
    %17 = vector.shape_cast %16 : vector<1x4x8xbf16> to vector<4x8xbf16>
    %18 = arith.truncf %15 : vector<32x4xf32> to vector<32x4xbf16>
    %cst_15 = arith.constant dense<0.000000e+00> : vector<32x8xf32>
    %19 = tpu.matmul %18, %17, %cst_15 {dimension_numbers = #tpu.dot_dimension_numbers<[1], [0], [0], [1], [0, 0, 1, 1], [], []>} : vector<32x4xbf16>, vector<4x8xbf16>, vector<32x8xf32> -> vector<32x8xf32>
    %c0_16 = arith.constant 0 : index
    %c1 = arith.constant 1 : index
    %c0_17 = arith.constant 0 : index
    %20 = vector.load %arg16[%c0_16, %c1, %c0_17] : memref<1x16x128xf32, #tpu.memory_space<vmem>>, vector<1x1x8xf32>
    %21 = vector.shape_cast %20 : vector<1x1x8xf32> to vector<1x8xf32>
    %22 = vector.broadcast %21 : vector<1x8xf32> to vector<32x8xf32>
    %23 = arith.addf %19, %22 : vector<32x8xf32>
    %cst_18 = arith.constant 0.000000e+00 : f32
    %24 = vector.broadcast %cst_18 : f32 to vector<32x8xf32>
    %25 = arith.maximumf %23, %24 : vector<32x8xf32>
    %c0_19 = arith.constant 0 : index
    %c0_20 = arith.constant 0 : index
    %c0_21 = arith.constant 0 : index
    %26 = vector.load %arg6[%c0_19, %c0_20, %c0_21] : memref<1x8x16xbf16, #tpu.memory_space<vmem>>, vector<1x8x16xbf16>
    %27 = vector.shape_cast %26 : vector<1x8x16xbf16> to vector<8x16xbf16>
    %28 = arith.truncf %25 : vector<32x8xf32> to vector<32x8xbf16>
    %cst_22 = arith.constant dense<0.000000e+00> : vector<32x16xf32>
    %29 = tpu.matmul %28, %27, %cst_22 {dimension_numbers = #tpu.dot_dimension_numbers<[1], [0], [0], [1], [0, 0, 1, 1], [], []>} : vector<32x8xbf16>, vector<8x16xbf16>, vector<32x16xf32> -> vector<32x16xf32>
    %c0_23 = arith.constant 0 : index
    %c2 = arith.constant 2 : index
    %c0_24 = arith.constant 0 : index
    %30 = vector.load %arg16[%c0_23, %c2, %c0_24] : memref<1x16x128xf32, #tpu.memory_space<vmem>>, vector<1x1x16xf32>
    %31 = vector.shape_cast %30 : vector<1x1x16xf32> to vector<1x16xf32>
    %32 = vector.broadcast %31 : vector<1x16xf32> to vector<32x16xf32>
    %33 = arith.addf %29, %32 : vector<32x16xf32>
    %cst_25 = arith.constant 0.000000e+00 : f32
    %34 = vector.broadcast %cst_25 : f32 to vector<32x16xf32>
    %35 = arith.maximumf %33, %34 : vector<32x16xf32>
    %c0_26 = arith.constant 0 : index
    %c0_27 = arith.constant 0 : index
    %c0_28 = arith.constant 0 : index
    %36 = vector.load %arg7[%c0_26, %c0_27, %c0_28] : memref<1x16x32xbf16, #tpu.memory_space<vmem>>, vector<1x16x32xbf16>
    %37 = vector.shape_cast %36 : vector<1x16x32xbf16> to vector<16x32xbf16>
    %38 = arith.truncf %35 : vector<32x16xf32> to vector<32x16xbf16>
    %cst_29 = arith.constant dense<0.000000e+00> : vector<32x32xf32>
    %39 = tpu.matmul %38, %37, %cst_29 {dimension_numbers = #tpu.dot_dimension_numbers<[1], [0], [0], [1], [0, 0, 1, 1], [], []>} : vector<32x16xbf16>, vector<16x32xbf16>, vector<32x32xf32> -> vector<32x32xf32>
    %c0_30 = arith.constant 0 : index
    %c3 = arith.constant 3 : index
    %c0_31 = arith.constant 0 : index
    %40 = vector.load %arg16[%c0_30, %c3, %c0_31] : memref<1x16x128xf32, #tpu.memory_space<vmem>>, vector<1x1x32xf32>
    %41 = vector.shape_cast %40 : vector<1x1x32xf32> to vector<1x32xf32>
    %42 = vector.broadcast %41 : vector<1x32xf32> to vector<32x32xf32>
    %43 = arith.addf %39, %42 : vector<32x32xf32>
    %c0_32 = arith.constant 0 : index
    %c0_33 = arith.constant 0 : index
    %c0_34 = arith.constant 0 : index
    %44 = vector.load %arg8[%c0_32, %c0_33, %c0_34] : memref<1x32x32xbf16, #tpu.memory_space<vmem>>, vector<1x32x32xbf16>
    %45 = vector.shape_cast %44 : vector<1x32x32xbf16> to vector<32x32xbf16>
    %46 = arith.truncf %3 : vector<16x32xf32> to vector<16x32xbf16>
    %cst_35 = arith.constant dense<0.000000e+00> : vector<16x32xf32>
    %47 = tpu.matmul %46, %45, %cst_35 {dimension_numbers = #tpu.dot_dimension_numbers<[1], [0], [0], [1], [0, 0, 1, 1], [], []>} : vector<16x32xbf16>, vector<32x32xbf16>, vector<16x32xf32> -> vector<16x32xf32>
    %c0_36 = arith.constant 0 : index
    %c4 = arith.constant 4 : index
    %c0_37 = arith.constant 0 : index
    %48 = vector.load %arg16[%c0_36, %c4, %c0_37] : memref<1x16x128xf32, #tpu.memory_space<vmem>>, vector<1x1x32xf32>
    %49 = vector.shape_cast %48 : vector<1x1x32xf32> to vector<1x32xf32>
    %50 = vector.broadcast %49 : vector<1x32xf32> to vector<16x32xf32>
    %51 = arith.addf %47, %50 : vector<16x32xf32>
    %c0_38 = arith.constant 0 : index
    %c0_39 = arith.constant 0 : index
    %c0_40 = arith.constant 0 : index
    %52 = vector.load %arg9[%c0_38, %c0_39, %c0_40] : memref<1x32x64xbf16, #tpu.memory_space<vmem>>, vector<1x32x64xbf16>
    %53 = vector.shape_cast %52 : vector<1x32x64xbf16> to vector<32x64xbf16>
    %54 = arith.truncf %43 : vector<32x32xf32> to vector<32x32xbf16>
    %cst_41 = arith.constant dense<0.000000e+00> : vector<32x64xf32>
    %55 = tpu.matmul %54, %53, %cst_41 {dimension_numbers = #tpu.dot_dimension_numbers<[1], [0], [0], [1], [0, 0, 1, 1], [], []>} : vector<32x32xbf16>, vector<32x64xbf16>, vector<32x64xf32> -> vector<32x64xf32>
    %c0_42 = arith.constant 0 : index
    %c5 = arith.constant 5 : index
    %c0_43 = arith.constant 0 : index
    %56 = vector.load %arg16[%c0_42, %c5, %c0_43] : memref<1x16x128xf32, #tpu.memory_space<vmem>>, vector<1x1x64xf32>
    %57 = vector.shape_cast %56 : vector<1x1x64xf32> to vector<1x64xf32>
    %58 = vector.broadcast %57 : vector<1x64xf32> to vector<32x64xf32>
    %59 = arith.addf %55, %58 : vector<32x64xf32>
    %60 = vector.extract_strided_slice %59 {offsets = [0, 0], sizes = [32, 32], strides = [1, 1]} : vector<32x64xf32> to vector<32x32xf32>
    %61 = vector.extract_strided_slice %59 {offsets = [0, 32], sizes = [32, 32], strides = [1, 1]} : vector<32x64xf32> to vector<32x32xf32>
    %62 = vector.shape_cast %51 : vector<16x32xf32> to vector<2x8x32xf32>
    %63 = vector.shape_cast %60 : vector<32x32xf32> to vector<2x16x32xf32>
    %64 = vector.shape_cast %61 : vector<32x32xf32> to vector<2x16x32xf32>
    %65 = vector.extract_strided_slice %62 {offsets = [0, 0, 0], sizes = [2, 8, 8], strides = [1, 1, 1]} : vector<2x8x32xf32> to vector<2x8x8xf32>
    %66 = vector.extract_strided_slice %63 {offsets = [0, 0, 0], sizes = [2, 16, 8], strides = [1, 1, 1]} : vector<2x16x32xf32> to vector<2x16x8xf32>
    "tpu.trace_start"() <{level = 10 : i32, message = "bqd,bkd->bqk"}> : () -> ()
    %cst_44 = arith.constant dense<0.000000e+00> : vector<2x8x16xf32>
    %67 = tpu.matmul %65, %66, %cst_44 {dimension_numbers = #tpu.dot_dimension_numbers<[2], [2], [1], [1], [0, 0, 0, 1, 1, 1], [0], [0]>} : vector<2x8x8xf32>, vector<2x16x8xf32>, vector<2x8x16xf32> -> vector<2x8x16xf32>
    "tpu.trace_stop"() : () -> ()
    %cst_45 = arith.constant 0.353553385 : f32
    %68 = vector.broadcast %cst_45 : f32 to vector<2x8x16xf32>
    %69 = arith.mulf %67, %68 : vector<2x8x16xf32>
    %cst_46 = arith.constant dense<0xFF800000> : vector<2x8xf32>
    %70 = vector.multi_reduction <maximumf>, %69, %cst_46 [2] : vector<2x8x16xf32> to vector<2x8xf32>
    %71 = vector.shape_cast %70 : vector<2x8xf32> to vector<2x8x1xf32>
    %72 = vector.broadcast %71 : vector<2x8x1xf32> to vector<2x8x16xf32>
    %73 = arith.subf %69, %72 : vector<2x8x16xf32>
    %74 = math.exp %73 : vector<2x8x16xf32>
    %cst_47 = arith.constant dense<0.000000e+00> : vector<2x8xf32>
    %75 = vector.multi_reduction <add>, %74, %cst_47 [2] : vector<2x8x16xf32> to vector<2x8xf32>
    %76 = vector.shape_cast %75 : vector<2x8xf32> to vector<2x8x1xf32>
    %77 = tpu.reciprocal %76 {approx = true} : vector<2x8x1xf32> -> vector<2x8x1xf32>
    %78 = vector.broadcast %77 : vector<2x8x1xf32> to vector<2x8x16xf32>
    %79 = arith.mulf %74, %78 : vector<2x8x16xf32>
    %80 = vector.extract_strided_slice %64 {offsets = [0, 0, 0], sizes = [2, 16, 8], strides = [1, 1, 1]} : vector<2x16x32xf32> to vector<2x16x8xf32>
    "tpu.trace_start"() <{level = 10 : i32, message = "bqk,bkd->bqd"}> : () -> ()
    %cst_48 = arith.constant dense<0.000000e+00> : vector<2x8x8xf32>
    %81 = tpu.matmul %79, %80, %cst_48 {dimension_numbers = #tpu.dot_dimension_numbers<[2], [1], [1], [2], [0, 0, 0, 1, 1, 2], [0], [0]>} : vector<2x8x16xf32>, vector<2x16x8xf32>, vector<2x8x8xf32> -> vector<2x8x8xf32>
    "tpu.trace_stop"() : () -> ()
    %82 = vector.extract_strided_slice %62 {offsets = [0, 0, 8], sizes = [2, 8, 8], strides = [1, 1, 1]} : vector<2x8x32xf32> to vector<2x8x8xf32>
    %83 = vector.extract_strided_slice %63 {offsets = [0, 0, 8], sizes = [2, 16, 8], strides = [1, 1, 1]} : vector<2x16x32xf32> to vector<2x16x8xf32>
    "tpu.trace_start"() <{level = 10 : i32, message = "bqd,bkd->bqk"}> : () -> ()
    %cst_49 = arith.constant dense<0.000000e+00> : vector<2x8x16xf32>
    %84 = tpu.matmul %82, %83, %cst_49 {dimension_numbers = #tpu.dot_dimension_numbers<[2], [2], [1], [1], [0, 0, 0, 1, 1, 1], [0], [0]>} : vector<2x8x8xf32>, vector<2x16x8xf32>, vector<2x8x16xf32> -> vector<2x8x16xf32>
    "tpu.trace_stop"() : () -> ()
    %cst_50 = arith.constant 0.353553385 : f32
    %85 = vector.broadcast %cst_50 : f32 to vector<2x8x16xf32>
    %86 = arith.mulf %84, %85 : vector<2x8x16xf32>
    %cst_51 = arith.constant dense<0xFF800000> : vector<2x8xf32>
    %87 = vector.multi_reduction <maximumf>, %86, %cst_51 [2] : vector<2x8x16xf32> to vector<2x8xf32>
    %88 = vector.shape_cast %87 : vector<2x8xf32> to vector<2x8x1xf32>
    %89 = vector.broadcast %88 : vector<2x8x1xf32> to vector<2x8x16xf32>
    %90 = arith.subf %86, %89 : vector<2x8x16xf32>
    %91 = math.exp %90 : vector<2x8x16xf32>
    %cst_52 = arith.constant dense<0.000000e+00> : vector<2x8xf32>
    %92 = vector.multi_reduction <add>, %91, %cst_52 [2] : vector<2x8x16xf32> to vector<2x8xf32>
    %93 = vector.shape_cast %92 : vector<2x8xf32> to vector<2x8x1xf32>
    %94 = tpu.reciprocal %93 {approx = true} : vector<2x8x1xf32> -> vector<2x8x1xf32>
    %95 = vector.broadcast %94 : vector<2x8x1xf32> to vector<2x8x16xf32>
    %96 = arith.mulf %91, %95 : vector<2x8x16xf32>
    %97 = vector.extract_strided_slice %64 {offsets = [0, 0, 8], sizes = [2, 16, 8], strides = [1, 1, 1]} : vector<2x16x32xf32> to vector<2x16x8xf32>
    "tpu.trace_start"() <{level = 10 : i32, message = "bqk,bkd->bqd"}> : () -> ()
    %cst_53 = arith.constant dense<0.000000e+00> : vector<2x8x8xf32>
    %98 = tpu.matmul %96, %97, %cst_53 {dimension_numbers = #tpu.dot_dimension_numbers<[2], [1], [1], [2], [0, 0, 0, 1, 1, 2], [0], [0]>} : vector<2x8x16xf32>, vector<2x16x8xf32>, vector<2x8x8xf32> -> vector<2x8x8xf32>
    "tpu.trace_stop"() : () -> ()
    %99 = vector.extract_strided_slice %62 {offsets = [0, 0, 16], sizes = [2, 8, 8], strides = [1, 1, 1]} : vector<2x8x32xf32> to vector<2x8x8xf32>
    %100 = vector.extract_strided_slice %63 {offsets = [0, 0, 16], sizes = [2, 16, 8], strides = [1, 1, 1]} : vector<2x16x32xf32> to vector<2x16x8xf32>
    "tpu.trace_start"() <{level = 10 : i32, message = "bqd,bkd->bqk"}> : () -> ()
    %cst_54 = arith.constant dense<0.000000e+00> : vector<2x8x16xf32>
    %101 = tpu.matmul %99, %100, %cst_54 {dimension_numbers = #tpu.dot_dimension_numbers<[2], [2], [1], [1], [0, 0, 0, 1, 1, 1], [0], [0]>} : vector<2x8x8xf32>, vector<2x16x8xf32>, vector<2x8x16xf32> -> vector<2x8x16xf32>
    "tpu.trace_stop"() : () -> ()
    %cst_55 = arith.constant 0.353553385 : f32
    %102 = vector.broadcast %cst_55 : f32 to vector<2x8x16xf32>
    %103 = arith.mulf %101, %102 : vector<2x8x16xf32>
    %cst_56 = arith.constant dense<0xFF800000> : vector<2x8xf32>
    %104 = vector.multi_reduction <maximumf>, %103, %cst_56 [2] : vector<2x8x16xf32> to vector<2x8xf32>
    %105 = vector.shape_cast %104 : vector<2x8xf32> to vector<2x8x1xf32>
    %106 = vector.broadcast %105 : vector<2x8x1xf32> to vector<2x8x16xf32>
    %107 = arith.subf %103, %106 : vector<2x8x16xf32>
    %108 = math.exp %107 : vector<2x8x16xf32>
    %cst_57 = arith.constant dense<0.000000e+00> : vector<2x8xf32>
    %109 = vector.multi_reduction <add>, %108, %cst_57 [2] : vector<2x8x16xf32> to vector<2x8xf32>
    %110 = vector.shape_cast %109 : vector<2x8xf32> to vector<2x8x1xf32>
    %111 = tpu.reciprocal %110 {approx = true} : vector<2x8x1xf32> -> vector<2x8x1xf32>
    %112 = vector.broadcast %111 : vector<2x8x1xf32> to vector<2x8x16xf32>
    %113 = arith.mulf %108, %112 : vector<2x8x16xf32>
    %114 = vector.extract_strided_slice %64 {offsets = [0, 0, 16], sizes = [2, 16, 8], strides = [1, 1, 1]} : vector<2x16x32xf32> to vector<2x16x8xf32>
    "tpu.trace_start"() <{level = 10 : i32, message = "bqk,bkd->bqd"}> : () -> ()
    %cst_58 = arith.constant dense<0.000000e+00> : vector<2x8x8xf32>
    %115 = tpu.matmul %113, %114, %cst_58 {dimension_numbers = #tpu.dot_dimension_numbers<[2], [1], [1], [2], [0, 0, 0, 1, 1, 2], [0], [0]>} : vector<2x8x16xf32>, vector<2x16x8xf32>, vector<2x8x8xf32> -> vector<2x8x8xf32>
    "tpu.trace_stop"() : () -> ()
    %116 = vector.extract_strided_slice %62 {offsets = [0, 0, 24], sizes = [2, 8, 8], strides = [1, 1, 1]} : vector<2x8x32xf32> to vector<2x8x8xf32>
    %117 = vector.extract_strided_slice %63 {offsets = [0, 0, 24], sizes = [2, 16, 8], strides = [1, 1, 1]} : vector<2x16x32xf32> to vector<2x16x8xf32>
    "tpu.trace_start"() <{level = 10 : i32, message = "bqd,bkd->bqk"}> : () -> ()
    %cst_59 = arith.constant dense<0.000000e+00> : vector<2x8x16xf32>
    %118 = tpu.matmul %116, %117, %cst_59 {dimension_numbers = #tpu.dot_dimension_numbers<[2], [2], [1], [1], [0, 0, 0, 1, 1, 1], [0], [0]>} : vector<2x8x8xf32>, vector<2x16x8xf32>, vector<2x8x16xf32> -> vector<2x8x16xf32>
    "tpu.trace_stop"() : () -> ()
    %cst_60 = arith.constant 0.353553385 : f32
    %119 = vector.broadcast %cst_60 : f32 to vector<2x8x16xf32>
    %120 = arith.mulf %118, %119 : vector<2x8x16xf32>
    %cst_61 = arith.constant dense<0xFF800000> : vector<2x8xf32>
    %121 = vector.multi_reduction <maximumf>, %120, %cst_61 [2] : vector<2x8x16xf32> to vector<2x8xf32>
    %122 = vector.shape_cast %121 : vector<2x8xf32> to vector<2x8x1xf32>
    %123 = vector.broadcast %122 : vector<2x8x1xf32> to vector<2x8x16xf32>
    %124 = arith.subf %120, %123 : vector<2x8x16xf32>
    %125 = math.exp %124 : vector<2x8x16xf32>
    %cst_62 = arith.constant dense<0.000000e+00> : vector<2x8xf32>
    %126 = vector.multi_reduction <add>, %125, %cst_62 [2] : vector<2x8x16xf32> to vector<2x8xf32>
    %127 = vector.shape_cast %126 : vector<2x8xf32> to vector<2x8x1xf32>
    %128 = tpu.reciprocal %127 {approx = true} : vector<2x8x1xf32> -> vector<2x8x1xf32>
    %129 = vector.broadcast %128 : vector<2x8x1xf32> to vector<2x8x16xf32>
    %130 = arith.mulf %125, %129 : vector<2x8x16xf32>
    %131 = vector.extract_strided_slice %64 {offsets = [0, 0, 24], sizes = [2, 16, 8], strides = [1, 1, 1]} : vector<2x16x32xf32> to vector<2x16x8xf32>
    "tpu.trace_start"() <{level = 10 : i32, message = "bqk,bkd->bqd"}> : () -> ()
    %cst_63 = arith.constant dense<0.000000e+00> : vector<2x8x8xf32>
    %132 = tpu.matmul %130, %131, %cst_63 {dimension_numbers = #tpu.dot_dimension_numbers<[2], [1], [1], [2], [0, 0, 0, 1, 1, 2], [0], [0]>} : vector<2x8x16xf32>, vector<2x16x8xf32>, vector<2x8x8xf32> -> vector<2x8x8xf32>
    "tpu.trace_stop"() : () -> ()
    %133 = tpu.concatenate %81, %98, %115, %132 in 2 : vector<2x8x8xf32>, vector<2x8x8xf32>, vector<2x8x8xf32>, vector<2x8x8xf32> -> vector<2x8x32xf32>
    %134 = vector.shape_cast %133 : vector<2x8x32xf32> to vector<16x32xf32>
    %c0_64 = arith.constant 0 : index
    %c0_65 = arith.constant 0 : index
    %c0_66 = arith.constant 0 : index
    %135 = vector.load %arg10[%c0_64, %c0_65, %c0_66] : memref<1x32x32xbf16, #tpu.memory_space<vmem>>, vector<1x32x32xbf16>
    %136 = vector.shape_cast %135 : vector<1x32x32xbf16> to vector<32x32xbf16>
    %137 = arith.truncf %134 : vector<16x32xf32> to vector<16x32xbf16>
    %cst_67 = arith.constant dense<0.000000e+00> : vector<16x32xf32>
    %138 = tpu.matmul %137, %136, %cst_67 {dimension_numbers = #tpu.dot_dimension_numbers<[1], [0], [0], [1], [0, 0, 1, 1], [], []>} : vector<16x32xbf16>, vector<32x32xbf16>, vector<16x32xf32> -> vector<16x32xf32>
    %c0_68 = arith.constant 0 : index
    %c6 = arith.constant 6 : index
    %c0_69 = arith.constant 0 : index
    %139 = vector.load %arg16[%c0_68, %c6, %c0_69] : memref<1x16x128xf32, #tpu.memory_space<vmem>>, vector<1x1x32xf32>
    %140 = vector.shape_cast %139 : vector<1x1x32xf32> to vector<1x32xf32>
    %141 = vector.broadcast %140 : vector<1x32xf32> to vector<16x32xf32>
    %142 = arith.addf %138, %141 : vector<16x32xf32>
    %c0_70 = arith.constant 0 : index
    %c0_71 = arith.constant 0 : index
    %c0_72 = arith.constant 0 : index
    %143 = vector.load %arg11[%c0_70, %c0_71, %c0_72] : memref<1x32x32xbf16, #tpu.memory_space<vmem>>, vector<1x32x32xbf16>
    %144 = vector.shape_cast %143 : vector<1x32x32xbf16> to vector<32x32xbf16>
    %145 = arith.truncf %142 : vector<16x32xf32> to vector<16x32xbf16>
    %cst_73 = arith.constant dense<0.000000e+00> : vector<16x32xf32>
    %146 = tpu.matmul %145, %144, %cst_73 {dimension_numbers = #tpu.dot_dimension_numbers<[1], [0], [0], [1], [0, 0, 1, 1], [], []>} : vector<16x32xbf16>, vector<32x32xbf16>, vector<16x32xf32> -> vector<16x32xf32>
    %147 = arith.addf %3, %146 : vector<16x32xf32>
    %c0_74 = arith.constant 0 : index
    %c7 = arith.constant 7 : index
    %c0_75 = arith.constant 0 : index
    %148 = vector.load %arg16[%c0_74, %c7, %c0_75] : memref<1x16x128xf32, #tpu.memory_space<vmem>>, vector<1x1x32xf32>
    %149 = vector.shape_cast %148 : vector<1x1x32xf32> to vector<1x32xf32>
    %150 = vector.broadcast %149 : vector<1x32xf32> to vector<16x32xf32>
    %151 = arith.addf %147, %150 : vector<16x32xf32>
    %c0_76 = arith.constant 0 : index
    %c12 = arith.constant 12 : index
    %c0_77 = arith.constant 0 : index
    %152 = vector.load %arg16[%c0_76, %c12, %c0_77] : memref<1x16x128xf32, #tpu.memory_space<vmem>>, vector<1x1x32xf32>
    %153 = vector.shape_cast %152 : vector<1x1x32xf32> to vector<1x32xf32>
    %c0_78 = arith.constant 0 : index
    %c13 = arith.constant 13 : index
    %c0_79 = arith.constant 0 : index
    %154 = vector.load %arg16[%c0_78, %c13, %c0_79] : memref<1x16x128xf32, #tpu.memory_space<vmem>>, vector<1x1x32xf32>
    %155 = vector.shape_cast %154 : vector<1x1x32xf32> to vector<1x32xf32>
    %cst_80 = arith.constant dense<0.000000e+00> : vector<16xf32>
    %156 = vector.multi_reduction <add>, %151, %cst_80 [1] : vector<16x32xf32> to vector<16xf32>
    %157 = vector.shape_cast %156 : vector<16xf32> to vector<16x1xf32>
    %cst_81 = arith.constant 3.200000e+01 : f32
    %158 = vector.broadcast %cst_81 : f32 to vector<16x1xf32>
    %159 = arith.divf %157, %158 : vector<16x1xf32>
    %160 = vector.broadcast %159 : vector<16x1xf32> to vector<16x32xf32>
    %161 = arith.subf %151, %160 : vector<16x32xf32>
    %162 = arith.mulf %161, %161 : vector<16x32xf32>
    %cst_82 = arith.constant dense<0.000000e+00> : vector<16xf32>
    %163 = vector.multi_reduction <add>, %162, %cst_82 [1] : vector<16x32xf32> to vector<16xf32>
    %164 = vector.shape_cast %163 : vector<16xf32> to vector<16x1xf32>
    %cst_83 = arith.constant 0.0322580636 : f32
    %165 = vector.broadcast %cst_83 : f32 to vector<16x1xf32>
    %166 = arith.mulf %164, %165 : vector<16x1xf32>
    %167 = math.sqrt %166 : vector<16x1xf32>
    %cst_84 = arith.constant 9.99999997E-7 : f32
    %168 = vector.broadcast %cst_84 : f32 to vector<16x1xf32>
    %169 = arith.addf %167, %168 : vector<16x1xf32>
    %170 = tpu.reciprocal %169 : vector<16x1xf32> -> vector<16x1xf32>
    %171 = vector.broadcast %170 : vector<16x1xf32> to vector<16x32xf32>
    %172 = arith.mulf %161, %171 : vector<16x32xf32>
    %173 = vector.broadcast %153 : vector<1x32xf32> to vector<16x32xf32>
    %174 = arith.mulf %173, %172 : vector<16x32xf32>
    %175 = vector.broadcast %155 : vector<1x32xf32> to vector<16x32xf32>
    %176 = arith.addf %174, %175 : vector<16x32xf32>
    %c0_85 = arith.constant 0 : index
    %c0_86 = arith.constant 0 : index
    %c0_87 = arith.constant 0 : index
    %177 = vector.load %arg12[%c0_85, %c0_86, %c0_87] : memref<1x32x96xbf16, #tpu.memory_space<vmem>>, vector<1x32x96xbf16>
    %178 = vector.shape_cast %177 : vector<1x32x96xbf16> to vector<32x96xbf16>
    %179 = arith.truncf %176 : vector<16x32xf32> to vector<16x32xbf16>
    %cst_88 = arith.constant dense<0.000000e+00> : vector<16x96xf32>
    %180 = tpu.matmul %179, %178, %cst_88 {dimension_numbers = #tpu.dot_dimension_numbers<[1], [0], [0], [1], [0, 0, 1, 1], [], []>} : vector<16x32xbf16>, vector<32x96xbf16>, vector<16x96xf32> -> vector<16x96xf32>
    %c0_89 = arith.constant 0 : index
    %c8 = arith.constant 8 : index
    %c0_90 = arith.constant 0 : index
    %181 = vector.load %arg16[%c0_89, %c8, %c0_90] : memref<1x16x128xf32, #tpu.memory_space<vmem>>, vector<1x1x96xf32>
    %182 = vector.shape_cast %181 : vector<1x1x96xf32> to vector<1x96xf32>
    %183 = vector.broadcast %182 : vector<1x96xf32> to vector<16x96xf32>
    %184 = arith.addf %180, %183 : vector<16x96xf32>
    %185 = vector.extract_strided_slice %184 {offsets = [0, 0], sizes = [16, 32], strides = [1, 1]} : vector<16x96xf32> to vector<16x32xf32>
    %186 = vector.extract_strided_slice %184 {offsets = [0, 32], sizes = [16, 32], strides = [1, 1]} : vector<16x96xf32> to vector<16x32xf32>
    %187 = vector.extract_strided_slice %184 {offsets = [0, 64], sizes = [16, 32], strides = [1, 1]} : vector<16x96xf32> to vector<16x32xf32>
    %188 = vector.shape_cast %185 : vector<16x32xf32> to vector<2x8x32xf32>
    %189 = vector.shape_cast %186 : vector<16x32xf32> to vector<2x8x32xf32>
    %190 = vector.shape_cast %187 : vector<16x32xf32> to vector<2x8x32xf32>
    %191 = vector.extract_strided_slice %188 {offsets = [0, 0, 0], sizes = [2, 8, 8], strides = [1, 1, 1]} : vector<2x8x32xf32> to vector<2x8x8xf32>
    %192 = vector.extract_strided_slice %189 {offsets = [0, 0, 0], sizes = [2, 8, 8], strides = [1, 1, 1]} : vector<2x8x32xf32> to vector<2x8x8xf32>
    "tpu.trace_start"() <{level = 10 : i32, message = "bqd,bkd->bqk"}> : () -> ()
    %cst_91 = arith.constant dense<0.000000e+00> : vector<2x8x8xf32>
    %193 = tpu.matmul %191, %192, %cst_91 {dimension_numbers = #tpu.dot_dimension_numbers<[2], [2], [1], [1], [0, 0, 0, 1, 1, 1], [0], [0]>} : vector<2x8x8xf32>, vector<2x8x8xf32>, vector<2x8x8xf32> -> vector<2x8x8xf32>
    "tpu.trace_stop"() : () -> ()
    %cst_92 = arith.constant 0.353553385 : f32
    %194 = vector.broadcast %cst_92 : f32 to vector<2x8x8xf32>
    %195 = arith.mulf %193, %194 : vector<2x8x8xf32>
    %cst_93 = arith.constant dense<0xFF800000> : vector<2x8xf32>
    %196 = vector.multi_reduction <maximumf>, %195, %cst_93 [2] : vector<2x8x8xf32> to vector<2x8xf32>
    %197 = vector.shape_cast %196 : vector<2x8xf32> to vector<2x8x1xf32>
    %198 = vector.broadcast %197 : vector<2x8x1xf32> to vector<2x8x8xf32>
    %199 = arith.subf %195, %198 : vector<2x8x8xf32>
    %200 = math.exp %199 : vector<2x8x8xf32>
    %cst_94 = arith.constant dense<0.000000e+00> : vector<2x8xf32>
    %201 = vector.multi_reduction <add>, %200, %cst_94 [2] : vector<2x8x8xf32> to vector<2x8xf32>
    %202 = vector.shape_cast %201 : vector<2x8xf32> to vector<2x8x1xf32>
    %203 = tpu.reciprocal %202 {approx = true} : vector<2x8x1xf32> -> vector<2x8x1xf32>
    %204 = vector.broadcast %203 : vector<2x8x1xf32> to vector<2x8x8xf32>
    %205 = arith.mulf %200, %204 : vector<2x8x8xf32>
    %206 = vector.extract_strided_slice %190 {offsets = [0, 0, 0], sizes = [2, 8, 8], strides = [1, 1, 1]} : vector<2x8x32xf32> to vector<2x8x8xf32>
    "tpu.trace_start"() <{level = 10 : i32, message = "bqk,bkd->bqd"}> : () -> ()
    %cst_95 = arith.constant dense<0.000000e+00> : vector<2x8x8xf32>
    %207 = tpu.matmul %205, %206, %cst_95 {dimension_numbers = #tpu.dot_dimension_numbers<[2], [1], [1], [2], [0, 0, 0, 1, 1, 2], [0], [0]>} : vector<2x8x8xf32>, vector<2x8x8xf32>, vector<2x8x8xf32> -> vector<2x8x8xf32>
    "tpu.trace_stop"() : () -> ()
    %208 = vector.extract_strided_slice %188 {offsets = [0, 0, 8], sizes = [2, 8, 8], strides = [1, 1, 1]} : vector<2x8x32xf32> to vector<2x8x8xf32>
    %209 = vector.extract_strided_slice %189 {offsets = [0, 0, 8], sizes = [2, 8, 8], strides = [1, 1, 1]} : vector<2x8x32xf32> to vector<2x8x8xf32>
    "tpu.trace_start"() <{level = 10 : i32, message = "bqd,bkd->bqk"}> : () -> ()
    %cst_96 = arith.constant dense<0.000000e+00> : vector<2x8x8xf32>
    %210 = tpu.matmul %208, %209, %cst_96 {dimension_numbers = #tpu.dot_dimension_numbers<[2], [2], [1], [1], [0, 0, 0, 1, 1, 1], [0], [0]>} : vector<2x8x8xf32>, vector<2x8x8xf32>, vector<2x8x8xf32> -> vector<2x8x8xf32>
    "tpu.trace_stop"() : () -> ()
    %cst_97 = arith.constant 0.353553385 : f32
    %211 = vector.broadcast %cst_97 : f32 to vector<2x8x8xf32>
    %212 = arith.mulf %210, %211 : vector<2x8x8xf32>
    %cst_98 = arith.constant dense<0xFF800000> : vector<2x8xf32>
    %213 = vector.multi_reduction <maximumf>, %212, %cst_98 [2] : vector<2x8x8xf32> to vector<2x8xf32>
    %214 = vector.shape_cast %213 : vector<2x8xf32> to vector<2x8x1xf32>
    %215 = vector.broadcast %214 : vector<2x8x1xf32> to vector<2x8x8xf32>
    %216 = arith.subf %212, %215 : vector<2x8x8xf32>
    %217 = math.exp %216 : vector<2x8x8xf32>
    %cst_99 = arith.constant dense<0.000000e+00> : vector<2x8xf32>
    %218 = vector.multi_reduction <add>, %217, %cst_99 [2] : vector<2x8x8xf32> to vector<2x8xf32>
    %219 = vector.shape_cast %218 : vector<2x8xf32> to vector<2x8x1xf32>
    %220 = tpu.reciprocal %219 {approx = true} : vector<2x8x1xf32> -> vector<2x8x1xf32>
    %221 = vector.broadcast %220 : vector<2x8x1xf32> to vector<2x8x8xf32>
    %222 = arith.mulf %217, %221 : vector<2x8x8xf32>
    %223 = vector.extract_strided_slice %190 {offsets = [0, 0, 8], sizes = [2, 8, 8], strides = [1, 1, 1]} : vector<2x8x32xf32> to vector<2x8x8xf32>
    "tpu.trace_start"() <{level = 10 : i32, message = "bqk,bkd->bqd"}> : () -> ()
    %cst_100 = arith.constant dense<0.000000e+00> : vector<2x8x8xf32>
    %224 = tpu.matmul %222, %223, %cst_100 {dimension_numbers = #tpu.dot_dimension_numbers<[2], [1], [1], [2], [0, 0, 0, 1, 1, 2], [0], [0]>} : vector<2x8x8xf32>, vector<2x8x8xf32>, vector<2x8x8xf32> -> vector<2x8x8xf32>
    "tpu.trace_stop"() : () -> ()
    %225 = vector.extract_strided_slice %188 {offsets = [0, 0, 16], sizes = [2, 8, 8], strides = [1, 1, 1]} : vector<2x8x32xf32> to vector<2x8x8xf32>
    %226 = vector.extract_strided_slice %189 {offsets = [0, 0, 16], sizes = [2, 8, 8], strides = [1, 1, 1]} : vector<2x8x32xf32> to vector<2x8x8xf32>
    "tpu.trace_start"() <{level = 10 : i32, message = "bqd,bkd->bqk"}> : () -> ()
    %cst_101 = arith.constant dense<0.000000e+00> : vector<2x8x8xf32>
    %227 = tpu.matmul %225, %226, %cst_101 {dimension_numbers = #tpu.dot_dimension_numbers<[2], [2], [1], [1], [0, 0, 0, 1, 1, 1], [0], [0]>} : vector<2x8x8xf32>, vector<2x8x8xf32>, vector<2x8x8xf32> -> vector<2x8x8xf32>
    "tpu.trace_stop"() : () -> ()
    %cst_102 = arith.constant 0.353553385 : f32
    %228 = vector.broadcast %cst_102 : f32 to vector<2x8x8xf32>
    %229 = arith.mulf %227, %228 : vector<2x8x8xf32>
    %cst_103 = arith.constant dense<0xFF800000> : vector<2x8xf32>
    %230 = vector.multi_reduction <maximumf>, %229, %cst_103 [2] : vector<2x8x8xf32> to vector<2x8xf32>
    %231 = vector.shape_cast %230 : vector<2x8xf32> to vector<2x8x1xf32>
    %232 = vector.broadcast %231 : vector<2x8x1xf32> to vector<2x8x8xf32>
    %233 = arith.subf %229, %232 : vector<2x8x8xf32>
    %234 = math.exp %233 : vector<2x8x8xf32>
    %cst_104 = arith.constant dense<0.000000e+00> : vector<2x8xf32>
    %235 = vector.multi_reduction <add>, %234, %cst_104 [2] : vector<2x8x8xf32> to vector<2x8xf32>
    %236 = vector.shape_cast %235 : vector<2x8xf32> to vector<2x8x1xf32>
    %237 = tpu.reciprocal %236 {approx = true} : vector<2x8x1xf32> -> vector<2x8x1xf32>
    %238 = vector.broadcast %237 : vector<2x8x1xf32> to vector<2x8x8xf32>
    %239 = arith.mulf %234, %238 : vector<2x8x8xf32>
    %240 = vector.extract_strided_slice %190 {offsets = [0, 0, 16], sizes = [2, 8, 8], strides = [1, 1, 1]} : vector<2x8x32xf32> to vector<2x8x8xf32>
    "tpu.trace_start"() <{level = 10 : i32, message = "bqk,bkd->bqd"}> : () -> ()
    %cst_105 = arith.constant dense<0.000000e+00> : vector<2x8x8xf32>
    %241 = tpu.matmul %239, %240, %cst_105 {dimension_numbers = #tpu.dot_dimension_numbers<[2], [1], [1], [2], [0, 0, 0, 1, 1, 2], [0], [0]>} : vector<2x8x8xf32>, vector<2x8x8xf32>, vector<2x8x8xf32> -> vector<2x8x8xf32>
    "tpu.trace_stop"() : () -> ()
    %242 = vector.extract_strided_slice %188 {offsets = [0, 0, 24], sizes = [2, 8, 8], strides = [1, 1, 1]} : vector<2x8x32xf32> to vector<2x8x8xf32>
    %243 = vector.extract_strided_slice %189 {offsets = [0, 0, 24], sizes = [2, 8, 8], strides = [1, 1, 1]} : vector<2x8x32xf32> to vector<2x8x8xf32>
    "tpu.trace_start"() <{level = 10 : i32, message = "bqd,bkd->bqk"}> : () -> ()
    %cst_106 = arith.constant dense<0.000000e+00> : vector<2x8x8xf32>
    %244 = tpu.matmul %242, %243, %cst_106 {dimension_numbers = #tpu.dot_dimension_numbers<[2], [2], [1], [1], [0, 0, 0, 1, 1, 1], [0], [0]>} : vector<2x8x8xf32>, vector<2x8x8xf32>, vector<2x8x8xf32> -> vector<2x8x8xf32>
    "tpu.trace_stop"() : () -> ()
    %cst_107 = arith.constant 0.353553385 : f32
    %245 = vector.broadcast %cst_107 : f32 to vector<2x8x8xf32>
    %246 = arith.mulf %244, %245 : vector<2x8x8xf32>
    %cst_108 = arith.constant dense<0xFF800000> : vector<2x8xf32>
    %247 = vector.multi_reduction <maximumf>, %246, %cst_108 [2] : vector<2x8x8xf32> to vector<2x8xf32>
    %248 = vector.shape_cast %247 : vector<2x8xf32> to vector<2x8x1xf32>
    %249 = vector.broadcast %248 : vector<2x8x1xf32> to vector<2x8x8xf32>
    %250 = arith.subf %246, %249 : vector<2x8x8xf32>
    %251 = math.exp %250 : vector<2x8x8xf32>
    %cst_109 = arith.constant dense<0.000000e+00> : vector<2x8xf32>
    %252 = vector.multi_reduction <add>, %251, %cst_109 [2] : vector<2x8x8xf32> to vector<2x8xf32>
    %253 = vector.shape_cast %252 : vector<2x8xf32> to vector<2x8x1xf32>
    %254 = tpu.reciprocal %253 {approx = true} : vector<2x8x1xf32> -> vector<2x8x1xf32>
    %255 = vector.broadcast %254 : vector<2x8x1xf32> to vector<2x8x8xf32>
    %256 = arith.mulf %251, %255 : vector<2x8x8xf32>
    %257 = vector.extract_strided_slice %190 {offsets = [0, 0, 24], sizes = [2, 8, 8], strides = [1, 1, 1]} : vector<2x8x32xf32> to vector<2x8x8xf32>
    "tpu.trace_start"() <{level = 10 : i32, message = "bqk,bkd->bqd"}> : () -> ()
    %cst_110 = arith.constant dense<0.000000e+00> : vector<2x8x8xf32>
    %258 = tpu.matmul %256, %257, %cst_110 {dimension_numbers = #tpu.dot_dimension_numbers<[2], [1], [1], [2], [0, 0, 0, 1, 1, 2], [0], [0]>} : vector<2x8x8xf32>, vector<2x8x8xf32>, vector<2x8x8xf32> -> vector<2x8x8xf32>
    "tpu.trace_stop"() : () -> ()
    %259 = tpu.concatenate %207, %224, %241, %258 in 2 : vector<2x8x8xf32>, vector<2x8x8xf32>, vector<2x8x8xf32>, vector<2x8x8xf32> -> vector<2x8x32xf32>
    %260 = vector.shape_cast %259 : vector<2x8x32xf32> to vector<16x32xf32>
    %c0_111 = arith.constant 0 : index
    %c0_112 = arith.constant 0 : index
    %c0_113 = arith.constant 0 : index
    %261 = vector.load %arg13[%c0_111, %c0_112, %c0_113] : memref<1x32x32xbf16, #tpu.memory_space<vmem>>, vector<1x32x32xbf16>
    %262 = vector.shape_cast %261 : vector<1x32x32xbf16> to vector<32x32xbf16>
    %263 = arith.truncf %260 : vector<16x32xf32> to vector<16x32xbf16>
    %cst_114 = arith.constant dense<0.000000e+00> : vector<16x32xf32>
    %264 = tpu.matmul %263, %262, %cst_114 {dimension_numbers = #tpu.dot_dimension_numbers<[1], [0], [0], [1], [0, 0, 1, 1], [], []>} : vector<16x32xbf16>, vector<32x32xbf16>, vector<16x32xf32> -> vector<16x32xf32>
    %c0_115 = arith.constant 0 : index
    %c9 = arith.constant 9 : index
    %c0_116 = arith.constant 0 : index
    %265 = vector.load %arg16[%c0_115, %c9, %c0_116] : memref<1x16x128xf32, #tpu.memory_space<vmem>>, vector<1x1x32xf32>
    %266 = vector.shape_cast %265 : vector<1x1x32xf32> to vector<1x32xf32>
    %267 = vector.broadcast %266 : vector<1x32xf32> to vector<16x32xf32>
    %268 = arith.addf %264, %267 : vector<16x32xf32>
    %c0_117 = arith.constant 0 : index
    %c0_118 = arith.constant 0 : index
    %c0_119 = arith.constant 0 : index
    %269 = vector.load %arg14[%c0_117, %c0_118, %c0_119] : memref<1x32x64xbf16, #tpu.memory_space<vmem>>, vector<1x32x64xbf16>
    %270 = vector.shape_cast %269 : vector<1x32x64xbf16> to vector<32x64xbf16>
    %271 = arith.truncf %268 : vector<16x32xf32> to vector<16x32xbf16>
    %cst_120 = arith.constant dense<0.000000e+00> : vector<16x64xf32>
    %272 = tpu.matmul %271, %270, %cst_120 {dimension_numbers = #tpu.dot_dimension_numbers<[1], [0], [0], [1], [0, 0, 1, 1], [], []>} : vector<16x32xbf16>, vector<32x64xbf16>, vector<16x64xf32> -> vector<16x64xf32>
    %c0_121 = arith.constant 0 : index
    %c10 = arith.constant 10 : index
    %c0_122 = arith.constant 0 : index
    %273 = vector.load %arg16[%c0_121, %c10, %c0_122] : memref<1x16x128xf32, #tpu.memory_space<vmem>>, vector<1x1x64xf32>
    %274 = vector.shape_cast %273 : vector<1x1x64xf32> to vector<1x64xf32>
    %275 = vector.broadcast %274 : vector<1x64xf32> to vector<16x64xf32>
    %276 = arith.addf %272, %275 : vector<16x64xf32>
    %cst_123 = arith.constant 0.000000e+00 : f32
    %277 = vector.broadcast %cst_123 : f32 to vector<16x64xf32>
    %278 = arith.maximumf %276, %277 : vector<16x64xf32>
    %c0_124 = arith.constant 0 : index
    %c0_125 = arith.constant 0 : index
    %c0_126 = arith.constant 0 : index
    %279 = vector.load %arg15[%c0_124, %c0_125, %c0_126] : memref<1x64x32xbf16, #tpu.memory_space<vmem>>, vector<1x64x32xbf16>
    %280 = vector.shape_cast %279 : vector<1x64x32xbf16> to vector<64x32xbf16>
    %281 = arith.truncf %278 : vector<16x64xf32> to vector<16x64xbf16>
    %cst_127 = arith.constant dense<0.000000e+00> : vector<16x32xf32>
    %282 = tpu.matmul %281, %280, %cst_127 {dimension_numbers = #tpu.dot_dimension_numbers<[1], [0], [0], [1], [0, 0, 1, 1], [], []>} : vector<16x64xbf16>, vector<64x32xbf16>, vector<16x32xf32> -> vector<16x32xf32>
    %c0_128 = arith.constant 0 : index
    %c11 = arith.constant 11 : index
    %c0_129 = arith.constant 0 : index
    %283 = vector.load %arg16[%c0_128, %c11, %c0_129] : memref<1x16x128xf32, #tpu.memory_space<vmem>>, vector<1x1x32xf32>
    %284 = vector.shape_cast %283 : vector<1x1x32xf32> to vector<1x32xf32>
    %285 = vector.broadcast %284 : vector<1x32xf32> to vector<16x32xf32>
    %286 = arith.addf %282, %285 : vector<16x32xf32>
    %287 = arith.addf %176, %286 : vector<16x32xf32>
    %c0_130 = arith.constant 0 : index
    %c14 = arith.constant 14 : index
    %c0_131 = arith.constant 0 : index
    %288 = vector.load %arg16[%c0_130, %c14, %c0_131] : memref<1x16x128xf32, #tpu.memory_space<vmem>>, vector<1x1x32xf32>
    %289 = vector.shape_cast %288 : vector<1x1x32xf32> to vector<1x32xf32>
    %c0_132 = arith.constant 0 : index
    %c15 = arith.constant 15 : index
    %c0_133 = arith.constant 0 : index
    %290 = vector.load %arg16[%c0_132, %c15, %c0_133] : memref<1x16x128xf32, #tpu.memory_space<vmem>>, vector<1x1x32xf32>
    %291 = vector.shape_cast %290 : vector<1x1x32xf32> to vector<1x32xf32>
    %cst_134 = arith.constant dense<0.000000e+00> : vector<16xf32>
    %292 = vector.multi_reduction <add>, %287, %cst_134 [1] : vector<16x32xf32> to vector<16xf32>
    %293 = vector.shape_cast %292 : vector<16xf32> to vector<16x1xf32>
    %cst_135 = arith.constant 3.200000e+01 : f32
    %294 = vector.broadcast %cst_135 : f32 to vector<16x1xf32>
    %295 = arith.divf %293, %294 : vector<16x1xf32>
    %296 = vector.broadcast %295 : vector<16x1xf32> to vector<16x32xf32>
    %297 = arith.subf %287, %296 : vector<16x32xf32>
    %298 = arith.mulf %297, %297 : vector<16x32xf32>
    %cst_136 = arith.constant dense<0.000000e+00> : vector<16xf32>
    %299 = vector.multi_reduction <add>, %298, %cst_136 [1] : vector<16x32xf32> to vector<16xf32>
    %300 = vector.shape_cast %299 : vector<16xf32> to vector<16x1xf32>
    %cst_137 = arith.constant 0.0322580636 : f32
    %301 = vector.broadcast %cst_137 : f32 to vector<16x1xf32>
    %302 = arith.mulf %300, %301 : vector<16x1xf32>
    %303 = math.sqrt %302 : vector<16x1xf32>
    %cst_138 = arith.constant 9.99999997E-7 : f32
    %304 = vector.broadcast %cst_138 : f32 to vector<16x1xf32>
    %305 = arith.addf %303, %304 : vector<16x1xf32>
    %306 = tpu.reciprocal %305 : vector<16x1xf32> -> vector<16x1xf32>
    %307 = vector.broadcast %306 : vector<16x1xf32> to vector<16x32xf32>
    %308 = arith.mulf %297, %307 : vector<16x32xf32>
    %309 = vector.broadcast %289 : vector<1x32xf32> to vector<16x32xf32>
    %310 = arith.mulf %309, %308 : vector<16x32xf32>
    %311 = vector.broadcast %291 : vector<1x32xf32> to vector<16x32xf32>
    %312 = arith.addf %310, %311 : vector<16x32xf32>
    %c0_139 = arith.constant 0 : index
    %c0_140 = arith.constant 0 : index
    %313 = vector.load %arg19[%c0_139, %c0_140] : memref<16x32xf32, #tpu.memory_space<vmem>>, vector<16x32xf32>
    tpu.vector_store %arg19[%c0_139, %c0_140], %312 {strides = array<i32>} : memref<16x32xf32, #tpu.memory_space<vmem>>, vector<16x32xf32>,
    %c1_i32 = arith.constant 1 : i32
    %314 = arith.cmpi eq, %arg0, %c1_i32 : i32
    %315 = arith.extui %314 : i1 to i32
    %c0_i32_141 = arith.constant 0 : i32
    %316 = arith.cmpi ne, %315, %c0_i32_141 : i32
    scf.if %316 {
      %c0_142 = arith.constant 0 : index
      %c0_143 = arith.constant 0 : index
      %317 = vector.load %arg17[%c0_142, %c0_143] : memref<2x32xf32, #tpu.memory_space<vmem>>, vector<2x32xf32>
      %318 = vector.extract_strided_slice %317 {offsets = [0, 0], sizes = [1, 32], strides = [1, 1]} : vector<2x32xf32> to vector<1x32xf32>
      %319 = vector.extract_strided_slice %317 {offsets = [1, 0], sizes = [1, 32], strides = [1, 1]} : vector<2x32xf32> to vector<1x32xf32>
      %cst_144 = arith.constant dense<0.000000e+00> : vector<16xf32>
      %320 = vector.multi_reduction <add>, %312, %cst_144 [1] : vector<16x32xf32> to vector<16xf32>
      %321 = vector.shape_cast %320 : vector<16xf32> to vector<16x1xf32>
      %cst_145 = arith.constant 3.200000e+01 : f32
      %322 = vector.broadcast %cst_145 : f32 to vector<16x1xf32>
      %323 = arith.divf %321, %322 : vector<16x1xf32>
      %324 = vector.broadcast %323 : vector<16x1xf32> to vector<16x32xf32>
      %325 = arith.subf %312, %324 : vector<16x32xf32>
      %326 = arith.mulf %325, %325 : vector<16x32xf32>
      %cst_146 = arith.constant dense<0.000000e+00> : vector<16xf32>
      %327 = vector.multi_reduction <add>, %326, %cst_146 [1] : vector<16x32xf32> to vector<16xf32>
      %328 = vector.shape_cast %327 : vector<16xf32> to vector<16x1xf32>
      %cst_147 = arith.constant 0.0322580636 : f32
      %329 = vector.broadcast %cst_147 : f32 to vector<16x1xf32>
      %330 = arith.mulf %328, %329 : vector<16x1xf32>
      %331 = math.sqrt %330 : vector<16x1xf32>
      %cst_148 = arith.constant 9.99999997E-7 : f32
      %332 = vector.broadcast %cst_148 : f32 to vector<16x1xf32>
      %333 = arith.addf %331, %332 : vector<16x1xf32>
      %334 = tpu.reciprocal %333 : vector<16x1xf32> -> vector<16x1xf32>
      %335 = vector.broadcast %334 : vector<16x1xf32> to vector<16x32xf32>
      %336 = arith.mulf %325, %335 : vector<16x32xf32>
      %337 = vector.broadcast %318 : vector<1x32xf32> to vector<16x32xf32>
      %338 = arith.mulf %337, %336 : vector<16x32xf32>
      %339 = vector.broadcast %319 : vector<1x32xf32> to vector<16x32xf32>
      %340 = arith.addf %338, %339 : vector<16x32xf32>
      %341 = vector.shape_cast %340 : vector<16x32xf32> to vector<2x8x32xf32>
      %c0_149 = arith.constant 0 : index
      %c0_150 = arith.constant 0 : index
      %c0_151 = arith.constant 0 : index
      %342 = vector.load %arg18[%c0_149, %c0_150, %c0_151] : memref<2x8x32xf32, #tpu.memory_space<vmem>>, vector<2x8x32xf32>
      tpu.vector_store %arg18[%c0_149, %c0_150, %c0_151], %341 {strides = array<i32>} : memref<2x8x32xf32, #tpu.memory_space<vmem>>, vector<2x8x32xf32>,
    } else {
    }
    return
  }
  func.func @transform_0(%arg0: i32) -> (i32, i32, i32) {
    %c0_i32 = arith.constant 0 : i32
    %c0_i32_0 = arith.constant 0 : i32
    %c0_i32_1 = arith.constant 0 : i32
    %c0_i32_2 = arith.constant 0 : i32
    return %c0_i32, %c0_i32_0, %c0_i32_1 : i32, i32, i32
  }
  func.func @transform_1(%arg0: i32) -> (i32, i32) {
    %c0_i32 = arith.constant 0 : i32
    %c0_i32_0 = arith.constant 0 : i32
    %c0_i32_1 = arith.constant 0 : i32
    return %c0_i32, %c0_i32_0 : i32, i32
  }
  func.func @transform_2(%arg0: i32) -> (i32, i32, i32) {
    %c0_i32 = arith.constant 0 : i32
    %c0_i32_0 = arith.constant 0 : i32
    %c0_i32_1 = arith.constant 0 : i32
    %c0_i32_2 = arith.constant 0 : i32
    return %c0_i32, %c0_i32_0, %c0_i32_1 : i32, i32, i32
  }
  func.func @transform_3(%arg0: i32) -> (i32, i32, i32) {
    %c0_i32 = arith.constant 0 : i32
    %c0_i32_0 = arith.constant 0 : i32
    %c0_i32_1 = arith.constant 0 : i32
    return %arg0, %c0_i32, %c0_i32_0 : i32, i32, i32
  }
  func.func @transform_4(%arg0: i32) -> (i32, i32, i32) {
    %c0_i32 = arith.constant 0 : i32
    %c0_i32_0 = arith.constant 0 : i32
    %c0_i32_1 = arith.constant 0 : i32
    return %arg0, %c0_i32, %c0_i32_0 : i32, i32, i32
  }
  func.func @transform_5(%arg0: i32) -> (i32, i32, i32) {
    %c0_i32 = arith.constant 0 : i32
    %c0_i32_0 = arith.constant 0 : i32
    %c0_i32_1 = arith.constant 0 : i32
    return %arg0, %c0_i32, %c0_i32_0 : i32, i32, i32
  }
  func.func @transform_6(%arg0: i32) -> (i32, i32, i32) {
    %c0_i32 = arith.constant 0 : i32
    %c0_i32_0 = arith.constant 0 : i32
    %c0_i32_1 = arith.constant 0 : i32
    return %arg0, %c0_i32, %c0_i32_0 : i32, i32, i32
  }
  func.func @transform_7(%arg0: i32) -> (i32, i32, i32) {
    %c0_i32 = arith.constant 0 : i32
    %c0_i32_0 = arith.constant 0 : i32
    %c0_i32_1 = arith.constant 0 : i32
    return %arg0, %c0_i32, %c0_i32_0 : i32, i32, i32
  }
  func.func @transform_8(%arg0: i32) -> (i32, i32, i32) {
    %c0_i32 = arith.constant 0 : i32
    %c0_i32_0 = arith.constant 0 : i32
    %c0_i32_1 = arith.constant 0 : i32
    return %arg0, %c0_i32, %c0_i32_0 : i32, i32, i32
  }
  func.func @transform_9(%arg0: i32) -> (i32, i32, i32) {
    %c0_i32 = arith.constant 0 : i32
    %c0_i32_0 = arith.constant 0 : i32
    %c0_i32_1 = arith.constant 0 : i32
    return %arg0, %c0_i32, %c0_i32_0 : i32, i32, i32
  }
  func.func @transform_10(%arg0: i32) -> (i32, i32, i32) {
    %c0_i32 = arith.constant 0 : i32
    %c0_i32_0 = arith.constant 0 : i32
    %c0_i32_1 = arith.constant 0 : i32
    return %arg0, %c0_i32, %c0_i32_0 : i32, i32, i32
  }
  func.func @transform_11(%arg0: i32) -> (i32, i32, i32) {
    %c0_i32 = arith.constant 0 : i32
    %c0_i32_0 = arith.constant 0 : i32
    %c0_i32_1 = arith.constant 0 : i32
    return %arg0, %c0_i32, %c0_i32_0 : i32, i32, i32
  }
  func.func @transform_12(%arg0: i32) -> (i32, i32, i32) {
    %c0_i32 = arith.constant 0 : i32
    %c0_i32_0 = arith.constant 0 : i32
    %c0_i32_1 = arith.constant 0 : i32
    return %arg0, %c0_i32, %c0_i32_0 : i32, i32, i32
  }
  func.func @transform_13(%arg0: i32) -> (i32, i32, i32) {
    %c0_i32 = arith.constant 0 : i32
    %c0_i32_0 = arith.constant 0 : i32
    %c0_i32_1 = arith.constant 0 : i32
    return %arg0, %c0_i32, %c0_i32_0 : i32, i32, i32
  }
  func.func @transform_14(%arg0: i32) -> (i32, i32, i32) {
    %c0_i32 = arith.constant 0 : i32
    %c0_i32_0 = arith.constant 0 : i32
    %c0_i32_1 = arith.constant 0 : i32
    return %arg0, %c0_i32, %c0_i32_0 : i32, i32, i32
  }
  func.func @transform_15(%arg0: i32) -> (i32, i32, i32) {
    %c0_i32 = arith.constant 0 : i32
    %c0_i32_0 = arith.constant 0 : i32
    %c0_i32_1 = arith.constant 0 : i32
    return %arg0, %c0_i32, %c0_i32_0 : i32, i32, i32
  }
  func.func @transform_16(%arg0: i32) -> (i32, i32) {
    %c0_i32 = arith.constant 0 : i32
    %c0_i32_0 = arith.constant 0 : i32
    %c0_i32_1 = arith.constant 0 : i32
    return %c0_i32, %c0_i32_0 : i32, i32
  }
  func.func @transform_17(%arg0: i32) -> (i32, i32, i32) {
    %c0_i32 = arith.constant 0 : i32
    %c0_i32_0 = arith.constant 0 : i32
    %c0_i32_1 = arith.constant 0 : i32
    %c0_i32_2 = arith.constant 0 : i32
    return %c0_i32, %c0_i32_0, %c0_i32_1 : i32, i32, i32
  }
}

</mosaic_0001>

<bundles_post_ra>
// kernel: tpu_custom_call.1
= control target key start
LH: loop header
LB: loop body
LE: loop exit
PB: predicated region body
PF: predicated region fallthrough
CT: control target
= control target key end

     0   :  { %s7228_s0 = inlined_call_operand.hbm [shape: f32[2,8,32], index: 0, kind: input, shape index: {}]   ;;  %s7229_s1 = inlined_call_operand.hbm [shape: f32[8,32], index: 1, kind: input, shape index: {}]   ;;  %s7230_s2 = inlined_call_operand.vmem [shape: f32[2,16,8], index: 2, kind: input, shape index: {}]   ;;  %s7231_s3 = inlined_call_operand.vmem [shape: bf16[2,8,4], index: 3, kind: input, shape index: {}]   ;;  %s7232_s4 = inlined_call_operand.hbm [shape: bf16[2,4,8], index: 4, kind: input, shape index: {}]   ;;  %s7233_s5 = inlined_call_operand.hbm [shape: bf16[2,8,16], index: 5, kind: input, shape index: {}]   ;;  %s7234_s6 = inlined_call_operand.hbm [shape: bf16[2,16,32], index: 6, kind: input, shape index: {}]   ;;  %s7235_s7 = inlined_call_operand.vmem [shape: bf16[2,32,32], index: 7, kind: input, shape index: {}]   ;;  %s7236_s8 = inlined_call_operand.vmem [shape: bf16[2,32,64], index: 8, kind: input, shape index: {}]   ;;  %s7237_s9 = inlined_call_operand.vmem [shape: bf16[2,32,32], index: 9, kind: input, shape index: {}]   ;;  %s7238_s10 = inlined_call_operand.vmem [shape: bf16[2,32,32], index: 10, kind: input, shape index: {}]   ;;  %s7239_s11 = inlined_call_operand.vmem [shape: bf16[2,32,96], index: 11, kind: input, shape index: {}]   ;;  %s7240_s12 = inlined_call_operand.hbm [shape: bf16[2,32,32], index: 12, kind: input, shape index: {}]   ;;  %s7241_s13 = inlined_call_operand.hbm [shape: bf16[2,32,64], index: 13, kind: input, shape index: {}]   ;;  %s7242_s14 = inlined_call_operand.vmem [shape: bf16[2,64,32], index: 14, kind: input, shape index: {}]   ;;  %s7243_s15 = inlined_call_operand.hbm [shape: f32[2,16,128], index: 15, kind: input, shape index: {}]   ;;  %s7244_s16 = inlined_call_operand.vmem [shape: f32[2,32], index: 16, kind: input, shape index: {}]   ;;  %s7245_s17 = inlined_call_operand.hbm [shape: f32[2,8,32], index: 17, kind: output, shape index: {}]  }
   0x1   :  { %7267 = sst [smem:[#allocation22_spill]] %s7228_s0 }
   0x2   :  { %7268 = sst [smem:[#allocation23_spill]] %s7229_s1 }
   0x3   :  { %7269 = sst [smem:[#allocation24_spill]] %s7230_s2 }
   0x4   :  { %7270 = sst [smem:[#allocation25_spill]] %s7231_s3 }
   0x5   :  { %7271 = sst [smem:[#allocation26_spill]] %s7232_s4 }
   0x6   :  { %7272 = sst [smem:[#allocation27_spill]] %s7233_s5 }
   0x7   :  { %7273 = sst [smem:[#allocation28_spill]] %s7234_s6 }
   0x8   :  { %7274 = sst [smem:[#allocation29_spill]] %s7235_s7 }
   0x9   :  { %7275 = sst [smem:[#allocation30_spill]] %s7236_s8 }
   0xa   :  { %7276 = sst [smem:[#allocation31_spill]] %s7237_s9 }
   0xb   :  { %7277 = sst [smem:[#allocation32_spill]] %s7238_s10 }
   0xc   :  { %7278 = sst [smem:[#allocation33_spill]] %s7239_s11 }
   0xd   :  { %7279 = sst [smem:[#allocation34_spill]] %s7240_s12 }
   0xe   :  { %7280 = sst [smem:[#allocation35_spill]] %s7241_s13 }
   0xf   :  { %7281 = sst [smem:[#allocation36_spill]] %s7242_s14 }
  0x10   :  { %7282 = sst [smem:[#allocation37_spill]] %s7244_s16 }
  0x11   :  { %7283 = sst [smem:[#allocation38_spill]] %s7245_s17 }
  0x12   :  { %22 = vsyncpa [#allocation4], 0 }
  0x13   :  { %23 = vsyncpa [#allocation7], 0 }
  0x14   :  { %24 = vsyncpa [#allocation5], 0  ;;  %s6344_s24 = smov 0   ;;  %s6346_s25 = smov 0  }
  0x15   :  { %s6348_s26 = smov 0   ;;  %s6350_s27 = smov 0  }
  0x16 LB: > { %7284 = sst [smem:[#allocation19_spill]] %s6217_s26  ;;  %s6363_s28 = sadd.s32 4294967295, %s6221_s27   ;;  %s6221_s27 = sphi %s6350_s27, %s7327_s27   ;;  %s6217_s26 = sphi %s6348_s26, %s7329_s26   ;;  %s6213_s25 = sphi %s6346_s25, %s7331_s25   ;;  %s6209_s24 = sphi %s6344_s24, %s7330_s24  }
  0x17   : > { %p139_p0 = scmp.ne.s32.totalorder %s6213_s25, %s6209_s24  ;;  %p7252_p1 = scmp.eq.s32.totalorder %s6363_s28, 0 }
  0x18   : > { %p4964_p2 = scmp.ge.s32.totalorder %s6221_s27, 1  ;;  %p478_p3 = scmp.lt.s32.totalorder %s6221_s27, 3 }
  0x19   : > { %p6372_p5 = por %p7252_p1, %p139_p0  ;;  %s6223_s30 = smov [#allocation3]  }
  0x1a   : > { %p6376_p6 = pnand %p4964_p2, %p478_p3  ;;  %s490_s18 = sshll.u32 %s6223_s30, 4  ;;  %s491_s18 = int_to_ptr.vmem [resolvable:$true] %s490_s18 }
  0x1b   : > { %s7285_s29 = scalar_select %p6372_p5, 1, 0 }
  0x1c   : > { %s7286_s0 = scalar_select %p6376_p6, 1, 0 }
  0x1d   : > { %p5616_p7 = pneg %p6376_p6  ;;  %s6389_s1 = sadd.s32 1, %s6221_s27  }
  0x1e   : > { %7288 = sst [smem:[#allocation20_spill]] %s6389_s1  ;;  %s126_s20 = sadd.s32 1, %s6217_s26 }
  0x1f   : > { %p6384_p8 = pnand %p5616_p7, %p7252_p1  ;;  %s123_s21 = ssub.s32 %s6221_s27, %s6389_s1 }
  0x20   : > { %s7289_s24 = sld [smem:[#allocation22_spill]] }
  0x21   : > { %s7287_s19 = scalar_select %p6384_p8, 1, 0 }
  0x22   : > { %p7257_p10 = pneg %p6384_p8 }
  0x26   : > { %s7290_s17 = smov %s7289_s24  ;;  %s5913_s16 = scalar_lea.hbm %s7289_s24, 256 }
  0x27   : > { %p5914_p9 = scmp.ne.s32.totalorder %s7290_s17, %s5913_s16  ;;  %p5920_p13 = scmp.lt.u32.totalorder %s5913_s16, %s7290_s17 }
  0x29   : > { %p5916_p11 = pnand %p7257_p10, %p5914_p9 }
  0x2b   : > { %p5917_p12 = pneg %p5916_p11 }
  0x2d   : > { %p5922_p0 = pnand %p5920_p13, %p5917_p12 }
  0x2f   : > { %5925 = shalt.err (!%p5922_p0)
}
  0x30   : > { %s5926_s1 = scalar_lea.vmem %s491_s18, 256  ;;  %p5934_p4 = scmp.lt.s32.totalorder %s491_s18, %s491_s18 }
  0x31   : > { %p5927_p2 = scmp.ne.s32.totalorder %s491_s18, %s5926_s1  ;;  %p5935_p1 = scmp.lt.s32.totalorder %s5926_s1, %s5926_s1 }
  0x33   : > { %p5929_p3 = pnand %p5927_p2, %p7257_p10  ;;  %p5936_p5 = por %p5935_p1, %p5934_p4 }
  0x35   : > { %p5930_p7 = pneg %p5929_p3 }
  0x37   : > { %p5937_p6 = pnand %p5936_p5, %p5930_p7 }
  0x39   : > { %5940 = shalt.err (!%p5937_p6)
}
  0x3a   : > { %s7255_s2 = smov 128   ;;  %s7256_s11 = smov 8  }
  0x3b   : > { %5619 = dma.hbm_to_vmem [thread:$0]  (!%p6384_p8), %s7290_s17, 256, %s491_s18, [#allocation4], %s7255_s2, %s7255_s2, %s7256_s11  }
  0x3c   : > { %p124_p1 = scmp.eq.s32.totalorder %s123_s21, 0  ;;  %p133_p4 = scmp.ne.s32.totalorder %s6217_s26, %s6213_s25 }
  0x3d   : > { %p134_p5 = scmp.eq.s32.totalorder %s6221_s27, 0  ;;  %p5644_p6 = scmp.lt.s32.totalorder %s6221_s27, 2 }
  0x3e   : > { %s6424_s1 = scalar_select %p124_p1, %s6217_s26, %s126_s20  }
  0x3f   : > { %p135_p9 = por %p134_p5, %p133_p4  ;;  %s528_s22 = sand.u32 1, %s6221_s27  }
  0x40   : > { %7291 = sst [smem:[#allocation21_spill]] %s6424_s1  ;;  %s6428_s23 = sand.u32 1, %s6217_s26  }
  0x41   : > { %s4968_s24 = sshll.u32 %s6428_s23, 1  ;;  %s4969_s30 = sshll.u32 %s6221_s27, 5 }
  0x42   : > { %s7292_s4 = sld [smem:[#allocation26_spill]]  ;;  %s532_s18 = scalar_lea.vmem [#allocation8], %s4968_s24 }
  0x43   : > { %s539_s20 = sshll.u32 %s532_s18, 4  ;;  %p6437_p11 = pnand %p5644_p6, %p135_p9  ;;  %s6441_s20 = int_to_ptr.vmem [resolvable:$true] %s539_s20 }
  0x44   : > { %s4970_s14 = sshll.u32 %s6428_s23, 2  ;;  %s6444_s16 = scalar_lea.sflag [#allocation4], %s528_s22 }
  0x45   : > { %s7293_s21 = scalar_select %p6437_p11, 1, 0 }
  0x46   : > { %p6450_p13 = pneg %p6437_p11 }
  0x48   : > { %s6435_s8 = scalar_lea.hbm %s7292_s4, %s4969_s30  ;;  %s5946_s30 = scalar_lea.hbm %s7292_s4, 64 }
  0x49   : > { %s5941_s2 = scalar_lea.hbm %s6435_s8, 32  ;;  %p5947_p3 = scmp.lt.u32.totalorder %s6435_s8, %s7292_s4 }
  0x4a   : > { %p5942_p12 = scmp.ne.s32.totalorder %s6435_s8, %s5941_s2  ;;  %p5948_p7 = scmp.lt.u32.totalorder %s5946_s30, %s5941_s2 }
  0x4b   : > { %s7294_s9 = scalar_select %p6450_p13, 1, 0 }
  0x4c   : > { %p5944_p0 = pnand %p6450_p13, %p5942_p12  ;;  %p5949_p1 = por %p5948_p7, %p5947_p3 }
  0x4d   : > { %p5950_p4 = scmp.lt.u32.totalorder %s5941_s2, %s6435_s8 }
  0x4e   : > { %p5945_p2 = pneg %p5944_p0 }
  0x4f   : > { %p5951_p5 = por %p5950_p4, %p5949_p1 }
  0x51   : > { %p5952_p6 = pnand %p5951_p5, %p5945_p2 }
  0x53   : > { %5955 = shalt.err (!%p5952_p6)
}
  0x54   : > { %s5956_s22 = scalar_lea.vmem %s6441_s20, 32  ;;  %s6226_s10 = smov [#allocation8]  }
  0x55   : > { %p5957_p9 = scmp.ne.s32.totalorder %s6441_s20, %s5956_s22  ;;  %s5961_s24 = sshll.u32 %s6226_s10, 4  ;;  %s5962_s24 = int_to_ptr.vmem [resolvable:$false] %s5961_s24 }
  0x56   : > { %s5963_s11 = scalar_lea.vmem %s5962_s24, 64  ;;  %p5964_p10 = scmp.lt.s32.totalorder %s6441_s20, %s5962_s24 }
  0x57   : > { %p5959_p12 = pnand %p5957_p9, %p6450_p13  ;;  %p5965_p8 = scmp.lt.s32.totalorder %s5963_s11, %s5956_s22 }
  0x59   : > { %p5960_p0 = pneg %p5959_p12  ;;  %p5966_p3 = por %p5965_p8, %p5964_p10 }
  0x5b   : > { %p5967_p7 = pnand %p5966_p3, %p5960_p0 }
  0x5d   : > { %5970 = shalt.err (!%p5967_p7)
}
  0x5e   : > { %5626 = dma.hbm_to_vmem [thread:$0]  (!%p6437_p11), %s6435_s8, 32, %s6441_s20, %s6444_s16  }
  0x5f   : > { %s4971_s2 = sshll.u32 %s6221_s27, 6  ;;  %s550_s30 = scalar_lea.vmem [#allocation9], %s4970_s14 }
  0x60   : > { %s557_s18 = sshll.u32 %s550_s30, 4  ;;  %s7295_s5 = sld [smem:[#allocation27_spill]]  ;;  %s558_s18 = int_to_ptr.vmem [resolvable:$true] %s557_s18 }
  0x66   : > { %s555_s22 = scalar_lea.hbm %s7295_s5, %s4971_s2  ;;  %s5976_s1 = scalar_lea.hbm %s7295_s5, 128 }
  0x67   : > { %s5971_s24 = scalar_lea.hbm %s555_s22, 64  ;;  %p5977_p1 = scmp.lt.u32.totalorder %s555_s22, %s7295_s5 }
  0x68   : > { %p5972_p8 = scmp.ne.s32.totalorder %s555_s22, %s5971_s24  ;;  %p5978_p4 = scmp.lt.u32.totalorder %s5976_s1, %s5971_s24 }
  0x69   : > { %p5980_p6 = scmp.lt.u32.totalorder %s5971_s24, %s555_s22 }
  0x6a   : > { %p5974_p10 = pnand %p5972_p8, %p6450_p13  ;;  %p5979_p5 = por %p5978_p4, %p5977_p1 }
  0x6c   : > { %p5975_p2 = pneg %p5974_p10  ;;  %p5981_p9 = por %p5980_p6, %p5979_p5 }
  0x6e   : > { %p5982_p12 = pnand %p5981_p9, %p5975_p2 }
  0x70   : > { %5985 = shalt.err (!%p5982_p12)
}
  0x71   : > { %s5986_s4 = scalar_lea.vmem %s558_s18, 64  ;;  %s6227_s20 = smov [#allocation9]  }
  0x72   : > { %p5987_p0 = scmp.ne.s32.totalorder %s558_s18, %s5986_s4  ;;  %s5991_s14 = sshll.u32 %s6227_s20, 4  ;;  %s5992_s14 = int_to_ptr.vmem [resolvable:$false] %s5991_s14 }
  0x73   : > { %s5993_s17 = scalar_lea.vmem %s5992_s14, 128  ;;  %p5994_p8 = scmp.lt.s32.totalorder %s558_s18, %s5992_s14 }
  0x74   : > { %p5989_p3 = pnand %p5987_p0, %p6450_p13  ;;  %p5995_p10 = scmp.lt.s32.totalorder %s5993_s17, %s5986_s4 }
  0x76   : > { %p5990_p7 = pneg %p5989_p3  ;;  %p5996_p11 = por %p5995_p10, %p5994_p8 }
  0x78   : > { %p5997_p1 = pnand %p5996_p11, %p5990_p7 }
  0x7a   : > { %6000 = shalt.err (!%p5997_p1)
}
  0x7b   : > { %p7296_p4 = scmp.ne.s32.totalorder %s7293_s21, 0  ;;  %s4972_s26 = sshll.u32 %s6428_s23, 3 }
  0x7c   : > { %s5120_s1 = sshll.u32 %s6221_s27, 7  ;;  %s7297_s6 = sld [smem:[#allocation28_spill]] }
  0x7d   : > { %5629 = dma.hbm_to_vmem [thread:$0]  (!%p7296_p4), %s555_s22, 64, %s558_s18, %s6444_s16  }
  0x7e   : > { %s568_s24 = scalar_lea.vmem [#allocation10], %s4972_s26 }
  0x7f   : > { %s575_s11 = sshll.u32 %s568_s24, 4  ;;  %s6500_s11 = int_to_ptr.vmem [resolvable:$true] %s575_s11 }
  0x82   : > { %s6498_s10 = scalar_lea.hbm %s7297_s6, %s5120_s1  ;;  %s6006_s4 = scalar_lea.hbm %s7297_s6, 256 }
  0x83   : > { %s6001_s8 = scalar_lea.hbm %s6498_s10, 128  ;;  %p6007_p6 = scmp.lt.u32.totalorder %s6498_s10, %s7297_s6 }
  0x84   : > { %p6002_p11 = scmp.ne.s32.totalorder %s6498_s10, %s6001_s8  ;;  %p6008_p9 = scmp.lt.u32.totalorder %s6006_s4, %s6001_s8 }
  0x85   : > { %p6010_p0 = scmp.lt.u32.totalorder %s6001_s8, %s6498_s10 }
  0x86   : > { %p6004_p2 = pnand %p6002_p11, %p6450_p13  ;;  %p6009_p12 = por %p6008_p9, %p6007_p6 }
  0x88   : > { %p6005_p5 = pneg %p6004_p2  ;;  %p6011_p3 = por %p6010_p0, %p6009_p12 }
  0x8a   : > { %p6012_p7 = pnand %p6011_p3, %p6005_p5 }
  0x8c   : > { %6015 = shalt.err (!%p6012_p7)
}
  0x8d   : > { %s6016_s17 = scalar_lea.vmem %s6500_s11, 128  ;;  %s6228_s26 = smov [#allocation10]  }
  0x8e   : > { %p6017_p8 = scmp.ne.s32.totalorder %s6500_s11, %s6016_s17  ;;  %s6021_s1 = sshll.u32 %s6228_s26, 4  ;;  %s6022_s1 = int_to_ptr.vmem [resolvable:$false] %s6021_s1 }
  0x8f   : > { %s6023_s2 = scalar_lea.vmem %s6022_s1, 256  ;;  %p6024_p11 = scmp.lt.s32.totalorder %s6500_s11, %s6022_s1 }
  0x90   : > { %p6019_p10 = pnand %p6017_p8, %p6450_p13  ;;  %p6025_p2 = scmp.lt.s32.totalorder %s6023_s2, %s6016_s17 }
  0x92   : > { %p6020_p1 = pneg %p6019_p10  ;;  %p6026_p6 = por %p6025_p2, %p6024_p11 }
  0x94   : > { %p6027_p9 = pnand %p6026_p6, %p6020_p1 }
  0x96   : > { %6030 = shalt.err (!%p6027_p9)
}
  0x97   : > { %s6229_s30 = smov 64   ;;  %s6230_s24 = smov 4  }
  0x98   : > { %5632 = dma.hbm_to_vmem [thread:$0]  (!%p7296_p4), %s6498_s10, 128, %s6500_s11, %s6444_s16, %s6229_s30, %s6229_s30, %s6230_s24  }
  0x99   : > { %s6528_s8 = sshll.u32 %s6428_s23, 4  ;;  %s6531_s18 = sshll.u32 %s6221_s27, 8 }
  0x9a   : > { %s7298_s12 = sld [smem:[#allocation34_spill]]  ;;  %s629_s14 = scalar_lea.vmem [#allocation11], %s6528_s8 }
  0x9b   : > { %s636_s17 = sshll.u32 %s629_s14, 4  ;;  %s7299_s13 = sld [smem:[#allocation35_spill]]  ;;  %s6540_s17 = int_to_ptr.vmem [resolvable:$true] %s636_s17 }
  0xa0   : > { %s6537_s20 = scalar_lea.hbm %s7298_s12, %s6531_s18  ;;  %s6036_s2 = scalar_lea.hbm %s7298_s12, 512 }
  0xa1   : > { %s6546_s27 = scalar_lea.hbm %s7299_s13, %s6531_s18  ;;  %s6031_s11 = scalar_lea.hbm %s6537_s20, 256 }
  0xa2   : > { %p6032_p5 = scmp.ne.s32.totalorder %s6537_s20, %s6031_s11  ;;  %p6037_p3 = scmp.lt.u32.totalorder %s6537_s20, %s7298_s12 }
  0xa3   : > { %p6038_p7 = scmp.lt.u32.totalorder %s6036_s2, %s6031_s11  ;;  %p6040_p10 = scmp.lt.u32.totalorder %s6031_s11, %s6537_s20 }
  0xa4   : > { %p6034_p12 = pnand %p6032_p5, %p6450_p13 }
  0xa5   : > { %p6039_p8 = por %p6038_p7, %p6037_p3 }
  0xa6   : > { %p6035_p0 = pneg %p6034_p12 }
  0xa7   : > { %p6041_p1 = por %p6040_p10, %p6039_p8 }
  0xa9   : > { %p6042_p11 = pnand %p6041_p1, %p6035_p0 }
  0xab   : > { %6045 = shalt.err (!%p6042_p11)
}
  0xac   : > { %s6046_s14 = scalar_lea.vmem %s6540_s17, 256  ;;  %s6231_s23 = smov [#allocation11]  }
  0xad   : > { %p6047_p2 = scmp.ne.s32.totalorder %s6540_s17, %s6046_s14  ;;  %s6051_s10 = sshll.u32 %s6231_s23, 4  ;;  %s6052_s10 = int_to_ptr.vmem [resolvable:$false] %s6051_s10 }
  0xae   : > { %s6053_s26 = scalar_lea.vmem %s6052_s10, 512  ;;  %p6054_p5 = scmp.lt.s32.totalorder %s6540_s17, %s6052_s10 }
  0xaf   : > { %p6049_p6 = pnand %p6047_p2, %p6450_p13  ;;  %p6055_p12 = scmp.lt.s32.totalorder %s6053_s26, %s6046_s14 }
  0xb1   : > { %p6050_p9 = pneg %p6049_p6  ;;  %p6056_p3 = por %p6055_p12, %p6054_p5 }
  0xb3   : > { %p6057_p7 = pnand %p6056_p3, %p6050_p9 }
  0xb5   : > { %6060 = shalt.err (!%p6057_p7)
}
  0xb6   : > { %5635 = dma.hbm_to_vmem [thread:$0]  (!%p7296_p4), %s6537_s20, 256, %s6540_s17, %s6444_s16, %s6229_s30, %s6229_s30, %s6230_s24  }
  0xb7   : > { %s650_s11 = scalar_lea.vmem [#allocation12], %s6528_s8  ;;  %s6232_s2 = smov [#allocation6]  }
  0xb8   : > { %s657_s1 = sshll.u32 %s650_s11, 4  ;;  %s6576_s22 = sshll.u32 %s6232_s2, 4  ;;  %s6574_s1 = int_to_ptr.vmem [resolvable:$true] %s657_s1  ;;  %s505_s22 = int_to_ptr.vmem [resolvable:$true] %s6576_s22 }
  0xb9   : > { %s6061_s4 = scalar_lea.hbm %s6546_s27, 256  ;;  %s6066_s10 = scalar_lea.hbm %s7299_s13, 512 }
  0xba   : > { %p6062_p0 = scmp.ne.s32.totalorder %s6546_s27, %s6061_s4  ;;  %p6067_p1 = scmp.lt.u32.totalorder %s6546_s27, %s7299_s13 }
  0xbb   : > { %p6068_p11 = scmp.lt.u32.totalorder %s6066_s10, %s6061_s4  ;;  %p6070_p6 = scmp.lt.u32.totalorder %s6061_s4, %s6546_s27 }
  0xbc   : > { %p6064_p8 = pnand %p6062_p0, %p6450_p13 }
  0xbd   : > { %p6069_p2 = por %p6068_p11, %p6067_p1 }
  0xbe   : > { %p6065_p10 = pneg %p6064_p8 }
  0xbf   : > { %p6071_p9 = por %p6070_p6, %p6069_p2 }
  0xc1   : > { %p6072_p5 = pnand %p6071_p9, %p6065_p10 }
  0xc3   : > { %6075 = shalt.err (!%p6072_p5)
}
  0xc4   : > { %s6076_s20 = scalar_lea.vmem %s6574_s1, 256  ;;  %s6233_s17 = smov [#allocation12]  }
  0xc5   : > { %p6077_p12 = scmp.ne.s32.totalorder %s6574_s1, %s6076_s20  ;;  %s6081_s11 = sshll.u32 %s6233_s17, 4  ;;  %s6082_s11 = int_to_ptr.vmem [resolvable:$false] %s6081_s11 }
  0xc6   : > { %s6083_s5 = scalar_lea.vmem %s6082_s11, 512  ;;  %p6084_p0 = scmp.lt.s32.totalorder %s6574_s1, %s6082_s11 }
  0xc7   : > { %p6079_p3 = pnand %p6077_p12, %p6450_p13  ;;  %p6085_p8 = scmp.lt.s32.totalorder %s6083_s5, %s6076_s20 }
  0xc9   : > { %p6080_p7 = pneg %p6079_p3  ;;  %p6086_p1 = por %p6085_p8, %p6084_p0 }
  0xcb   : > { %p6087_p11 = pnand %p6086_p1, %p6080_p7 }
  0xcd   : > { %6090 = shalt.err (!%p6087_p11)
}
  0xce   : > { %5638 = dma.hbm_to_vmem [thread:$0]  (!%p7296_p4), %s6546_s27, 256, %s6574_s1, %s6444_s16, %s6229_s30, %s6229_s30, %s6230_s24  }
  0xcf   : > { %s7300_s14 = sld [smem:[#allocation23_spill]]  ;;  %p7301_p2 = scmp.ne.s32.totalorder %s7287_s19, 0 }
  0xd1   : > { %p7302_p6 = pneg %p7301_p2 }
  0xd5   : > { %s6091_s23 = scalar_lea.hbm %s7300_s14, 128 }
  0xd6   : > { %p6092_p10 = scmp.ne.s32.totalorder %s7300_s14, %s6091_s23  ;;  %p6098_p12 = scmp.lt.u32.totalorder %s6091_s23, %s7300_s14 }
  0xd8   : > { %p6094_p9 = pnand %p6092_p10, %p7302_p6 }
  0xda   : > { %p6095_p5 = pneg %p6094_p9 }
  0xdc   : > { %p6100_p3 = pnand %p6098_p12, %p6095_p5 }
  0xde   : > { %6103 = shalt.err (!%p6100_p3)
}
  0xdf   : > { %s6104_s30 = scalar_lea.vmem %s505_s22, 128  ;;  %p7303_p0 = pmov %p7302_p6 }
  0xe0   : > { %p6105_p7 = scmp.ne.s32.totalorder %s505_s22, %s6104_s30  ;;  %p6112_p11 = scmp.lt.s32.totalorder %s505_s22, %s505_s22 }
  0xe1   : > { %p6113_p4 = scmp.lt.s32.totalorder %s6104_s30, %s6104_s30 }
  0xe2   : > { %p6107_p8 = pnand %p6105_p7, %p7303_p0 }
  0xe3   : > { %p6114_p13 = por %p6113_p4, %p6112_p11 }
  0xe4   : > { %p6108_p1 = pneg %p6107_p8 }
  0xe6   : > { %p6115_p6 = pnand %p6114_p13, %p6108_p1 }
  0xe8   : > { %6118 = shalt.err (!%p6115_p6)
}
  0xe9   : > { %5622 = dma.hbm_to_vmem [thread:$0]  (!%p7301_p2), %s7300_s14, 128, %s505_s22, [#allocation7]  }
  0xea   : > { %s6628_s5 = scalar_lea.hbm %s7243_s15, %s6531_s18  ;;  %s679_s2 = scalar_lea.vmem [#allocation13], %s6528_s8 }
  0xeb   : > { %s686_s4 = sshll.u32 %s679_s2, 4  ;;  %s6119_s19 = scalar_lea.hbm %s6628_s5, 256  ;;  %s6631_s4 = int_to_ptr.vmem [resolvable:$true] %s686_s4 }
  0xec   : > { %p6120_p13 = scmp.ne.s32.totalorder %s6628_s5, %s6119_s19  ;;  %p7304_p4 = scmp.ne.s32.totalorder %s7294_s9, 0 }
  0xed   : > { %s6124_s10 = scalar_lea.hbm %s7243_s15, 512  ;;  %p6125_p2 = scmp.lt.u32.totalorder %s6628_s5, %s7243_s15 }
  0xee   : > { %p6122_p10 = pnand %p6120_p13, %p7304_p4  ;;  %p6126_p5 = scmp.lt.u32.totalorder %s6124_s10, %s6119_s19 }
  0xef   : > { %p6128_p3 = scmp.lt.u32.totalorder %s6119_s19, %s6628_s5 }
  0xf0   : > { %p6123_p9 = pneg %p6122_p10  ;;  %p6127_p12 = por %p6126_p5, %p6125_p2 }
  0xf2   : > { %p6129_p7 = por %p6128_p3, %p6127_p12 }
  0xf4   : > { %p6130_p0 = pnand %p6129_p7, %p6123_p9 }
  0xf6   : > { %6133 = shalt.err (!%p6130_p0)
}
  0xf7   : > { %s6134_s8 = scalar_lea.vmem %s6631_s4, 256  ;;  %s6234_s20 = smov [#allocation13]  }
  0xf8   : > { %p6135_p8 = scmp.ne.s32.totalorder %s6631_s4, %s6134_s8  ;;  %s6139_s17 = sshll.u32 %s6234_s20, 4  ;;  %s6140_s17 = int_to_ptr.vmem [resolvable:$false] %s6139_s17 }
  0xf9   : > { %s6141_s30 = scalar_lea.vmem %s6140_s17, 512  ;;  %p6142_p6 = scmp.lt.s32.totalorder %s6631_s4, %s6140_s17 }
  0xfa   : > { %p6137_p1 = pnand %p6135_p8, %p7304_p4  ;;  %p6143_p13 = scmp.lt.s32.totalorder %s6141_s30, %s6134_s8 }
  0xfc   : > { %p6138_p11 = pneg %p6137_p1  ;;  %p6144_p10 = por %p6143_p13, %p6142_p6 }
  0xfe   : > { %p6145_p2 = pnand %p6144_p10, %p6138_p11 }
 0x100   : > { %6148 = shalt.err (!%p6145_p2)
}
 0x101   : > { %p7305_p9 = scmp.ne.s32.totalorder %s7293_s21, 0  ;;  %s7306_s24 = smov 8  }
 0x102   : > { %s7307_s27 = smov 128   ;;  %p7308_p4 = scmp.ne.s32.totalorder %s7286_s0, 0 }
 0x103   : > { %5641 = dma.hbm_to_vmem [thread:$0]  (!%p7305_p9), %s6628_s5, 256, %s6631_s4, %s6444_s16, %s7307_s27, %s7307_s27, %s7306_s24  }
 0x104   : > { %698 = sbr.rel (%p7308_p4) target bundleno = 8814 (0x226e), region = 88  ;;  %p7309_p5 = scmp.eq.s32.totalorder (!%p7308_p4), %s6363_s28, 0 }
 0x10b   : > { %6192 = dma.done.wait (%p7309_p5), [#allocation4], 256   ;;  %p7310_p12 = pmov %p7309_p5 }
 0x10c   : > { %p7311_p3 = pmov %p7309_p5 }
 0x10d   : > { %6194 = vsyncadd (%p7310_p12), [#allocation4], 4294967040 }
 0x10e   : > { %6196 = dma.done.wait (%p7311_p3), [#allocation7], 128   ;;  %p7312_p7 = pmov %p7311_p3 }
 0x10f   : > { %s708_s21 = sand.u32 1, %s6363_s28   ;;  %s710_s16 = sand.u32 1, %s6213_s25  }
 0x110   : > { %6198 = vsyncadd (%p7312_p7), [#allocation7], 4294967168  ;;  %s4987_s9 = sshll.u32 %s710_s16, 1  ;;  %s709_s0 = scalar_lea.sflag [#allocation4], %s708_s21 }
 0x111   : > { %s6670_s1 = scalar_lea.vmem [#allocation8], %s4987_s9  ;;  %p7313_p0 = scmp.ne.s32.totalorder %s7285_s29, 0 }
 0x113   : > { %6200 = dma.done.wait (%p7313_p0), %s709_s0, 992  }
 0x114   : > { %6202 = vsyncadd (%p7313_p0), %s709_s0, 4294966304  ;;  %s4988_s11 = sshll.u32 %s710_s16, 2  ;;  %s4989_s5 = sshll.u32 %s710_s16, 3 }
 0x115   : > { %s6676_s2 = sshll.u32 %s710_s16, 4  ;;  %p862_p8 = scmp.lt.s32.totalorder %s6363_s28, 1 }
 0x116   : > { %s7314_s3 = sld [smem:[#allocation25_spill]]  ;;  %s7315_s7 = sld [smem:[#allocation29_spill]] }
 0x117   : > { %s863_s4 = scalar_select %p862_p8, %s6363_s28, 1 }
 0x118   : > { %s7316_s30 = sld [smem:[#allocation30_spill]]  ;;  %s7317_s16 = sld [smem:[#allocation31_spill]] }
 0x119   : > { %s4993_s19 = sshll.u32 %s863_s4, 2  ;;  %s5124_s23 = sshll.u32 %s863_s4, 4 }
 0x11a   : > { %s7318_s12 = sld [smem:[#allocation32_spill]]  ;;  %s7319_s18 = sld [smem:[#allocation33_spill]] }
 0x11b   : > { %s7320_s17 = sld [smem:[#allocation36_spill]]  ;;  %s6713_s13 = scalar_lea.vmem [#allocation9], %s4988_s11 }
 0x11c   : > { %s865_s26 = scalar_lea.vmem %s7314_s3, %s4993_s19  ;;  %s6686_s8 = scalar_lea.vmem %s7315_s7, %s5124_s23 }
 0x11d   : > { %s5129_s3 = sshll.u32 %s863_s4, 5  ;;  %s6715_s27 = scalar_lea.vmem [#allocation10], %s4989_s5 }
 0x11e   : > { %s6691_s24 = scalar_lea.vmem %s7316_s30, %s5124_s23  ;;  %s6696_s9 = scalar_lea.vmem %s7317_s16, %s5124_s23 }
 0x11f   : > { %s739_s21 = scalar_lea.vmem [#allocation11], %s6676_s2  ;;  %s748_s16 = scalar_lea.vmem [#allocation12], %s6676_s2 }
 0x120   : > { %s6701_s22 = scalar_lea.vmem %s7318_s12, %s5124_s23  ;;  %s6706_s29 = scalar_lea.vmem %s7319_s18, %s5124_s23 }
 0x121   : > { %s6711_s30 = scalar_lea.vmem %s7320_s17, %s5129_s3  ;;  %s6720_s6 = scalar_lea.vmem [#allocation13], %s6676_s2 }
 0x122   : > { %p7321_p1 = scmp.ne.s32.totalorder %s6363_s28, 0 }
 0x123   : > { %v901_v0 = vld [vmem:[#allocation3] sm:$0xff] (!%p7321_p1)  ;;  %v903_v1 = vld [vmem:[#allocation6] sm:$0xff] (!%p7321_p1)  ;;  %vm906_vm0 = vcmask (!%p7321_p1), 261120   ;;  %v902_v2 = vld [vmem:[#allocation3 + $0x8] sm:$0xff] (!%p7321_p1) }
 0x124   : > { %900 = sbr.rel (%p7321_p1) target bundleno = 299 (0x12b), region = 124  ;;  %v904_v3 = vadd.f32 (!%p7321_p1), %v903_v1, %v901_v0  ;;  %v905_v4 = vadd.f32 (!%p7321_p1), %v903_v1, %v902_v2 }
 0x126   : > { %907 = vst.msk [vmem:[#allocation2] sm:$0xff] (!%p7321_p1), %vm906_vm0, %v904_v3  ;;  %908 = vst.msk [vmem:[#allocation2 + $0x8] sm:$0xff] (!%p7321_p1), %vm906_vm0, %v905_v4 }
 0x12b PF: > { %v915_v5 = vld [vmem:[%s865_s26] sm:$0xf]  ;;  %vm930_vm1 = vcmask 1043456   ;;  %s7322_s12 = sld [smem:[#allocation24_spill]]  ;;  %vm923_vm2 = vcmask 64512   ;;  %vm1002_vm3 = vcmask 1041408  }
 0x12c   : > { %5589 = vmatprep.subr.msk.bf16.mxu1 %vm930_vm1, %v915_v5  ;;  %v932_v8 = vsel %vm930_vm1, %v915_v5, 0  ;;  %v987_v13 = vld [vmem:[%s6670_s1] sm:$0x3]  ;;  %v5007_v15 = vld [vmem:[%s6720_s6] ss:$0 sm:$0xff]  ;;  %vm995_vm4 = vcmask 31744   ;;  %vm6779_vm8 = vmpackc.low %vm923_vm2, %vm923_vm2 }
 0x12d   : > { %5250 = vmatpush3.bf16.msra.mxu1 %v932_v8  ;;  %v1004_v14 = vsel %vm1002_vm3, %v987_v13, 0  ;;  %v1059_v30 = vld [vmem:[%s6713_s13] sm:$0xf]  ;;  %v5010_v32 = vld [vmem:[%s6720_s6 + $0x1] ss:$0 sm:$0xff]  ;;  %v5806_v47 = vld [vmem:[%s6715_s27] sm:$0xff]  }
 0x12e   : > { %5590 = vmatprep.subr.msk.bf16.mxu1 %vm1002_vm3, %v987_v13  ;;  %5591 = vmatprep.subr.msk.bf16.mxu0 %vm930_vm1, %v1059_v30  ;;  %v1074_v31 = vsel %vm930_vm1, %v1059_v30, 0  ;;  %v5013_v48 = vld [vmem:[%s6720_s6 + $0x2] ss:$0 sm:$0xff]  ;;  %vm1144_vm5 = vcmask 130048   ;;  %v5808_v0 = vld [vmem:[%s6691_s24 + $0x8] sm:$0xff]   ;;  %v6235_v2 = vmov 0.0  }
 0x12f   : > { %5262 = vmatpush3.bf16.msra.mxu0 %v1074_v31  ;;  %v5807_v63 = vld [vmem:[%s6691_s24] sm:$0xff]   ;;  %vm6236_vm6 = vmmov 0   ;;  %v5810_v3 = vld [vmem:[%s6686_s8 + $0x8] sm:$0xff]   ;;  %vm1222_vm7 = vcmask 261120   ;;  %s6238_s13 = smov 96   ;;  %s6239_s1 = smov 120  }
 0x130   : > { %v5809_v1 = vld [vmem:[%s6686_s8] sm:$0xff]   ;;  %5273 = vmatprep.subr.bf16.mxu0 %v6235_v2  ;;  %v6761_v5 = vld [vmem:[#allocation2 + $0x8] sm:$0xff]  ;;  %s6240_s8 = smov 88   ;;  %s6241_s24 = smov 112   ;;  %vm2751_vm9 = vcmask 195584   ;;  %vm4539_vm14 = vcmask 523264  }
 0x131   : > { %v911_v6 = vld [vmem:[%s7322_s12] sm:$0xff]  ;;  %v912_v7 = vld [vmem:[%s7322_s12 + $0x8] sm:$0xff]  ;;  %v913_v10 = vld [vmem:[%s7322_s12 + $0x10] sm:$0xff]  ;;  %s6242_s19 = smov 80   ;;  %s6243_s10 = smov 104  }
 0x132   : > { %v916_v9 = vpack.c.bf16 %v912_v7, %v911_v6  ;;  %v914_v11 = vld [vmem:[%s7322_s12 + $0x18] sm:$0xff]  ;;  %v6759_v4 = vld [vmem:[#allocation2] sm:$0xff]  ;;  %s6244_s18 = smov 72   ;;  %s6245_s20 = smov 8  }
 0x133   : > { %v917_v12 = vpack.c.bf16 %v914_v11, %v913_v10  ;;  %v1204_v6 = vpack.c.bf16 %v6761_v5, %v6759_v4  ;;  %v5016_v8 = vld [vmem:[%s6720_s6 + $0x3] ss:$0 sm:$0xff]  ;;  %s6246_s17 = smov 16   ;;  %s6247_s27 = smov 24  }
 0x134   : > { %5251 = vmatprep.mubr.msk.bf16.mxu1 %vm923_vm2, %v916_v9  ;;  %s6251_s3 = smov 40   ;;  %p5115_p11 = scmp.ne.s32.totalorder %s6363_s28, 1 }
 0x135   : > { %5252 = vmatmul.mubr.msk.bf16.vlgmr.msra.gmra.mrb[0].mxu1 %vm923_vm2, %v917_v12 }
 0x136   : > { %5256 = vmatpush3.bf16.msra.mxu1 %v1004_v14 }
 0x137   : > { %5267 = vmatprep.subr.bf16.mxu1 %v5806_v47 }
 0x208   : > { %v5253_v16 = vpop.f32.mrb[0].mxu1 }
 0x209   : > { %v977_v17 = vadd.f32 %v5253_v16, %v5007_v15  ;;  %v968_v18 = vpop.f32.mrb[1].mxu1 }
 0x20a   : > { %v969_v19 = vadd.f32 %v5007_v15, %v968_v18  ;;  %v5254_v20 = vpop.f32.mrb[2].mxu1  ;;  %v6237_v18 = vmov 0.0|0.0  }
 0x20b   : > { %v980_v21 = vadd.f32 %v5254_v20, %v5007_v15  ;;  %v971_v22 = vpop.f32.mrb[3].mxu1  ;;  %v985_v24 = vmax.f32 %v977_v17, 0.0 }
 0x20c   : > { %v972_v23 = vadd.f32 %v5007_v15, %v971_v22  ;;  %v983_v26 = vmax.f32 %v969_v19, 0.0 }
 0x20d   : > { %v986_v25 = vmax.f32 %v980_v21, 0.0 }
 0x20e   : > { %v984_v27 = vmax.f32 %v972_v23, 0.0 }
 0x20f   : > { %v989_v28 = vpack.c.bf16 %v986_v25, %v985_v24  ;;  %v5024_v24 = vld [vmem:[%s6720_s6 + $0x5] ss:$0 sm:$0xff] }
 0x210   : > { %v988_v29 = vpack.c.bf16 %v984_v27, %v983_v26 }
 0x212   : > { %5257 = vmatprep.mubr.msk.bf16.mxu1 %vm995_vm4, %v988_v29 }
 0x213   : > { %5258 = vmatmul.mubr.msk.bf16.vlgmr.msra.gmra.mrb[4].mxu1 %vm995_vm4, %v989_v28 }
 0x214   : > { %5268 = vmatpush3.bf16.msra.mxu1 %v5806_v47 }
 0x215   : > { %5281 = vmatprep.subr.bf16.mxu1 %v5807_v63 }
 0x2e6   : > { %v5259_v33 = vpop.f32.mrb[4].mxu1 }
 0x2e7   : > { %v1049_v34 = vadd.f32 %v5259_v33, %v5010_v32  ;;  %v1040_v35 = vpop.f32.mrb[5].mxu1 }
 0x2e8   : > { %v1041_v36 = vadd.f32 %v5010_v32, %v1040_v35  ;;  %v5260_v37 = vpop.f32.mrb[6].mxu1 }
 0x2e9   : > { %v1052_v38 = vadd.f32 %v5260_v37, %v5010_v32  ;;  %v1043_v39 = vpop.f32.mrb[7].mxu1  ;;  %v1057_v41 = vmax.f32 %v1049_v34, 0.0  ;;  %v5020_v37 = vld [vmem:[%s6720_s6 + $0x4] ss:$0 sm:$0xff] }
 0x2ea   : > { %v1044_v40 = vadd.f32 %v5010_v32, %v1043_v39  ;;  %v1055_v43 = vmax.f32 %v1041_v36, 0.0 }
 0x2eb   : > { %v1058_v42 = vmax.f32 %v1052_v38, 0.0 }
 0x2ec   : > { %v1056_v44 = vmax.f32 %v1044_v40, 0.0 }
 0x2ed   : > { %v1061_v45 = vpack.c.bf16 %v1058_v42, %v1057_v41 }
 0x2ee   : > { %v1060_v46 = vpack.c.bf16 %v1056_v44, %v1055_v43 }
 0x2f0   : > { %5263 = vmatprep.mubr.msk.bf16.mxu0 %vm923_vm2, %v1060_v46 }
 0x2f1   : > { %5264 = vmatmul.mubr.msk.bf16.vlgmr.msra.gmra.mrb[0].mxu0 %vm923_vm2, %v1061_v45 }
 0x2f2   : > { %5277 = vmatprep.mubr.msk.bf16.mxu0 %vm6236_vm6, %v6235_v2  ;;  %5274 = vmatpush3.bf16.msra.mxu0 %v5809_v1 }
 0x2f3   : > { %5275 = vmatprep.subr.bf16.mxu0 %v6235_v2 }
 0x2f6   : > { %5276 = vmatpush3.bf16.msra.mxu0 %v5810_v3 }
 0x2f7   : > { %5533 = vmatprep.subr.bf16.mxu0 %v6237_v18 }
 0x2f9   : > { %5278 = vmatmul.mubr.msk.bf16.vlgmr.msra.gmra.mrb[4].mxu0 %vm1222_vm7, %v1204_v6 }
 0x2fa   : > { %5293 = vmatprep.mubr.msk.f32.mxu0 %vm6236_vm6, %v6235_v2 }
 0x3c4   : > { %v5265_v49 = vpop.f32.mrb[0].mxu0 }
 0x3c5   : > { %v1119_v50 = vadd.f32 %v5265_v49, %v5013_v48  ;;  %v1110_v51 = vpop.f32.mrb[1].mxu0 }
 0x3c6   : > { %v1111_v52 = vadd.f32 %v5013_v48, %v1110_v51  ;;  %v5266_v53 = vpop.f32.mrb[2].mxu0 }
 0x3c7   : > { %v1122_v54 = vadd.f32 %v5266_v53, %v5013_v48  ;;  %v1113_v55 = vpop.f32.mrb[3].mxu0  ;;  %v1127_v57 = vmax.f32 %v1119_v50, 0.0 }
 0x3c8   : > { %v1114_v56 = vadd.f32 %v5013_v48, %v1113_v55  ;;  %v1125_v59 = vmax.f32 %v1111_v52, 0.0 }
 0x3c9   : > { %v1128_v58 = vmax.f32 %v1122_v54, 0.0 }
 0x3ca   : > { %v1126_v60 = vmax.f32 %v1114_v56, 0.0 }
 0x3cb   : > { %v1132_v61 = vpack.c.bf16 %v1128_v58, %v1127_v57 }
 0x3cc   : > { %v1131_v62 = vpack.c.bf16 %v1126_v60, %v1125_v59  ;;  %v1260_v19 = vpop.f32.mrb[4].mxu0 }
 0x3cd   : > { %v5279_v20 = vpop.f32.mrb[5].mxu0  ;;  %v6798_v39 = vadd.f32 %v5020_v37, %v1260_v19 }
 0x3ce   : > { %5269 = vmatprep.mubr.msk.bf16.mxu1 %vm1144_vm5, %v1131_v62  ;;  %v1263_v21 = vpop.f32.mrb[6].mxu0 }
 0x3cf   : > { %5270 = vmatmul.mubr.msk.bf16.vlgmr.msra.gmra.mrb[8].mxu1 %vm1144_vm5, %v1132_v61  ;;  %v5280_v22 = vpop.f32.mrb[7].mxu0  ;;  %v6796_v38 = vadd.f32 %v5020_v37, %v1263_v21 }
 0x3d0   : > { %5282 = vmatpush3.bf16.msra.mxu1 %v5807_v63 }
 0x3d1   : > { %5283 = vmatprep.subr.bf16.mxu1 %v5808_v0 }
 0x3d4   : > { %5284 = vmatpush3.bf16.msra.mxu1 %v5808_v0 }
 0x3d5   : > { %5537 = vmatprep.subr.bf16.mxu1 %v6237_v18 }
 0x4a2   : > { %v5271_v7 = vpop.f32.mrb[8].mxu1 }
 0x4a3   : > { %v1185_v9 = vpop.f32.mrb[9].mxu1  ;;  %v1194_v11 = vadd.f32 %v5271_v7, %v5016_v8 }
 0x4a4   : > { %v5272_v10 = vpop.f32.mrb[10].mxu1  ;;  %v1186_v14 = vadd.f32 %v5016_v8, %v1185_v9 }
 0x4a5   : > { %v1197_v12 = vadd.f32 %v5272_v10, %v5016_v8  ;;  %v1188_v13 = vpop.f32.mrb[11].mxu1 }
 0x4a6   : > { %v1189_v15 = vadd.f32 %v5016_v8, %v1188_v13 }
 0x4a7   : > { %v1272_v16 = vpack.c.bf16 %v1197_v12, %v1194_v11 }
 0x4a8   : > { %v1271_v17 = vpack.c.bf16 %v1189_v15, %v1186_v14 }
 0x4aa   : > { %5285 = vmatprep.mubr.msk.bf16.mxu1 %vm1222_vm7, %v1271_v17 }
 0x4ab   : > { %5286 = vmatmul.mubr.msk.bf16.vlgmr.msra.gmra.mrb[12].mxu1 %vm1222_vm7, %v1272_v16 }
 0x4ac   : > { %5300 = vmatprep.mubr.msk.f32.mxu1 %vm6236_vm6, %v6235_v2 }
 0x57e   : > { %v5287_v23 = vpop.f32.mrb[12].mxu1 }
 0x57f   : > { %v1330_v25 = vpop.f32.mrb[13].mxu1  ;;  %v1339_v27 = vadd.f32 %v5287_v23, %v5024_v24 }
 0x580   : > { %v5288_v26 = vpop.f32.mrb[14].mxu1  ;;  %v1331_v30 = vadd.f32 %v5024_v24, %v1330_v25 }
 0x581   : > { %v1342_v28 = vadd.f32 %v5288_v26, %v5024_v24  ;;  %v1333_v29 = vpop.f32.mrb[15].mxu1 }
 0x582   : > { %v1334_v31 = vadd.f32 %v5024_v24, %v1333_v29 }
 0x583   : > { %v6783_v33 = vpack.i.bf16 %v1342_v28, %v1339_v27  ;;  %v5538_v34 = vpack.c.bf16 %v1342_v28, %v1339_v27 }
 0x584   : > { %v5534_v35 = vpack.c.bf16 %v1334_v31, %v1331_v30  ;;  %v6785_v36 = vpack.i.bf16 %v1334_v31, %v1331_v30 }
 0x585   : > { %5712 = vrot.lane.b32.xlu1 %v6783_v33, %s6238_s13  ;;  %5540 = vmatpush3.bf16.xpose.msk.msra.mxu1 %vm6779_vm8, %v5538_v34 }
 0x586   : > { %5536 = vmatpush3.bf16.xpose.msk.msra.mxu0 %vm6779_vm8, %v5534_v35  ;;  %5544 = vmatprep.subr.bf16.mxu1 %v6237_v18 }
 0x587   : > { %5541 = vmatprep.subr.bf16.mxu0 %v6237_v18 }
 0x589   : > { %5717 = vrot.lane.b32.xlu1 %v6785_v36, %s6239_s1 }
 0x58c   : > { %5301 = vmatmul.mubr.msk.f32.vlgmr.msra.gmra.mrb[16].mxu1 %vm923_vm2, %v6796_v38 }
 0x58d   : > { %5722 = vrot.lane.b32.xlu1 %v6783_v33, %s6239_s1  ;;  %5294 = vmatmul.mubr.msk.f32.vlgmr.msra.gmra.mrb[8].mxu0 %vm923_vm2, %v6798_v39 }
 0x58e   : > { %5314 = vmatprep.mubr.msk.f32.mxu1 %vm6236_vm6, %v6235_v2  ;;  %5307 = vmatprep.mubr.msk.f32.mxu0 %vm6236_vm6, %v6235_v2 }
 0x5f7   : > { %v5713_v40 = vpop.permute.xlu1 %5712 }
 0x5f8   : > { %v5715_v41 = vunpack.i.h.bf16 %v5713_v40  ;;  %v5714_v42 = vunpack.i.l.bf16 %v5713_v40 }
 0x5fa   : > { %v5545_v43 = vpack.c.bf16 %v5715_v41, %v5714_v42 }
 0x5fb   : > { %v5718_v3 = vpop.permute.xlu1 %5717 }
 0x5fc   : > { %5546 = vmatpush3.bf16.msra.mxu1 %v5545_v43  ;;  %v5720_v13 = vunpack.i.h.bf16 %v5718_v3  ;;  %v5719_v14 = vunpack.i.l.bf16 %v5718_v3 }
 0x5fd   : > { %5551 = vmatprep.subr.bf16.mxu1 %v6237_v18 }
 0x5fe   : > { %v5548_v19 = vpack.c.bf16 %v5720_v13, %v5719_v14 }
 0x5ff   : > { %v5723_v6 = vpop.permute.xlu1 %5722 }
 0x600   : > { %v5725_v9 = vunpack.i.h.bf16 %v5723_v6  ;;  %v5724_v10 = vunpack.i.l.bf16 %v5723_v6 }
 0x602   : > { %v5552_v15 = vpack.c.bf16 %v5725_v9, %v5724_v10 }
 0x65f   : > { %v1499_v44 = vpop.f32.mrb[16].mxu1 }
 0x660   : > { %v1420_v45 = vpop.f32.mrb[8].mxu0  ;;  %v5302_v46 = vpop.f32.mrb[17].mxu1  ;;  %v1504_v49 = vmul.f32 0.35355338, %v1499_v44 }
 0x661   : > { %v1503_v47 = vmul.f32 0.35355338, %v1420_v45  ;;  %v5295_v48 = vpop.f32.mrb[9].mxu0 }
 0x662   : > { %v1508_v51 = vsel %vm1144_vm5, %v1504_v49, -inf }
 0x663   : > { %v1505_v50 = vsel %vm1144_vm5, %v1503_v47, -inf }
 0x664   : > { %1506 = vmax.xlane.f32.xlu0 %v1505_v50 }
 0x668   : > { %1509 = vmax.xlane.f32.xlu0 %v1508_v51 }
 0x67e   : > { %5707 = vrot.lane.b32.xlu0 %v6785_v36, %s6238_s13 }
 0x682   : > { %1685 = vrot.lane.b32.xlu0 %v6798_v39, %s6239_s1 }
 0x6f1   : > { %v1507_v52 = vpop.xlane.xlu0 %1506 }
 0x6f2   : > { %v1511_v53 = vsub.f32 %v1503_v47, %v1507_v52 }
 0x6f4   : > { %v1513_v56 = vmul.f32 1.442695, %v1511_v53 }
 0x6f5   : > { %v1510_v54 = vpop.xlane.xlu0 %1509 }
 0x6f6   : > { %v1512_v55 = vsub.f32 %v1504_v49, %v1510_v54 }
 0x6f8   : > { %v1515_v57 = vmul.f32 1.442695, %v1512_v55 }
 0x6f9   : > { %v5708_v58 = vpop.permute.xlu0 %5707 }
 0x6fa   : > { %5825 = vpow2.f32 %v1515_v57  ;;  %v5710_v59 = vunpack.i.h.bf16 %v5708_v58  ;;  %v5709_v60 = vunpack.i.l.bf16 %v5708_v58 }
 0x6fb   : > { %5827 = vpow2.f32 %v1513_v56 }
 0x6fc   : > { %v5542_v61 = vpack.c.bf16 %v5710_v59, %v5709_v60 }
 0x6fd   : > { %v1686_v21 = vpop.permute.xlu0 %1685 }
 0x6fe   : > { %5543 = vmatpush3.bf16.msra.mxu0 %v5542_v61 }
 0x6ff   : > { %5547 = vmatprep.subr.bf16.mxu0 %v6237_v18 }
 0x704   : > { %v5826_v62 = vpop.eup %5825 }
 0x705   : > { %v1520_v63 = vsel %vm1144_vm5, %v5826_v62, 0.0  ;;  %v5828_v0 = vpop.eup %5827 }
 0x706   : > { %1521 = vadd.xlane.f32.xlu1 %v1520_v63  ;;  %v1517_v1 = vsel %vm1144_vm5, %v5828_v0, 0.0 }
 0x70a   : > { %1518 = vadd.xlane.f32.xlu1 %v1517_v1 }
 0x71b   : > { %1767 = vrot.lane.b32.xlu1 %v6796_v38, %s6239_s1 }
 0x793   : > { %v1522_v7 = vpop.xlane.xlu1 %1521 }
 0x794   : > { %5829 = vrcp.f32 %v1522_v7 }
 0x797   : > { %v1519_v8 = vpop.xlane.xlu1 %1518 }
 0x798   : > { %5831 = vrcp.f32 %v1519_v8 }
 0x79b   : > { %v1768_v20 = vpop.permute.xlu1 %1767 }
 0x79e   : > { %v5830_v11 = vpop.eup %5829 }
 0x79f   : > { %v1526_v12 = vmul.f32 %v5830_v11, %v5826_v62 }
 0x7a1   : > { %5315 = vmatmul.mubr.msk.f32.vlgmr.msra.gmra.mrb[18].mxu1 %vm1144_vm5, %v1526_v12 }
 0x7a2   : > { %v5832_v16 = vpop.eup %5831  ;;  %5554 = vmatpush3.bf16.xpose.msk.msra.mxu1 %vm6779_vm8, %v5552_v15  ;;  %5328 = vmatprep.mubr.msk.f32.mxu1 %vm6236_vm6, %v6235_v2 }
 0x7a3   : > { %v1525_v17 = vmul.f32 %v5832_v16, %v5828_v0  ;;  %5558 = vmatprep.subr.bf16.mxu1 %v6237_v18 }
 0x7a5   : > { %5308 = vmatmul.mubr.msk.f32.vlgmr.msra.gmra.mrb[10].mxu0 %vm1144_vm5, %v1525_v17 }
 0x7a6   : > { %5550 = vmatpush3.bf16.xpose.msk.msra.mxu0 %vm6779_vm8, %v5548_v19  ;;  %5321 = vmatprep.mubr.msk.f32.mxu0 %vm6236_vm6, %v6235_v2 }
 0x7a7   : > { %5555 = vmatprep.subr.bf16.mxu0 %v6237_v18 }
 0x7a9   : > { %5329 = vmatmul.mubr.msk.f32.vlgmr.msra.gmra.mrb[20].mxu1 %vm923_vm2, %v1768_v20 }
 0x7aa   : > { %5342 = vmatprep.mubr.msk.f32.mxu1 %vm6236_vm6, %v6235_v2 }
 0x7ad   : > { %5322 = vmatmul.mubr.msk.f32.vlgmr.msra.gmra.mrb[12].mxu0 %vm923_vm2, %v1686_v21 }
 0x7ae   : > { %5335 = vmatprep.mubr.msk.f32.mxu0 %vm6236_vm6, %v6235_v2 }
 0x874   : > { %v6842_v22 = vpop.f32.mrb[18].mxu1 }
 0x875   : > { %v5316_v23 = vpop.f32.mrb[19].mxu1 }
 0x878   : > { %v6844_v24 = vpop.f32.mrb[10].mxu0 }
 0x879   : > { %v5309_v25 = vpop.f32.mrb[11].mxu0 }
 0x87c   : > { %v1845_v26 = vpop.f32.mrb[20].mxu1 }
 0x87d   : > { %v1850_v27 = vmul.f32 0.35355338, %v1845_v26  ;;  %v5330_v28 = vpop.f32.mrb[21].mxu1 }
 0x87f   : > { %v1854_v29 = vsel %vm1144_vm5, %v1850_v27, -inf }
 0x880   : > { %1855 = vmax.xlane.f32.xlu1 %v1854_v29  ;;  %v1763_v30 = vpop.f32.mrb[12].mxu0 }
 0x881   : > { %v1849_v31 = vmul.f32 0.35355338, %v1763_v30  ;;  %v5323_v34 = vpop.f32.mrb[13].mxu0 }
 0x883   : > { %v1851_v35 = vsel %vm1144_vm5, %v1849_v31, -inf }
 0x884   : > { %1852 = vmax.xlane.f32.xlu0 %v1851_v35 }
 0x891   : > { %5732 = vrot.lane.b32.xlu1 %v6783_v33, %s6240_s8 }
 0x895   : > { %5737 = vrot.lane.b32.xlu1 %v6785_v36, %s6241_s24 }
 0x899   : > { %5742 = vrot.lane.b32.xlu1 %v6783_v33, %s6241_s24 }
 0x89d   : > { %2113 = vrot.lane.b32.xlu1 %v6796_v38, %s6241_s24 }
 0x90d   : > { %v1856_v37 = vpop.xlane.xlu1 %1855 }
 0x90e   : > { %v1858_v40 = vsub.f32 %v1850_v27, %v1856_v37 }
 0x910   : > { %v1861_v41 = vmul.f32 1.442695, %v1858_v40 }
 0x911   : > { %v5733_v42 = vpop.permute.xlu1 %5732  ;;  %v1853_v43 = vpop.xlane.xlu0 %1852 }
 0x912   : > { %5833 = vpow2.f32 %v1861_v41  ;;  %v5735_v44 = vunpack.i.h.bf16 %v5733_v42  ;;  %v5734_v45 = vunpack.i.l.bf16 %v5733_v42  ;;  %v1857_v46 = vsub.f32 %v1849_v31, %v1853_v43 }
 0x914   : > { %v5559_v47 = vpack.c.bf16 %v5735_v44, %v5734_v45  ;;  %v1859_v48 = vmul.f32 1.442695, %v1857_v46 }
 0x915   : > { %v5738_v53 = vpop.permute.xlu1 %5737 }
 0x916   : > { %5835 = vpow2.f32 %v1859_v48  ;;  %5560 = vmatpush3.bf16.msra.mxu1 %v5559_v47  ;;  %v5740_v6 = vunpack.i.h.bf16 %v5738_v53  ;;  %v5739_v7 = vunpack.i.l.bf16 %v5738_v53 }
 0x917   : > { %5565 = vmatprep.subr.bf16.mxu1 %v6237_v18 }
 0x918   : > { %v5562_v9 = vpack.c.bf16 %v5740_v6, %v5739_v7 }
 0x919   : > { %v5743_v56 = vpop.permute.xlu1 %5742 }
 0x91a   : > { %v5745_v58 = vunpack.i.h.bf16 %v5743_v56  ;;  %v5744_v59 = vunpack.i.l.bf16 %v5743_v56 }
 0x91c   : > { %v5834_v49 = vpop.eup %5833  ;;  %v5566_v1 = vpack.c.bf16 %v5745_v58, %v5744_v59 }
 0x91d   : > { %v1866_v50 = vsel %vm1144_vm5, %v5834_v49, 0.0  ;;  %v2114_v10 = vpop.permute.xlu1 %2113 }
 0x91e   : > { %1867 = vadd.xlane.f32.xlu0 %v1866_v50 }
 0x920   : > { %v5836_v51 = vpop.eup %5835 }
 0x921   : > { %v1863_v52 = vsel %vm1144_vm5, %v5836_v51, 0.0 }
 0x922   : > { %1864 = vadd.xlane.f32.xlu0 %v1863_v52 }
 0x938   : > { %5727 = vrot.lane.b32.xlu0 %v6785_v36, %s6240_s8 }
 0x93c   : > { %2031 = vrot.lane.b32.xlu0 %v6798_v39, %s6241_s24 }
 0x9ab   : > { %v1868_v54 = vpop.xlane.xlu0 %1867 }
 0x9ac   : > { %5837 = vrcp.f32 %v1868_v54 }
 0x9af   : > { %v1865_v55 = vpop.xlane.xlu0 %1864 }
 0x9b0   : > { %5839 = vrcp.f32 %v1865_v55 }
 0x9b3   : > { %v5728_v57 = vpop.permute.xlu0 %5727 }
 0x9b4   : > { %v5730_v60 = vunpack.i.h.bf16 %v5728_v57  ;;  %v5729_v61 = vunpack.i.l.bf16 %v5728_v57 }
 0x9b6   : > { %v5838_v62 = vpop.eup %5837  ;;  %v5556_v63 = vpack.c.bf16 %v5730_v60, %v5729_v61 }
 0x9b7   : > { %v1872_v0 = vmul.f32 %v5838_v62, %v5834_v49  ;;  %v2032_v11 = vpop.permute.xlu0 %2031 }
 0x9b8   : > { %5557 = vmatpush3.bf16.msra.mxu0 %v5556_v63 }
 0x9b9   : > { %5343 = vmatmul.mubr.msk.f32.vlgmr.msra.gmra.mrb[22].mxu1 %vm1144_vm5, %v1872_v0  ;;  %5561 = vmatprep.subr.bf16.mxu0 %v6237_v18 }
 0x9ba   : > { %v5840_v3 = vpop.eup %5839  ;;  %5568 = vmatpush3.bf16.xpose.msk.msra.mxu1 %vm6779_vm8, %v5566_v1  ;;  %5356 = vmatprep.mubr.msk.f32.mxu1 %vm6236_vm6, %v6235_v2 }
 0x9bb   : > { %v1871_v8 = vmul.f32 %v5840_v3, %v5836_v51  ;;  %5572 = vmatprep.subr.bf16.mxu1 %v6237_v18 }
 0x9bd   : > { %5336 = vmatmul.mubr.msk.f32.vlgmr.msra.gmra.mrb[14].mxu0 %vm1144_vm5, %v1871_v8 }
 0x9be   : > { %5349 = vmatprep.mubr.msk.f32.mxu0 %vm6236_vm6, %v6235_v2 }
 0x9c1   : > { %5357 = vmatmul.mubr.msk.f32.vlgmr.msra.gmra.mrb[24].mxu1 %vm923_vm2, %v2114_v10  ;;  %5564 = vmatpush3.bf16.xpose.msk.msra.mxu0 %vm6779_vm8, %v5562_v9 }
 0x9c2   : > { %5370 = vmatprep.mubr.msk.f32.mxu1 %vm6236_vm6, %v6235_v2  ;;  %5569 = vmatprep.subr.bf16.mxu0 %v6237_v18 }
 0x9c8   : > { %5350 = vmatmul.mubr.msk.f32.vlgmr.msra.gmra.mrb[16].mxu0 %vm923_vm2, %v2032_v11 }
 0x9c9   : > { %5363 = vmatprep.mubr.msk.f32.mxu0 %vm6236_vm6, %v6235_v2 }
 0xa8c   : > { %v6882_v12 = vpop.f32.mrb[22].mxu1 }
 0xa8d   : > { %v5344_v13 = vpop.f32.mrb[23].mxu1 }
 0xa90   : > { %v6884_v14 = vpop.f32.mrb[14].mxu0 }
 0xa91   : > { %v5776_v15 = vpack.i.bf16 %v6882_v12, %v6884_v14  ;;  %v5337_v16 = vpop.f32.mrb[15].mxu0 }
 0xa94   : > { %v2191_v17 = vpop.f32.mrb[24].mxu1 }
 0xa95   : > { %v2196_v19 = vmul.f32 0.35355338, %v2191_v17  ;;  %v5358_v20 = vpop.f32.mrb[25].mxu1 }
 0xa97   : > { %v2200_v21 = vsel %vm1144_vm5, %v2196_v19, -inf }
 0xa98   : > { %2201 = vmax.xlane.f32.xlu1 %v2200_v21 }
 0xa9b   : > { %v2109_v23 = vpop.f32.mrb[16].mxu0 }
 0xa9c   : > { %v2195_v25 = vmul.f32 0.35355338, %v2109_v23  ;;  %v5351_v26 = vpop.f32.mrb[17].mxu0 }
 0xa9e   : > { %v2197_v27 = vsel %vm1144_vm5, %v2195_v25, -inf }
 0xa9f   : > { %2198 = vmax.xlane.f32.xlu0 %v2197_v27 }
 0xaa9   : > { %5752 = vrot.lane.b32.xlu1 %v6783_v33, %s6242_s19 }
 0xaad   : > { %5757 = vrot.lane.b32.xlu1 %v6785_v36, %s6243_s10 }
 0xab1   : > { %5762 = vrot.lane.b32.xlu1 %v6783_v33, %s6243_s10 }
 0xab5   : > { %2459 = vrot.lane.b32.xlu1 %v6796_v38, %s6243_s10 }
 0xb25   : > { %v2202_v28 = vpop.xlane.xlu1 %2201 }
 0xb26   : > { %v2204_v29 = vsub.f32 %v2196_v19, %v2202_v28 }
 0xb28   : > { %v2207_v30 = vmul.f32 1.442695, %v2204_v29 }
 0xb29   : > { %v5753_v31 = vpop.permute.xlu1 %5752 }
 0xb2a   : > { %5841 = vpow2.f32 %v2207_v30  ;;  %v5755_v34 = vunpack.i.h.bf16 %v5753_v31  ;;  %v5754_v35 = vunpack.i.l.bf16 %v5753_v31 }
 0xb2c   : > { %v5573_v37 = vpack.c.bf16 %v5755_v34, %v5754_v35  ;;  %v2199_v40 = vpop.xlane.xlu0 %2198 }
 0xb2d   : > { %v2203_v41 = vsub.f32 %v2195_v25, %v2199_v40  ;;  %v5758_v46 = vpop.permute.xlu1 %5757 }
 0xb2e   : > { %5574 = vmatpush3.bf16.msra.mxu1 %v5573_v37  ;;  %v5760_v59 = vunpack.i.h.bf16 %v5758_v46  ;;  %v5759_v60 = vunpack.i.l.bf16 %v5758_v46 }
 0xb2f   : > { %v2205_v42 = vmul.f32 1.442695, %v2203_v41  ;;  %5579 = vmatprep.subr.bf16.mxu1 %v6237_v18 }
 0xb30   : > { %v5576_v63 = vpack.c.bf16 %v5760_v59, %v5759_v60 }
 0xb31   : > { %5843 = vpow2.f32 %v2205_v42  ;;  %v5763_v48 = vpop.permute.xlu1 %5762 }
 0xb32   : > { %v5765_v50 = vunpack.i.h.bf16 %v5763_v48  ;;  %v5764_v51 = vunpack.i.l.bf16 %v5763_v48 }
 0xb34   : > { %v5842_v43 = vpop.eup %5841  ;;  %v5580_v57 = vpack.c.bf16 %v5765_v50, %v5764_v51 }
 0xb35   : > { %v2212_v44 = vsel %vm1144_vm5, %v5842_v43, 0.0  ;;  %v2460_v62 = vpop.permute.xlu1 %2459 }
 0xb36   : > { %2213 = vadd.xlane.f32.xlu0 %v2212_v44 }
 0xb3b   : > { %v5844_v38 = vpop.eup %5843 }
 0xb3c   : > { %v2209_v45 = vsel %vm1144_vm5, %v5844_v38, 0.0 }
 0xb3d   : > { %2210 = vadd.xlane.f32.xlu0 %v2209_v45 }
 0xb53   : > { %5747 = vrot.lane.b32.xlu0 %v6785_v36, %s6242_s19 }
 0xb57   : > { %2377 = vrot.lane.b32.xlu0 %v6798_v39, %s6243_s10 }
 0xbc3   : > { %v2214_v47 = vpop.xlane.xlu0 %2213 }
 0xbc4   : > { %5845 = vrcp.f32 %v2214_v47  ;;  %v5812_v47 = vld [vmem:[%s6696_s9 + $0x8] sm:$0xff]  }
 0xbca   : > { %v2211_v49 = vpop.xlane.xlu0 %2210 }
 0xbcb   : > { %5847 = vrcp.f32 %v2211_v49 }
 0xbce   : > { %v5846_v52 = vpop.eup %5845  ;;  %v5748_v53 = vpop.permute.xlu0 %5747 }
 0xbcf   : > { %v2218_v54 = vmul.f32 %v5846_v52, %v5842_v43  ;;  %v5750_v55 = vunpack.i.h.bf16 %v5748_v53  ;;  %v5749_v56 = vunpack.i.l.bf16 %v5748_v53 }
 0xbd1   : > { %v5570_v58 = vpack.c.bf16 %v5750_v55, %v5749_v56  ;;  %5371 = vmatmul.mubr.msk.f32.vlgmr.msra.gmra.mrb[26].mxu1 %vm1144_vm5, %v2218_v54 }
 0xbd2   : > { %5582 = vmatpush3.bf16.xpose.msk.msra.mxu1 %vm6779_vm8, %v5580_v57  ;;  %5384 = vmatprep.mubr.msk.f32.mxu1 %vm6236_vm6, %v6235_v2  ;;  %v2378_v0 = vpop.permute.xlu0 %2377 }
 0xbd3   : > { %5571 = vmatpush3.bf16.msra.mxu0 %v5570_v58  ;;  %5586 = vmatprep.subr.bf16.mxu1 %v6237_v18 }
 0xbd4   : > { %5575 = vmatprep.subr.bf16.mxu0 %v6237_v18 }
 0xbd5   : > { %v5848_v39 = vpop.eup %5847 }
 0xbd6   : > { %v2217_v61 = vmul.f32 %v5848_v39, %v5844_v38  ;;  %v5811_v38 = vld [vmem:[%s6696_s9] sm:$0xff]   ;;  %s6248_s9 = smov 64  }
 0xbd8   : > { %5364 = vmatmul.mubr.msk.f32.vlgmr.msra.gmra.mrb[18].mxu0 %vm1144_vm5, %v2217_v61 }
 0xbd9   : > { %5385 = vmatmul.mubr.msk.f32.vlgmr.msra.gmra.mrb[28].mxu1 %vm923_vm2, %v2460_v62  ;;  %5377 = vmatprep.mubr.msk.f32.mxu0 %vm6236_vm6, %v6235_v2 }
 0xbda   : > { %5398 = vmatprep.mubr.msk.f32.mxu1 %vm6236_vm6, %v6235_v2 }
 0xbdc   : > { %5578 = vmatpush3.bf16.xpose.msk.msra.mxu0 %vm6779_vm8, %v5576_v63 }
 0xbdd   : > { %5583 = vmatprep.subr.bf16.mxu0 %v6237_v18 }
 0xbe3   : > { %5378 = vmatmul.mubr.msk.f32.vlgmr.msra.gmra.mrb[20].mxu0 %vm923_vm2, %v2378_v0 }
 0xbe4   : > { %5391 = vmatprep.mubr.msk.f32.mxu0 %vm6236_vm6, %v6235_v2 }
 0xca4   : > { %v2373_v1 = vpop.f32.mrb[26].mxu1 }
 0xca5   : > { %v5372_v3 = vpop.f32.mrb[27].mxu1 }
 0xca6   : > { %v5061_v3 = vld [vmem:[%s6720_s6 + $0x6] ss:$0 sm:$0xff] }
 0xcab   : > { %v2294_v6 = vpop.f32.mrb[18].mxu0 }
 0xcac   : > { %v2537_v7 = vpop.f32.mrb[28].mxu1  ;;  %v5781_v8 = vpack.i.bf16 %v2373_v1, %v2294_v6  ;;  %v5365_v9 = vpop.f32.mrb[19].mxu0 }
 0xcad   : > { %v2542_v10 = vmul.f32 0.35355338, %v2537_v7  ;;  %v5386_v11 = vpop.f32.mrb[29].mxu1 }
 0xcaf   : > { %v2546_v13 = vsel %vm1144_vm5, %v2542_v10, -inf }
 0xcb0   : > { %2547 = vmax.xlane.f32.xlu1 %v2546_v13 }
 0xcb6   : > { %v2455_v32 = vpop.f32.mrb[20].mxu0 }
 0xcb7   : > { %v2541_v16 = vmul.f32 0.35355338, %v2455_v32  ;;  %v5379_v18 = vpop.f32.mrb[21].mxu0 }
 0xcb9   : > { %v2543_v17 = vsel %vm1144_vm5, %v2541_v16, -inf }
 0xcba   : > { %2544 = vmax.xlane.f32.xlu0 %v2543_v17 }
 0xcc1   : > { %5772 = vrot.lane.b32.xlu1 %v6783_v33, %s6244_s18 }
 0xcc5   : > { %5777 = vrot.lane.b32.xlu1 %v5776_v15, %s6245_s20 }
 0xcc9   : > { %5782 = vrot.lane.b32.xlu1 %v5781_v8, %s6246_s17 }
 0xd3d   : > { %v2548_v19 = vpop.xlane.xlu1 %2547 }
 0xd3e   : > { %v2550_v20 = vsub.f32 %v2542_v10, %v2548_v19 }
 0xd40   : > { %v2553_v21 = vmul.f32 1.442695, %v2550_v20 }
 0xd41   : > { %v5773_v23 = vpop.permute.xlu1 %5772 }
 0xd42   : > { %5849 = vpow2.f32 %v2553_v21  ;;  %v5775_v25 = vunpack.i.h.bf16 %v5773_v23  ;;  %v5774_v26 = vunpack.i.l.bf16 %v5773_v23 }
 0xd44   : > { %v5587_v27 = vpack.c.bf16 %v5775_v25, %v5774_v26 }
 0xd45   : > { %v5778_v51 = vpop.permute.xlu1 %5777 }
 0xd46   : > { %5588 = vmatpush3.bf16.msra.mxu1 %v5587_v27  ;;  %v5780_v53 = vunpack.i.h.bf16 %v5778_v51  ;;  %v5779_v54 = vunpack.i.l.bf16 %v5778_v51 }
 0xd47   : > { %v2545_v28 = vpop.xlane.xlu0 %2544  ;;  %5409 = vmatprep.subr.bf16.mxu1 %v6235_v2 }
 0xd48   : > { %v2549_v33 = vsub.f32 %v2541_v16, %v2545_v28  ;;  %v2748_v58 = vsel %vm923_vm2, %v6842_v22, %v5780_v53  ;;  %v2747_v39 = vsel %vm923_vm2, %v6844_v24, %v5779_v54  ;;  %v5813_v22 = vld [vmem:[%s6701_s22] sm:$0xff]   ;;  %v5814_v24 = vld [vmem:[%s6701_s22 + $0x8] sm:$0xff]   ;;  %s6249_s22 = smov 56  }
 0xd49   : > { %v5783_v52 = vpop.permute.xlu1 %5782  ;;  %v5068_v16 = vld [vmem:[%s6720_s6 + $0x7] ss:$0 sm:$0xff] }
 0xd4a   : > { %v2551_v29 = vmul.f32 1.442695, %v2549_v33  ;;  %v5785_v55 = vunpack.i.h.bf16 %v5783_v52  ;;  %v5784_v56 = vunpack.i.l.bf16 %v5783_v52 }
 0xd4c   : > { %v5850_v30 = vpop.eup %5849  ;;  %5851 = vpow2.f32 %v2551_v29  ;;  %v2750_v61 = vsel %vm1144_vm5, %v2748_v58, %v5785_v55  ;;  %v2749_v62 = vsel %vm1144_vm5, %v2747_v39, %v5784_v56  ;;  %v5069_v55 = vld [vmem:[%s6720_s6 + $0xc] ss:$0 sm:$0xff]  ;;  %v5070_v39 = vld [vmem:[%s6720_s6 + $0xd] ss:$0 sm:$0xff] }
 0xd4d   : > { %v2558_v12 = vsel %vm1144_vm5, %v5850_v30, 0.0 }
 0xd4e   : > { %2559 = vadd.xlane.f32.xlu0 %v2558_v12 }
 0xd56   : > { %v5852_v14 = vpop.eup %5851 }
 0xd57   : > { %v2555_v15 = vsel %vm1144_vm5, %v5852_v14, 0.0 }
 0xd58   : > { %2556 = vadd.xlane.f32.xlu0 %v2555_v15 }
 0xd6e   : > { %5767 = vrot.lane.b32.xlu0 %v6785_v36, %s6244_s18 }
 0xddb   : > { %v2560_v31 = vpop.xlane.xlu0 %2559 }
 0xddc   : > { %5853 = vrcp.f32 %v2560_v31 }
 0xde5   : > { %v2557_v34 = vpop.xlane.xlu0 %2556 }
 0xde6   : > { %v5854_v35 = vpop.eup %5853  ;;  %5855 = vrcp.f32 %v2557_v34  ;;  %v5815_v34 = vld [vmem:[%s6706_s29] sm:$0xff]  }
 0xde7   : > { %v2564_v37 = vmul.f32 %v5854_v35, %v5850_v30  ;;  %v5816_v35 = vld [vmem:[%s6706_s29 + $0x8] sm:$0xff]   ;;  %s6250_s29 = smov 48  }
 0xde9   : > { %5399 = vmatmul.mubr.msk.f32.vlgmr.msra.gmra.mrb[30].mxu1 %vm1144_vm5, %v2564_v37  ;;  %v5768_v40 = vpop.permute.xlu0 %5767 }
 0xdea   : > { %v5770_v41 = vunpack.i.h.bf16 %v5768_v40  ;;  %v5769_v42 = vunpack.i.l.bf16 %v5768_v40  ;;  %5413 = vmatprep.mubr.msk.bf16.mxu1 %vm6236_vm6, %v6235_v2  ;;  %5410 = vmatpush3.bf16.msra.mxu1 %v5813_v22 }
 0xdeb   : > { %5411 = vmatprep.subr.bf16.mxu1 %v6235_v2 }
 0xdec   : > { %v5584_v43 = vpack.c.bf16 %v5770_v41, %v5769_v42 }
 0xdee   : > { %5585 = vmatpush3.bf16.msra.mxu0 %v5584_v43  ;;  %5412 = vmatpush3.bf16.msra.mxu1 %v5814_v24 }
 0xdef   : > { %5401 = vmatprep.subr.bf16.mxu0 %v6235_v2  ;;  %5425 = vmatprep.subr.mxu1 %v6235_v2 }
 0xdf0   : > { %v5856_v36 = vpop.eup %5855 }
 0xdf1   : > { %v2563_v44 = vmul.f32 %v5856_v36, %v5852_v14 }
 0xdf3   : > { %5392 = vmatmul.mubr.msk.f32.vlgmr.msra.gmra.mrb[22].mxu0 %vm1144_vm5, %v2563_v44 }
 0xdf4   : > { %5405 = vmatprep.mubr.msk.bf16.mxu0 %vm6236_vm6, %v6235_v2  ;;  %5402 = vmatpush3.bf16.msra.mxu0 %v5811_v38 }
 0xdf5   : > { %5403 = vmatprep.subr.bf16.mxu0 %v6235_v2 }
 0xdf8   : > { %5404 = vmatpush3.bf16.msra.mxu0 %v5812_v47 }
 0xdf9   : > { %5417 = vmatprep.subr.bf16.mxu0 %v6235_v2 }
 0xebc   : > { %v2719_v45 = vpop.f32.mrb[30].mxu1 }
 0xebd   : > { %v5400_v46 = vpop.f32.mrb[31].mxu1 }
 0xec6   : > { %v2640_v48 = vpop.f32.mrb[22].mxu0 }
 0xec7   : > { %v5786_v49 = vpack.i.bf16 %v2719_v45, %v2640_v48  ;;  %v5393_v50 = vpop.f32.mrb[23].mxu0 }
 0xec9   : > { %5787 = vrot.lane.b32.xlu0 %v5786_v49, %s6247_s27 }
 0xf3b   : > { %v5788_v57 = vpop.permute.xlu0 %5787 }
 0xf3c   : > { %v5790_v59 = vunpack.i.h.bf16 %v5788_v57  ;;  %v5789_v60 = vunpack.i.l.bf16 %v5788_v57 }
 0xf3e   : > { %v2753_v63 = vsel %vm2751_vm9, %v2750_v61, %v5790_v59  ;;  %v2752_v0 = vsel %vm2751_vm9, %v2749_v62, %v5789_v60 }
 0xf3f   : > { %v2758_v1 = vpack.c.bf16 %v2753_v63, %v2752_v0  ;;  %v5071_v63 = vld [vmem:[%s6720_s6 + $0x8] ss:$0 sm:$0xff] }
 0xf41   : > { %5406 = vmatmul.mubr.msk.bf16.vlgmr.msra.gmra.mrb[24].mxu0 %vm1222_vm7, %v2758_v1 }
 0xf42   : > { %5421 = vmatprep.mubr.msk.bf16.mxu0 %vm6236_vm6, %v6235_v2  ;;  %5418 = vmatpush3.bf16.msra.mxu0 %v5815_v34 }
 0xf43   : > { %5419 = vmatprep.subr.bf16.mxu0 %v6235_v2 }
 0xf46   : > { %5420 = vmatpush3.bf16.msra.mxu0 %v5816_v35 }
 0xf47   : > { %5435 = vmatprep.subr.mxu0 %v6235_v2 }
0x1014   : > { %v2813_v6 = vpop.f32.mrb[24].mxu0 }
0x1015   : > { %v5407_v7 = vpop.f32.mrb[25].mxu0  ;;  %v2814_v9 = vadd.f32 %v5061_v3, %v2813_v6 }
0x1016   : > { %v2816_v8 = vpop.f32.mrb[26].mxu0 }
0x1017   : > { %v2817_v10 = vadd.f32 %v5061_v3, %v2816_v8  ;;  %v5408_v11 = vpop.f32.mrb[27].mxu0 }
0x1019   : > { %v2824_v13 = vpack.c.bf16 %v2817_v10, %v2814_v9 }
0x101b   : > { %5414 = vmatmul.mubr.msk.bf16.vlgmr.msra.gmra.mrb[32].mxu1 %vm1222_vm7, %v2824_v13 }
0x101c   : > { %5427 = vmatprep.mubr.msk.f32.mxu1 %vm6236_vm6, %v6235_v2 }
0x10ee   : > { %v2874_v32 = vpop.f32.mrb[32].mxu1 }
0x10ef   : > { %v2881_v18 = vadd.f32 %v2874_v32, %v6759_v4  ;;  %v5415_v17 = vpop.f32.mrb[33].mxu1 }
0x10f0   : > { %v2877_v19 = vpop.f32.mrb[34].mxu1 }
0x10f1   : > { %v2882_v20 = vadd.f32 %v2877_v19, %v6761_v5  ;;  %v5416_v21 = vpop.f32.mrb[35].mxu1  ;;  %v2888_v23 = vadd.f32 %v5068_v16, %v2881_v18 }
0x10f3   : > { %v2892_v25 = vsel %vm1222_vm7, %v2888_v23, 0.0  ;;  %v2889_v26 = vadd.f32 %v5068_v16, %v2882_v20 }
0x10f4   : > { %2893 = vadd.xlane.f32.xlu1 %v2892_v25 }
0x10f5   : > { %v2895_v27 = vsel %vm1222_vm7, %v2889_v26, 0.0 }
0x10f6   : > { %2896 = vadd.xlane.f32.xlu0 %v2895_v27 }
0x1181   : > { %v2894_v28 = vpop.xlane.xlu1 %2893 }
0x1182   : > { %v2899_v33 = vmul.f32 0.03125, %v2894_v28 }
0x1183   : > { %v2897_v29 = vpop.xlane.xlu0 %2896 }
0x1184   : > { %v2901_v30 = vsub.f32 %v2888_v23, %v2899_v33  ;;  %v2900_v4 = vmul.f32 0.03125, %v2897_v29 }
0x1186   : > { %v2902_v12 = vsub.f32 %v2889_v26, %v2900_v4  ;;  %v2903_v14 = vmul.f32 %v2901_v30, %v2901_v30 }
0x1188   : > { %v2905_v5 = vsel %vm1222_vm7, %v2903_v14, 0.0  ;;  %v2904_v15 = vmul.f32 %v2902_v12, %v2902_v12 }
0x1189   : > { %2906 = vadd.xlane.f32.xlu0 %v2905_v5 }
0x118a   : > { %v2908_v31 = vsel %vm1222_vm7, %v2904_v15, 0.0 }
0x118d   : > { %2909 = vadd.xlane.f32.xlu0 %v2908_v31 }
0x1216   : > { %v2907_v37 = vpop.xlane.xlu0 %2906 }
0x1217   : > { %v2911_v40 = vmul.f32 0.032258064, %v2907_v37 }
0x1219   : > { %5857 = vrsqrt.f32 %v2911_v40  ;;  %vm2915_vm10 = vcmp.eq.f32.partialorder %v2911_v40, inf  ;;  %v2918_v44 = vand.u32 2147483648, %v2911_v40  ;;  %vm2917_vm11 = vcmp.eq.f32.partialorder %v2911_v40, 0.0 }
0x121a   : > { %v2910_v41 = vpop.xlane.xlu0 %2909 }
0x121b   : > { %v2912_v42 = vmul.f32 0.032258064, %v2910_v41 }
0x121d   : > { %5859 = vrsqrt.f32 %v2912_v42  ;;  %vm2922_vm12 = vcmp.eq.f32.partialorder %v2912_v42, inf  ;;  %v2925_v49 = vand.u32 2147483648, %v2912_v42  ;;  %vm2924_vm13 = vcmp.eq.f32.partialorder %v2912_v42, 0.0 }
0x1223   : > { %v5858_v43 = vpop.eup %5857 }
0x1224   : > { %v2914_v36 = vmul.f32 %v5858_v43, %v2911_v40 }
0x1226   : > { %v2916_v38 = vsel %vm2915_vm10, %v2911_v40, %v2914_v36 }
0x1227   : > { %v5860_v45 = vpop.eup %5859  ;;  %v2919_v46 = vsel %vm2917_vm11, %v2918_v44, %v2916_v38 }
0x1228   : > { %v2927_v47 = vadd.f32 1e-06, %v2919_v46  ;;  %v2921_v48 = vmul.f32 %v5860_v45, %v2912_v42 }
0x122a   : > { %5861 = vrcp.f32 %v2927_v47  ;;  %v2923_v50 = vsel %vm2922_vm12, %v2912_v42, %v2921_v48 }
0x122b   : > { %v2926_v51 = vsel %vm2924_vm13, %v2925_v49, %v2923_v50 }
0x122c   : > { %v2928_v52 = vadd.f32 1e-06, %v2926_v51 }
0x122e   : > { %5863 = vrcp.f32 %v2928_v52 }
0x1234   : > { %v5862_v53 = vpop.eup %5861 }
0x1235   : > { %v2931_v54 = vmul.f32 %v5862_v53, %v2901_v30 }
0x1237   : > { %v2937_v58 = vmul.f32 %v5069_v55, %v2931_v54 }
0x1238   : > { %v5864_v56 = vpop.eup %5863 }
0x1239   : > { %v2932_v57 = vmul.f32 %v5864_v56, %v2902_v12  ;;  %v6982_v60 = vadd.f32 %v5070_v39, %v2937_v58 }
0x123b   : > { %v2938_v59 = vmul.f32 %v5069_v55, %v2932_v57 }
0x123d   : > { %v6984_v61 = vadd.f32 %v5070_v39, %v2938_v59 }
0x123f   : > { %v2949_v62 = vpack.c.bf16 %v6984_v61, %v6982_v60 }
0x1241   : > { %5422 = vmatmul.mubr.msk.bf16.vlgmr.msra.gmra.mrb[28].mxu0 %vm1222_vm7, %v2949_v62 }
0x1242   : > { %5437 = vmatprep.mubr.msk.f32.mxu0 %vm6236_vm6, %v6235_v2 }
0x1314   : > { %v3004_v0 = vpop.f32.mrb[28].mxu0 }
0x1315   : > { %v6992_v1 = vadd.f32 %v5071_v63, %v3004_v0  ;;  %v5423_v22 = vpop.f32.mrb[29].mxu0 }
0x1316   : > { %v3007_v24 = vpop.f32.mrb[30].mxu0 }
0x1317   : > { %v6994_v3 = vadd.f32 %v5071_v63, %v3007_v24  ;;  %3012 = vrot.lane.b32.xlu1 %v6992_v1, %s6238_s13  ;;  %v5424_v6 = vpop.f32.mrb[31].mxu0 }
0x1319   : > { %3089 = vrot.lane.b32.xlu0 %v6994_v3, %s6238_s13 }
0x1389   : > { %v3013_v7 = vpop.permute.xlu1 %3012 }
0x138a   : > { %5426 = vmatpush3.xpose.msk.msra.mxu1 %vm923_vm2, %v3013_v7 }
0x138b   : > { %5430 = vmatprep.subr.mxu1 %v6235_v2  ;;  %v3090_v8 = vpop.permute.xlu0 %3089 }
0x138d   : > { %5428 = vmatmul.mubr.msk.f32.vlgmr.msra.gmra.mrb[36].mxu1 %vm923_vm2, %v6992_v1 }
0x138e   : > { %5431 = vmatpush3.xpose.msk.msra.mxu1 %vm923_vm2, %v3090_v8  ;;  %5432 = vmatprep.mubr.msk.f32.mxu1 %vm6236_vm6, %v6235_v2 }
0x138f   : > { %5440 = vmatprep.subr.mxu1 %v6235_v2 }
0x1391   : > { %5433 = vmatmul.mubr.msk.f32.vlgmr.msra.gmra.mrb[38].mxu1 %vm923_vm2, %v6994_v3 }
0x1392   : > { %5442 = vmatprep.mubr.msk.f32.mxu1 %vm6236_vm6, %v6235_v2 }
0x1460   : > { %v3084_v9 = vpop.f32.mrb[36].mxu1 }
0x1461   : > { %v3165_v10 = vmul.f32 0.35355338, %v3084_v9  ;;  %v5429_v11 = vpop.f32.mrb[37].mxu1 }
0x1463   : > { %v3167_v13 = vsel %vm923_vm2, %v3165_v10, -inf }
0x1464   : > { %3168 = vmax.xlane.f32.xlu1 %v3167_v13  ;;  %v3161_v32 = vpop.f32.mrb[38].mxu1 }
0x1465   : > { %v3166_v16 = vmul.f32 0.35355338, %v3161_v32  ;;  %v5434_v18 = vpop.f32.mrb[39].mxu1 }
0x1467   : > { %v3170_v17 = vsel %vm923_vm2, %v3166_v16, -inf }
0x1468   : > { %3171 = vmax.xlane.f32.xlu0 %v3170_v17 }
0x1475   : > { %3189 = vrot.lane.b32.xlu1 %v6992_v1, %s6248_s9 }
0x1479   : > { %3343 = vrot.lane.b32.xlu1 %v6992_v1, %s6240_s8 }
0x147d   : > { %3421 = vrot.lane.b32.xlu1 %v6994_v3, %s6240_s8 }
0x147e   : > { %3265 = vrot.lane.b32.xlu0 %v6994_v3, %s6248_s9 }
0x14f1   : > { %v3169_v19 = vpop.xlane.xlu1 %3168 }
0x14f2   : > { %v3173_v20 = vsub.f32 %v3165_v10, %v3169_v19 }
0x14f4   : > { %v3175_v21 = vmul.f32 1.442695, %v3173_v20 }
0x14f5   : > { %v3190_v23 = vpop.permute.xlu1 %3189  ;;  %v3172_v25 = vpop.xlane.xlu0 %3171 }
0x14f6   : > { %5865 = vpow2.f32 %v3175_v21  ;;  %v3174_v26 = vsub.f32 %v3166_v16, %v3172_v25  ;;  %5436 = vmatpush3.msra.mxu0 %v3190_v23 }
0x14f7   : > { %5445 = vmatprep.subr.mxu0 %v6235_v2 }
0x14f8   : > { %v3177_v27 = vmul.f32 1.442695, %v3174_v26 }
0x14f9   : > { %v3266_v28 = vpop.permute.xlu0 %3265  ;;  %v3344_v12 = vpop.permute.xlu1 %3343 }
0x14fa   : > { %5867 = vpow2.f32 %v3177_v27  ;;  %5441 = vmatpush3.msra.mxu1 %v3266_v28 }
0x14fb   : > { %5450 = vmatprep.subr.mxu1 %v6235_v2 }
0x14fd   : > { %v3422_v14 = vpop.permute.xlu1 %3421 }
0x1500   : > { %v5866_v33 = vpop.eup %5865 }
0x1501   : > { %v3179_v29 = vsel %vm923_vm2, %v5866_v33, 0.0 }
0x1502   : > { %3180 = vadd.xlane.f32.xlu1 %v3179_v29 }
0x1504   : > { %v5868_v30 = vpop.eup %5867 }
0x1505   : > { %v3182_v4 = vsel %vm923_vm2, %v5868_v30, 0.0 }
0x1506   : > { %3183 = vadd.xlane.f32.xlu0 %v3182_v4 }
0x1513   : > { %3341 = vrot.lane.b32.xlu1 %v6992_v1, %s6239_s1 }
0x151c   : > { %3419 = vrot.lane.b32.xlu0 %v6994_v3, %s6239_s1 }
0x158f   : > { %v3181_v5 = vpop.xlane.xlu1 %3180 }
0x1590   : > { %5869 = vrcp.f32 %v3181_v5 }
0x1593   : > { %v3184_v15 = vpop.xlane.xlu0 %3183  ;;  %v3342_v40 = vpop.permute.xlu1 %3341 }
0x1594   : > { %5871 = vrcp.f32 %v3184_v15 }
0x1597   : > { %v3420_v41 = vpop.permute.xlu0 %3419 }
0x159a   : > { %v5870_v31 = vpop.eup %5869 }
0x159b   : > { %v3187_v34 = vmul.f32 %v5870_v31, %v5866_v33 }
0x159d   : > { %5438 = vmatmul.mubr.msk.f32.vlgmr.msra.gmra.mrb[32].mxu0 %vm923_vm2, %v3187_v34 }
0x159e   : > { %v5872_v35 = vpop.eup %5871  ;;  %5446 = vmatpush3.xpose.msk.msra.mxu0 %vm923_vm2, %v3344_v12  ;;  %5447 = vmatprep.mubr.msk.f32.mxu0 %vm6236_vm6, %v6235_v2 }
0x159f   : > { %v3188_v37 = vmul.f32 %v5872_v35, %v5868_v30  ;;  %5455 = vmatprep.subr.mxu0 %v6235_v2 }
0x15a1   : > { %5443 = vmatmul.mubr.msk.f32.vlgmr.msra.gmra.mrb[40].mxu1 %vm923_vm2, %v3188_v37  ;;  %5448 = vmatmul.mubr.msk.f32.vlgmr.msra.gmra.mrb[34].mxu0 %vm923_vm2, %v3342_v40 }
0x15a2   : > { %5451 = vmatpush3.xpose.msk.msra.mxu1 %vm923_vm2, %v3422_v14  ;;  %5452 = vmatprep.mubr.msk.f32.mxu1 %vm6236_vm6, %v6235_v2 }
0x15a3   : > { %5460 = vmatprep.subr.mxu1 %v6235_v2  ;;  %5457 = vmatprep.mubr.msk.f32.mxu0 %vm6236_vm6, %v6235_v2 }
0x15a5   : > { %5453 = vmatmul.mubr.msk.f32.vlgmr.msra.gmra.mrb[42].mxu1 %vm923_vm2, %v3420_v41 }
0x15a6   : > { %5462 = vmatprep.mubr.msk.f32.mxu1 %vm6236_vm6, %v6235_v2 }
0x1670   : > { %v7044_v42 = vpop.f32.mrb[32].mxu0 }
0x1671   : > { %v5439_v43 = vpop.f32.mrb[33].mxu0 }
0x1674   : > { %v7046_v36 = vpop.f32.mrb[40].mxu1  ;;  %v3415_v44 = vpop.f32.mrb[34].mxu0 }
0x1675   : > { %v3497_v38 = vmul.f32 0.35355338, %v3415_v44  ;;  %v5444_v45 = vpop.f32.mrb[41].mxu1  ;;  %v5449_v46 = vpop.f32.mrb[35].mxu0 }
0x1677   : > { %v3499_v47 = vsel %vm923_vm2, %v3497_v38, -inf }
0x1678   : > { %v3493_v48 = vpop.f32.mrb[42].mxu1  ;;  %3500 = vmax.xlane.f32.xlu1 %v3499_v47 }
0x1679   : > { %v3498_v49 = vmul.f32 0.35355338, %v3493_v48  ;;  %v5454_v50 = vpop.f32.mrb[43].mxu1 }
0x167b   : > { %v3502_v51 = vsel %vm923_vm2, %v3498_v49, -inf }
0x167c   : > { %3503 = vmax.xlane.f32.xlu0 %v3502_v51 }
0x1689   : > { %3521 = vrot.lane.b32.xlu1 %v6992_v1, %s6249_s22 }
0x168d   : > { %3675 = vrot.lane.b32.xlu1 %v6992_v1, %s6242_s19 }
0x1691   : > { %3753 = vrot.lane.b32.xlu1 %v6994_v3, %s6242_s19 }
0x1692   : > { %3597 = vrot.lane.b32.xlu0 %v6994_v3, %s6249_s22 }
0x1695   : > { %3673 = vrot.lane.b32.xlu1 %v6992_v1, %s6241_s24 }
0x1705   : > { %v3501_v52 = vpop.xlane.xlu1 %3500 }
0x1706   : > { %v3505_v53 = vsub.f32 %v3497_v38, %v3501_v52 }
0x1708   : > { %v3507_v54 = vmul.f32 1.442695, %v3505_v53 }
0x1709   : > { %v3504_v55 = vpop.xlane.xlu0 %3503  ;;  %v3522_v56 = vpop.permute.xlu1 %3521 }
0x170a   : > { %5873 = vpow2.f32 %v3507_v54  ;;  %v3506_v57 = vsub.f32 %v3498_v49, %v3504_v55  ;;  %5456 = vmatpush3.msra.mxu0 %v3522_v56 }
0x170b   : > { %5465 = vmatprep.subr.mxu0 %v6235_v2 }
0x170c   : > { %v3509_v58 = vmul.f32 1.442695, %v3506_v57 }
0x170d   : > { %v3598_v39 = vpop.permute.xlu0 %3597  ;;  %v3676_v6 = vpop.permute.xlu1 %3675 }
0x170e   : > { %5875 = vpow2.f32 %v3509_v58  ;;  %5461 = vmatpush3.msra.mxu1 %v3598_v39 }
0x170f   : > { %5470 = vmatprep.subr.mxu1 %v6235_v2 }
0x1711   : > { %v3754_v8 = vpop.permute.xlu1 %3753 }
0x1714   : > { %v5874_v59 = vpop.eup %5873 }
0x1715   : > { %v3511_v62 = vsel %vm923_vm2, %v5874_v59, 0.0  ;;  %v3674_v13 = vpop.permute.xlu1 %3673 }
0x1716   : > { %3512 = vadd.xlane.f32.xlu0 %v3511_v62 }
0x1718   : > { %v5876_v63 = vpop.eup %5875 }
0x1719   : > { %v3514_v0 = vsel %vm923_vm2, %v5876_v63, 0.0 }
0x171a   : > { %3515 = vadd.xlane.f32.xlu0 %v3514_v0 }
0x1730   : > { %3751 = vrot.lane.b32.xlu0 %v6994_v3, %s6241_s24 }
0x17a3   : > { %v3513_v22 = vpop.xlane.xlu0 %3512 }
0x17a4   : > { %5877 = vrcp.f32 %v3513_v22 }
0x17a7   : > { %v3516_v24 = vpop.xlane.xlu0 %3515 }
0x17a8   : > { %5879 = vrcp.f32 %v3516_v24 }
0x17ab   : > { %v3752_v32 = vpop.permute.xlu0 %3751 }
0x17ae   : > { %v5878_v7 = vpop.eup %5877 }
0x17af   : > { %v3519_v9 = vmul.f32 %v5878_v7, %v5874_v59 }
0x17b1   : > { %5458 = vmatmul.mubr.msk.f32.vlgmr.msra.gmra.mrb[36].mxu0 %vm923_vm2, %v3519_v9 }
0x17b2   : > { %v5880_v10 = vpop.eup %5879  ;;  %5466 = vmatpush3.xpose.msk.msra.mxu0 %vm923_vm2, %v3676_v6  ;;  %5467 = vmatprep.mubr.msk.f32.mxu0 %vm6236_vm6, %v6235_v2 }
0x17b3   : > { %v3520_v11 = vmul.f32 %v5880_v10, %v5876_v63  ;;  %5475 = vmatprep.subr.mxu0 %v6235_v2 }
0x17b5   : > { %5463 = vmatmul.mubr.msk.f32.vlgmr.msra.gmra.mrb[44].mxu1 %vm923_vm2, %v3520_v11  ;;  %5468 = vmatmul.mubr.msk.f32.vlgmr.msra.gmra.mrb[38].mxu0 %vm923_vm2, %v3674_v13 }
0x17b6   : > { %5471 = vmatpush3.xpose.msk.msra.mxu1 %vm923_vm2, %v3754_v8  ;;  %5472 = vmatprep.mubr.msk.f32.mxu1 %vm6236_vm6, %v6235_v2 }
0x17b7   : > { %5480 = vmatprep.subr.mxu1 %v6235_v2  ;;  %5477 = vmatprep.mubr.msk.f32.mxu0 %vm6236_vm6, %v6235_v2 }
0x17b9   : > { %5473 = vmatmul.mubr.msk.f32.vlgmr.msra.gmra.mrb[46].mxu1 %vm923_vm2, %v3752_v32 }
0x17ba   : > { %5482 = vmatprep.mubr.msk.f32.mxu1 %vm6236_vm6, %v6235_v2 }
0x1884   : > { %v7080_v16 = vpop.f32.mrb[36].mxu0 }
0x1885   : > { %v5459_v18 = vpop.f32.mrb[37].mxu0 }
0x1888   : > { %v7082_v17 = vpop.f32.mrb[44].mxu1  ;;  %v3747_v19 = vpop.f32.mrb[38].mxu0 }
0x1889   : > { %v5791_v20 = vpack.i.bf16 %v7082_v17, %v7080_v16  ;;  %v3829_v21 = vmul.f32 0.35355338, %v3747_v19  ;;  %v5464_v23 = vpop.f32.mrb[45].mxu1  ;;  %v5469_v25 = vpop.f32.mrb[39].mxu0 }
0x188b   : > { %v3831_v26 = vsel %vm923_vm2, %v3829_v21, -inf }
0x188c   : > { %v3825_v27 = vpop.f32.mrb[46].mxu1  ;;  %3832 = vmax.xlane.f32.xlu1 %v3831_v26  ;;  %v5818_v26 = vld [vmem:[%s739_s21 + $0x8] sm:$0xff]  }
0x188d   : > { %v3830_v28 = vmul.f32 0.35355338, %v3825_v27  ;;  %v5474_v33 = vpop.f32.mrb[47].mxu1 }
0x188f   : > { %v3834_v29 = vsel %vm923_vm2, %v3830_v28, -inf }
0x1890   : > { %3835 = vmax.xlane.f32.xlu0 %v3834_v29 }
0x189d   : > { %3853 = vrot.lane.b32.xlu1 %v6992_v1, %s6250_s29 }
0x18a1   : > { %4007 = vrot.lane.b32.xlu1 %v6992_v1, %s6244_s18 }
0x18a5   : > { %4085 = vrot.lane.b32.xlu1 %v6994_v3, %s6244_s18 }
0x18a6   : > { %3929 = vrot.lane.b32.xlu0 %v6994_v3, %s6250_s29 }
0x18a9   : > { %4005 = vrot.lane.b32.xlu1 %v6992_v1, %s6243_s10 }
0x1919   : > { %v3833_v30 = vpop.xlane.xlu1 %3832 }
0x191a   : > { %v3837_v4 = vsub.f32 %v3829_v21, %v3833_v30 }
0x191c   : > { %v3839_v12 = vmul.f32 1.442695, %v3837_v4 }
0x191d   : > { %v3836_v14 = vpop.xlane.xlu0 %3835  ;;  %v3854_v5 = vpop.permute.xlu1 %3853 }
0x191e   : > { %5881 = vpow2.f32 %v3839_v12  ;;  %v3838_v15 = vsub.f32 %v3830_v28, %v3836_v14  ;;  %5476 = vmatpush3.msra.mxu0 %v3854_v5 }
0x191f   : > { %5485 = vmatprep.subr.mxu0 %v6235_v2 }
0x1920   : > { %v3841_v31 = vmul.f32 1.442695, %v3838_v15 }
0x1921   : > { %v3930_v34 = vpop.permute.xlu0 %3929  ;;  %v4008_v38 = vpop.permute.xlu1 %4007 }
0x1922   : > { %5883 = vpow2.f32 %v3841_v31  ;;  %5481 = vmatpush3.msra.mxu1 %v3930_v34 }
0x1923   : > { %5490 = vmatprep.subr.mxu1 %v6235_v2 }
0x1925   : > { %v4086_v46 = vpop.permute.xlu1 %4085 }
0x1928   : > { %v5882_v35 = vpop.eup %5881 }
0x1929   : > { %v3843_v37 = vsel %vm923_vm2, %v5882_v35, 0.0  ;;  %v4006_v50 = vpop.permute.xlu1 %4005 }
0x192a   : > { %3844 = vadd.xlane.f32.xlu0 %v3843_v37 }
0x192c   : > { %v5884_v40 = vpop.eup %5883 }
0x192d   : > { %v3846_v41 = vsel %vm923_vm2, %v5884_v40, 0.0 }
0x192e   : > { %3847 = vadd.xlane.f32.xlu0 %v3846_v41 }
0x1944   : > { %4083 = vrot.lane.b32.xlu0 %v6994_v3, %s6243_s10 }
0x19b7   : > { %v3845_v43 = vpop.xlane.xlu0 %3844 }
0x19b8   : > { %5885 = vrcp.f32 %v3845_v43 }
0x19bb   : > { %v3848_v44 = vpop.xlane.xlu0 %3847 }
0x19bc   : > { %5887 = vrcp.f32 %v3848_v44 }
0x19bf   : > { %v4084_v51 = vpop.permute.xlu0 %4083 }
0x19c2   : > { %v5886_v45 = vpop.eup %5885 }
0x19c3   : > { %v3851_v47 = vmul.f32 %v5886_v45, %v5882_v35 }
0x19c5   : > { %5478 = vmatmul.mubr.msk.f32.vlgmr.msra.gmra.mrb[40].mxu0 %vm923_vm2, %v3851_v47  ;;  %v5821_v47 = vld [vmem:[%s6711_s30] sm:$0xff]  }
0x19c6   : > { %v5888_v48 = vpop.eup %5887  ;;  %5486 = vmatpush3.xpose.msk.msra.mxu0 %vm923_vm2, %v4008_v38  ;;  %5487 = vmatprep.mubr.msk.f32.mxu0 %vm6236_vm6, %v6235_v2 }
0x19c7   : > { %v3852_v49 = vmul.f32 %v5888_v48, %v5884_v40  ;;  %5495 = vmatprep.subr.mxu0 %v6235_v2  ;;  %v5822_v48 = vld [vmem:[%s6711_s30 + $0x8] sm:$0xff]  }
0x19c9   : > { %5483 = vmatmul.mubr.msk.f32.vlgmr.msra.gmra.mrb[48].mxu1 %vm923_vm2, %v3852_v49  ;;  %5488 = vmatmul.mubr.msk.f32.vlgmr.msra.gmra.mrb[42].mxu0 %vm923_vm2, %v4006_v50  ;;  %v5099_v49 = vld [vmem:[%s6720_s6 + $0x9] ss:$0 sm:$0xff] }
0x19ca   : > { %5491 = vmatpush3.xpose.msk.msra.mxu1 %vm923_vm2, %v4086_v46  ;;  %5492 = vmatprep.mubr.msk.f32.mxu1 %vm6236_vm6, %v6235_v2 }
0x19cb   : > { %5500 = vmatprep.subr.mxu1 %v6235_v2  ;;  %5497 = vmatprep.mubr.msk.f32.mxu0 %vm6236_vm6, %v6235_v2 }
0x19cd   : > { %5493 = vmatmul.mubr.msk.f32.vlgmr.msra.gmra.mrb[50].mxu1 %vm923_vm2, %v4084_v51 }
0x19ce   : > { %5502 = vmatprep.mubr.msk.f32.mxu1 %vm6236_vm6, %v6235_v2 }
0x1a98   : > { %v3925_v52 = vpop.f32.mrb[40].mxu0 }
0x1a99   : > { %v5479_v53 = vpop.f32.mrb[41].mxu0 }
0x1a9c   : > { %v4001_v54 = vpop.f32.mrb[48].mxu1  ;;  %v4079_v55 = vpop.f32.mrb[42].mxu0 }
0x1a9d   : > { %v5796_v56 = vpack.i.bf16 %v4001_v54, %v3925_v52  ;;  %v4161_v57 = vmul.f32 0.35355338, %v4079_v55  ;;  %v5484_v58 = vpop.f32.mrb[49].mxu1  ;;  %v5489_v39 = vpop.f32.mrb[43].mxu0 }
0x1a9e   : > { %v5824_v58 = vld [vmem:[%s6711_s30 + $0x18] sm:$0xff]  }
0x1a9f   : > { %v4163_v59 = vsel %vm923_vm2, %v4161_v57, -inf  ;;  %v5103_v39 = vld [vmem:[%s6720_s6 + $0xa] ss:$0 sm:$0xff] }
0x1aa0   : > { %v4157_v62 = vpop.f32.mrb[50].mxu1  ;;  %4164 = vmax.xlane.f32.xlu1 %v4163_v59 }
0x1aa1   : > { %v4162_v63 = vmul.f32 0.35355338, %v4157_v62  ;;  %v5494_v0 = vpop.f32.mrb[51].mxu1 }
0x1aa3   : > { %v4166_v22 = vsel %vm923_vm2, %v4162_v63, -inf }
0x1aa4   : > { %4167 = vmax.xlane.f32.xlu0 %v4166_v22 }
0x1ab1   : > { %4185 = vrot.lane.b32.xlu1 %v6992_v1, %s6251_s3 }
0x1ab5   : > { %5792 = vrot.lane.b32.xlu1 %v5791_v20, %s6245_s20 }
0x1ab9   : > { %5797 = vrot.lane.b32.xlu1 %v5796_v56, %s6246_s17 }
0x1b2d   : > { %v4165_v24 = vpop.xlane.xlu1 %4164 }
0x1b2e   : > { %v4169_v6 = vsub.f32 %v4161_v57, %v4165_v24  ;;  %v5823_v57 = vld [vmem:[%s6711_s30 + $0x10] sm:$0xff]  }
0x1b30   : > { %v4171_v7 = vmul.f32 1.442695, %v4169_v6 }
0x1b31   : > { %v4168_v8 = vpop.xlane.xlu0 %4167  ;;  %v4186_v9 = vpop.permute.xlu1 %4185 }
0x1b32   : > { %5889 = vpow2.f32 %v4171_v7  ;;  %v4170_v10 = vsub.f32 %v4162_v63, %v4168_v8  ;;  %5496 = vmatpush3.msra.mxu0 %v4186_v9  ;;  %v5107_v9 = vld [vmem:[%s6720_s6 + $0xb] ss:$0 sm:$0xff] }
0x1b33   : > { %5505 = vmatprep.subr.bf16.mxu0 %v6235_v2 }
0x1b34   : > { %v4173_v11 = vmul.f32 1.442695, %v4170_v10 }
0x1b35   : > { %v5793_v4 = vpop.permute.xlu1 %5792 }
0x1b36   : > { %5891 = vpow2.f32 %v4173_v11  ;;  %v5795_v14 = vunpack.i.h.bf16 %v5793_v4  ;;  %v5794_v5 = vunpack.i.l.bf16 %v5793_v4 }
0x1b38   : > { %v4362_v35 = vsel %vm923_vm2, %v7046_v36, %v5795_v14  ;;  %v4361_v37 = vsel %vm923_vm2, %v7044_v42, %v5794_v5  ;;  %v5819_v42 = vld [vmem:[%s748_s16] sm:$0xff]   ;;  %v5820_v36 = vld [vmem:[%s748_s16 + $0x8] sm:$0xff]  }
0x1b39   : > { %v5798_v12 = vpop.permute.xlu1 %5797 }
0x1b3a   : > { %v5800_v15 = vunpack.i.h.bf16 %v5798_v12  ;;  %v5799_v31 = vunpack.i.l.bf16 %v5798_v12 }
0x1b3c   : > { %v5890_v1 = vpop.eup %5889  ;;  %v4363_v43 = vsel %vm1144_vm5, %v4361_v37, %v5799_v31  ;;  %v4364_v44 = vsel %vm1144_vm5, %v4362_v35, %v5800_v15 }
0x1b3d   : > { %v4175_v13 = vsel %vm923_vm2, %v5890_v1, 0.0 }
0x1b3e   : > { %4176 = vadd.xlane.f32.xlu0 %v4175_v13 }
0x1b40   : > { %v5892_v32 = vpop.eup %5891 }
0x1b41   : > { %v4178_v16 = vsel %vm923_vm2, %v5892_v32, 0.0 }
0x1b42   : > { %4179 = vadd.xlane.f32.xlu0 %v4178_v16 }
0x1b58   : > { %4261 = vrot.lane.b32.xlu0 %v6994_v3, %s6251_s3  ;;  %v5817_v3 = vld [vmem:[%s739_s21] sm:$0xff]   ;;  %s7325_s21 = sld [smem:[#allocation37_spill]] (!%p5115_p11) }
0x1bcb   : > { %v4177_v18 = vpop.xlane.xlu0 %4176 }
0x1bcc   : > { %5893 = vrcp.f32 %v4177_v18 }
0x1bcf   : > { %v4180_v17 = vpop.xlane.xlu0 %4179 }
0x1bd0   : > { %5895 = vrcp.f32 %v4180_v17 }
0x1bd3   : > { %v4262_v19 = vpop.permute.xlu0 %4261 }
0x1bd4   : > { %5501 = vmatpush3.msra.mxu1 %v4262_v19 }
0x1bd5   : > { %5513 = vmatprep.subr.bf16.mxu1 %v6235_v2 }
0x1bd6   : > { %v5894_v20 = vpop.eup %5893 }
0x1bd7   : > { %v4183_v21 = vmul.f32 %v5894_v20, %v5890_v1 }
0x1bd9   : > { %5498 = vmatmul.mubr.msk.f32.vlgmr.msra.gmra.mrb[44].mxu0 %vm923_vm2, %v4183_v21 }
0x1bda   : > { %v5896_v23 = vpop.eup %5895  ;;  %5509 = vmatprep.mubr.msk.bf16.mxu0 %vm6236_vm6, %v6235_v2  ;;  %5506 = vmatpush3.bf16.msra.mxu0 %v5817_v3 }
0x1bdb   : > { %v4184_v25 = vmul.f32 %v5896_v23, %v5892_v32  ;;  %5507 = vmatprep.subr.bf16.mxu0 %v6235_v2 }
0x1bdd   : > { %5503 = vmatmul.mubr.msk.f32.vlgmr.msra.gmra.mrb[52].mxu1 %vm923_vm2, %v4184_v25 }
0x1bde   : > { %5517 = vmatprep.mubr.msk.bf16.mxu1 %vm6236_vm6, %v6235_v2  ;;  %5508 = vmatpush3.bf16.msra.mxu0 %v5818_v26 }
0x1bdf   : > { %5521 = vmatprep.subr.bf16.mxu0 %v6235_v2  ;;  %5514 = vmatpush3.bf16.msra.mxu1 %v5819_v42  ;;  %v5114_v42 = vld [vmem:[%s6720_s6 + $0xf] ss:$0 sm:$0xff] }
0x1be0   : > { %5515 = vmatprep.subr.bf16.mxu1 %v6235_v2 }
0x1be3   : > { %5516 = vmatpush3.bf16.msra.mxu1 %v5820_v36 }
0x1cac   : > { %v4257_v27 = vpop.f32.mrb[44].mxu0 }
0x1cad   : > { %v5499_v28 = vpop.f32.mrb[45].mxu0 }
0x1cb0   : > { %v4333_v33 = vpop.f32.mrb[52].mxu1 }
0x1cb1   : > { %v5801_v29 = vpack.i.bf16 %v4333_v33, %v4257_v27  ;;  %v5504_v30 = vpop.f32.mrb[53].mxu1 }
0x1cb3   : > { %5802 = vrot.lane.b32.xlu1 %v5801_v29, %s6247_s27 }
0x1d25   : > { %v5803_v34 = vpop.permute.xlu1 %5802 }
0x1d26   : > { %v5805_v40 = vunpack.i.h.bf16 %v5803_v34  ;;  %v5804_v41 = vunpack.i.l.bf16 %v5803_v34 }
0x1d28   : > { %v4366_v38 = vsel %vm2751_vm9, %v4364_v44, %v5805_v40  ;;  %v4365_v45 = vsel %vm2751_vm9, %v4363_v43, %v5804_v41 }
0x1d29   : > { %v4371_v46 = vpack.c.bf16 %v4366_v38, %v4365_v45  ;;  %v5113_v45 = vld [vmem:[%s6720_s6 + $0xe] ss:$0 sm:$0xff] }
0x1d2b   : > { %5510 = vmatmul.mubr.msk.bf16.vlgmr.msra.gmra.mrb[48].mxu0 %vm1222_vm7, %v4371_v46 }
0x1d2c   : > { %5529 = vmatprep.mubr.msk.bf16.mxu0 %vm6236_vm6, %v6235_v2  ;;  %5522 = vmatpush3.bf16.msra.mxu0 %v5821_v47 }
0x1d2d   : > { %5523 = vmatprep.subr.bf16.mxu0 %v6235_v2 }
0x1d30   : > { %5524 = vmatpush3.bf16.msra.mxu0 %v5822_v48 }
0x1d31   : > { %5525 = vmatprep.subr.bf16.mxu0 %v6235_v2 }
0x1d34   : > { %5526 = vmatpush3.bf16.msra.mxu0 %v5823_v57 }
0x1d35   : > { %5527 = vmatprep.subr.bf16.mxu0 %v6235_v2 }
0x1d38   : > { %5528 = vmatpush3.bf16.msra.mxu0 %v5824_v58 }
0x1dfe   : > { %v4426_v50 = vpop.f32.mrb[48].mxu0 }
0x1dff   : > { %v5511_v51 = vpop.f32.mrb[49].mxu0  ;;  %v4427_v53 = vadd.f32 %v5099_v49, %v4426_v50 }
0x1e00   : > { %v4429_v52 = vpop.f32.mrb[50].mxu0 }
0x1e01   : > { %v4430_v54 = vadd.f32 %v5099_v49, %v4429_v52  ;;  %v5512_v55 = vpop.f32.mrb[51].mxu0 }
0x1e03   : > { %v4437_v56 = vpack.c.bf16 %v4430_v54, %v4427_v53 }
0x1e05   : > { %5518 = vmatmul.mubr.msk.bf16.vlgmr.msra.gmra.mrb[56].mxu1 %vm1222_vm7, %v4437_v56 }
0x1ed8   : > { %v4492_v59 = vpop.f32.mrb[56].mxu1 }
0x1ed9   : > { %v4493_v62 = vadd.f32 %v5103_v39, %v4492_v59  ;;  %v5519_v63 = vpop.f32.mrb[57].mxu1 }
0x1eda   : > { %v4495_v0 = vpop.f32.mrb[58].mxu1 }
0x1edb   : > { %v4496_v22 = vadd.f32 %v5103_v39, %v4495_v0  ;;  %v5520_v24 = vpop.f32.mrb[59].mxu1  ;;  %v4499_v6 = vmax.f32 %v4493_v62, 0.0 }
0x1edd   : > { %v4500_v7 = vmax.f32 %v4496_v22, 0.0 }
0x1edf   : > { %v4509_v8 = vpack.c.bf16 %v4500_v7, %v4499_v6 }
0x1ee1   : > { %5530 = vmatmul.mubr.msk.bf16.vlgmr.msra.gmra.mrb[52].mxu0 %vm4539_vm14, %v4509_v8 }
0x1fb4   : > { %v4577_v10 = vpop.f32.mrb[52].mxu0 }
0x1fb5   : > { %v4578_v11 = vadd.f32 %v5107_v9, %v4577_v10  ;;  %v5531_v1 = vpop.f32.mrb[53].mxu0 }
0x1fb6   : > { %v4580_v13 = vpop.f32.mrb[54].mxu0 }
0x1fb7   : > { %v4581_v2 = vadd.f32 %v5107_v9, %v4580_v13  ;;  %v5532_v32 = vpop.f32.mrb[55].mxu0  ;;  %v4584_v16 = vadd.f32 %v4578_v11, %v6982_v60  ;;  %v4687_v13 = vlaneseq (!%p5115_p11) }
0x1fb9   : > { %v4588_v18 = vsel %vm1222_vm7, %v4584_v16, 0.0  ;;  %v4585_v17 = vadd.f32 %v4581_v2, %v6984_v61 }
0x1fba   : > { %4589 = vadd.xlane.f32.xlu0 %v4588_v18 }
0x1fbb   : > { %v4591_v19 = vsel %vm1222_vm7, %v4585_v17, 0.0 }
0x1fbc   : > { %4592 = vadd.xlane.f32.xlu1 %v4591_v19  ;;  %v4688_v19 = vshrl.u32 (!%p5115_p11), %v4687_v13, 7 }
0x2047   : > { %v4590_v20 = vpop.xlane.xlu0 %4589 }
0x2048   : > { %v4594_v21 = vmul.f32 0.03125, %v4590_v20 }
0x2049   : > { %v4593_v23 = vpop.xlane.xlu1 %4592 }
0x204a   : > { %v4596_v25 = vsub.f32 %v4584_v16, %v4594_v21  ;;  %v4595_v3 = vmul.f32 0.03125, %v4593_v23  ;;  %v4689_v23 = vsub.s32 (!%p5115_p11), 0, %v4688_v19 }
0x204c   : > { %v4597_v26 = vsub.f32 %v4585_v17, %v4595_v3  ;;  %v4598_v27 = vmul.f32 %v4596_v25, %v4596_v25  ;;  %v4695_v3 = vsub.s32 (!%p5115_p11), 1, %v4688_v19 }
0x204e   : > { %v4600_v28 = vsel %vm1222_vm7, %v4598_v27, 0.0  ;;  %v4599_v33 = vmul.f32 %v4597_v26, %v4597_v26 }
0x204f   : > { %4601 = vadd.xlane.f32.xlu0 %v4600_v28 }
0x2050   : > { %v4603_v60 = vsel %vm1222_vm7, %v4599_v33, 0.0 }
0x2053   : > { %4604 = vadd.xlane.f32.xlu0 %v4603_v60 }
0x20dc   : > { %v4602_v29 = vpop.xlane.xlu0 %4601 }
0x20dd   : > { %v4606_v61 = vmul.f32 0.032258064, %v4602_v29 }
0x20df   : > { %5897 = vrsqrt.f32 %v4606_v61  ;;  %vm4610_vm15 = vcmp.eq.f32.partialorder %v4606_v61, inf  ;;  %v4613_v5 = vand.u32 2147483648, %v4606_v61  ;;  %vm4612_vm0 = vcmp.eq.f32.partialorder %v4606_v61, 0.0 }
0x20e0   : > { %v4605_v30 = vpop.xlane.xlu0 %4604 }
0x20e1   : > { %v4607_v4 = vmul.f32 0.032258064, %v4605_v30 }
0x20e3   : > { %5899 = vrsqrt.f32 %v4607_v4  ;;  %vm4617_vm1 = vcmp.eq.f32.partialorder %v4607_v4, inf  ;;  %v4620_v40 = vand.u32 2147483648, %v4607_v4  ;;  %vm4619_vm2 = vcmp.eq.f32.partialorder %v4607_v4, 0.0 }
0x20e9   : > { %v5898_v12 = vpop.eup %5897 }
0x20ea   : > { %v4609_v14 = vmul.f32 %v5898_v12, %v4606_v61 }
0x20ec   : > { %v4611_v15 = vsel %vm4610_vm15, %v4606_v61, %v4609_v14 }
0x20ed   : > { %v5900_v31 = vpop.eup %5899  ;;  %v4614_v34 = vsel %vm4612_vm0, %v4613_v5, %v4611_v15 }
0x20ee   : > { %v4622_v35 = vadd.f32 1e-06, %v4614_v34  ;;  %v4616_v37 = vmul.f32 %v5900_v31, %v4607_v4 }
0x20f0   : > { %5901 = vrcp.f32 %v4622_v35  ;;  %v4618_v41 = vsel %vm4617_vm1, %v4607_v4, %v4616_v37 }
0x20f1   : > { %v4621_v43 = vsel %vm4619_vm2, %v4620_v40, %v4618_v41 }
0x20f2   : > { %v4623_v44 = vadd.f32 1e-06, %v4621_v43 }
0x20f4   : > { %5903 = vrcp.f32 %v4623_v44 }
0x20fa   : > { %v5902_v38 = vpop.eup %5901 }
0x20fb   : > { %v4626_v46 = vmul.f32 %v5902_v38, %v4596_v25  ;;  %v4646_v25 = vld [vmem:[%s7325_s21] sm:$0x3] (!%p5115_p11) }
0x20fc   : > { %v4696_v33 = vrot.slane (!%p5115_p11), %v4646_v25, %v4695_v3 }
0x20fd   : > { %v4632_v36 = vmul.f32 %v5113_v45, %v4626_v46 }
0x20fe   : > { %v5904_v47 = vpop.eup %5903 }
0x20ff   : > { %v4638_v48 = vadd.f32 %v5114_v42, %v4632_v36  ;;  %v4627_v49 = vmul.f32 %v5904_v47, %v4597_v26  ;;  %4645 = sbr.rel (%p5115_p11) target bundleno = 8782 (0x224e), region = 128  ;;  %v4690_v26 = vrot.slane (!%p5115_p11), %v4646_v25, %v4689_v23 }
0x2101   : > { %4640 = vst.msk [vmem:[#allocation2] sm:$0xff] %vm1222_vm7, %v4638_v48  ;;  %v4633_v50 = vmul.f32 %v5113_v45, %v4627_v49  ;;  %v4647_v52 = vsel (!%p5115_p11), %vm1222_vm7, %v4638_v48, 0.0 }
0x2102   : > { %4648 = vadd.xlane.f32.xlu0 (!%p5115_p11), %v4647_v52 }
0x2103   : > { %v4639_v51 = vadd.f32 %v5114_v42, %v4633_v50 }
0x2105   : > { %4641 = vst.msk [vmem:[#allocation2 + $0x8] sm:$0xff] %vm1222_vm7, %v4639_v51  ;;  %v4650_v53 = vsel (!%p5115_p11), %vm1222_vm7, %v4639_v51, 0.0 }
0x2106   : > { %4651 = vadd.xlane.f32.xlu0 %v4650_v53 }
0x218f   : > { %v4649_v54 = vpop.xlane.xlu0 %4648 }
0x2190   : > { %v4653_v55 = vmul.f32 0.03125, %v4649_v54 }
0x2192   : > { %v4655_v56 = vsub.f32 %v4638_v48, %v4653_v55 }
0x2193   : > { %v4652_v57 = vpop.xlane.xlu0 %4651 }
0x2194   : > { %v4654_v58 = vmul.f32 0.03125, %v4652_v57  ;;  %v4657_v39 = vmul.f32 %v4655_v56, %v4655_v56 }
0x2196   : > { %v4656_v59 = vsub.f32 %v4639_v51, %v4654_v58  ;;  %v4659_v62 = vsel %vm1222_vm7, %v4657_v39, 0.0 }
0x2197   : > { %4660 = vadd.xlane.f32.xlu1 %v4659_v62 }
0x2198   : > { %v4658_v63 = vmul.f32 %v4656_v59, %v4656_v59 }
0x219a   : > { %v4662_v0 = vsel %vm1222_vm7, %v4658_v63, 0.0 }
0x219b   : > { %4663 = vadd.xlane.f32.xlu1 %v4662_v0 }
0x2224   : > { %v4661_v22 = vpop.xlane.xlu1 %4660 }
0x2225   : > { %v4665_v24 = vmul.f32 0.032258064, %v4661_v22 }
0x2227   : > { %5905 = vrsqrt.f32 %v4665_v24  ;;  %vm4669_vm3 = vcmp.eq.f32.partialorder %v4665_v24, inf  ;;  %v4672_v10 = vand.u32 2147483648, %v4665_v24  ;;  %vm4671_vm4 = vcmp.eq.f32.partialorder %v4665_v24, 0.0 }
0x2228   : > { %v4664_v6 = vpop.xlane.xlu1 %4663 }
0x2229   : > { %v4666_v7 = vmul.f32 0.032258064, %v4664_v6 }
0x222b   : > { %5907 = vrsqrt.f32 %v4666_v7  ;;  %vm4676_vm5 = vcmp.eq.f32.partialorder %v4666_v7, inf  ;;  %v4679_v18 = vand.u32 2147483648, %v4666_v7  ;;  %vm4678_vm6 = vcmp.eq.f32.partialorder %v4666_v7, 0.0 }
0x2231   : > { %v5906_v8 = vpop.eup %5905 }
0x2232   : > { %v4668_v9 = vmul.f32 %v5906_v8, %v4665_v24 }
0x2234   : > { %v4670_v11 = vsel %vm4669_vm3, %v4665_v24, %v4668_v9 }
0x2235   : > { %v5908_v1 = vpop.eup %5907  ;;  %v4673_v2 = vsel %vm4671_vm4, %v4672_v10, %v4670_v11 }
0x2236   : > { %v4681_v32 = vadd.f32 1e-06, %v4673_v2  ;;  %v4675_v16 = vmul.f32 %v5908_v1, %v4666_v7 }
0x2238   : > { %5909 = vrcp.f32 %v4681_v32  ;;  %v4677_v17 = vsel %vm4676_vm5, %v4666_v7, %v4675_v16 }
0x2239   : > { %v4680_v20 = vsel %vm4678_vm6, %v4679_v18, %v4677_v17 }
0x223a   : > { %v4682_v21 = vadd.f32 1e-06, %v4680_v20 }
0x223c   : > { %5911 = vrcp.f32 %v4682_v21 }
0x2242   : > { %v5910_v27 = vpop.eup %5909 }
0x2243   : > { %v4685_v28 = vmul.f32 %v5910_v27, %v4655_v56 }
0x2245   : > { %v4691_v60 = vmul.f32 %v4690_v26, %v4685_v28 }
0x2246   : > { %v5912_v29 = vpop.eup %5911 }
0x2247   : > { %v4697_v61 = vadd.f32 %v4696_v33, %v4691_v60  ;;  %v4686_v30 = vmul.f32 %v5912_v29, %v4656_v59 }
0x2249   : > { %4699 = vst.msk [vmem:[#allocation14] sm:$0xff] %vm1222_vm7, %v4697_v61  ;;  %v4692_v4 = vmul.f32 %v4690_v26, %v4686_v30 }
0x224b   : > { %v4698_v12 = vadd.f32 %v4696_v33, %v4692_v4 }
0x224d   : > { %4700 = vst.msk [vmem:[#allocation14 + $0x8] sm:$0xff] %vm1222_vm7, %v4698_v12 }
0x224e PF: > { %p5647_p6 = scmp.eq.s32.totalorder %s6363_s28, 1  ;;  %s6252_s16 = smov [#allocation14]  }
0x224f   : > { %s4707_s6 = sshll.u32 %s6252_s16, 4  ;;  %s4708_s6 = int_to_ptr.vmem [resolvable:$true] %s4707_s6 }
0x2250   : > { %s6149_s7 = scalar_lea.vmem %s4708_s6, 256  ;;  %p6156_p9 = scmp.lt.s32.totalorder %s4708_s6, %s4708_s6 }
0x2251   : > { %p6150_p13 = scmp.ne.s32.totalorder %s4708_s6, %s6149_s7  ;;  %p6157_p4 = scmp.lt.s32.totalorder %s6149_s7, %s6149_s7 }
0x2253   : > { %p6151_p10 = pnand %p6150_p13, %p5647_p6  ;;  %p6158_p5 = por %p6157_p4, %p6156_p9 }
0x2255   : > { %p6152_p2 = pneg %p6151_p10 }
0x2257   : > { %p6159_p12 = pnand %p6158_p5, %p6152_p2 }
0x2259   : > { %6162 = shalt.err (!%p6159_p12)
}
0x225a   : > { %s7326_s4 = sld [smem:[#allocation38_spill]] }
0x2260   : > { %s6163_s23 = scalar_lea.hbm %s7326_s4, 256 }
0x2261   : > { %p6164_p3 = scmp.ne.s32.totalorder %s7326_s4, %s6163_s23  ;;  %p6169_p8 = scmp.lt.u32.totalorder %s6163_s23, %s7326_s4 }
0x2263   : > { %p6165_p7 = pnand %p6164_p3, %p5647_p6 }
0x2265   : > { %p6166_p0 = pneg %p6165_p7 }
0x2267   : > { %p6171_p1 = pnand %p6169_p8, %p6166_p0 }
0x2269   : > { %6174 = shalt.err (!%p6171_p1)
}
0x226a   : > { %s6253_s8 = smov 128  }
0x226b   : > { %5613 = dma.vmem_to_hbm [thread:$0]  (%p5647_p6), %s4708_s6, 256, %s7326_s4, [#allocation5], %s6253_s8, %s6253_s8, %s6245_s20  }
0x226c   : > { %6204 = dma.done.wait (%p5647_p6), [#allocation5], 256  }
0x226d   : > { %6206 = vsyncadd (%p5647_p6), [#allocation5], 4294967040 }
0x226e PF: > { %s7327_s27 = sld [smem:[#allocation20_spill]]  ;;  %s7328_s10 = sld [smem:[#allocation19_spill]] }
0x226f   : > { %s7329_s26 = sld [smem:[#allocation21_spill]]  ;;  %s7330_s24 = smov %s6213_s25 }
0x2274   : > { %p27_p11 = scmp.ge.s32.totalorder %s7327_s27, 4   ;;  %s7331_s25 = smov %s7328_s10 }
0x2276   :  { %29 = sbr.rel (!%p27_p11) target bundleno = 22 (0x16), region = 216 }
0x227d   :  { %4723 = vsyncpa [#allocation4], 1 }
0x227e   :  { %4725 = vsyncpa [#allocation4 + $0x1], 1 }
0x227f   :  { %4726 = vsyncpa [#allocation7], 1 }
0x2280   :  { %4727 = vsyncpa [#allocation5], 1 }
0x2281   :  { %4729 = vsyncpa [#allocation5 + $0x1], 1 }

</bundles_post_ra>
